<compile_context>
chip_gen: v7x
topology: tpu7x:2x2x1
jax: 0.10.0
libtpu: 0.0.40
codegen_flags: <defaults>
</compile_context>

<pallas_src>
import functools
import numpy as np
import jax
import jax.numpy as jnp
from jax.experimental import pallas as pl
from jax.experimental.pallas import tpu as pltpu


def _round_up(x, m):
    return (x + m - 1) // m * m


# ----------------------------- fused Pallas kernel -----------------------------

def _actor_fused_kernel(obs_ref, noise_ref,
                        w1_ref, b1_ref, w2_ref, b2_ref,
                        wfc_ref, bfc_ref, g_ref, beta_ref,
                        wt1_ref, bt1_ref, wt2_ref, bt2_ref, wt3_ref, bt3_ref,
                        out_ref, *,
                        action_dim, log_std_min, log_std_max):
    f32 = jnp.float32

    def lin(x, w_ref, b_ref, relu):
        y = jnp.dot(x, w_ref[...], preferred_element_type=f32) + b_ref[...]
        return jnp.maximum(y, 0.0) if relu else y

    # ---- encoder: conv1 -> relu -> conv2 -> relu (convs = Toeplitz matmuls) ----
    x = obs_ref[...]                        # (B, C*H*W) raw pixels; /255 in w1
    h = lin(x, w1_ref, b1_ref, True)        # (B, 512)  valid width 392
    h = lin(h, w2_ref, b2_ref, True)        # (B, 256)  valid width 200

    # ---- fc -> LayerNorm (output_logits=True: no tanh) ----
    h = lin(h, wfc_ref, bfc_ref, False)     # (B, feature_dim)
    mean = jnp.mean(h, axis=-1, keepdims=True)
    var = jnp.mean((h - mean) ** 2, axis=-1, keepdims=True)
    h = (h - mean) * jax.lax.rsqrt(var + 1e-5) * g_ref[...] + beta_ref[...]

    # ---- trunk ----
    h = lin(h, wt1_ref, bt1_ref, True)
    h = lin(h, wt2_ref, bt2_ref, True)
    out = lin(h, wt3_ref, bt3_ref, False)   # (B, 2*action_dim)

    # ---- head ----
    A = action_dim
    mu = out[:, :A]
    log_std = jnp.tanh(out[:, A:2 * A])
    log_std = log_std_min + 0.5 * (log_std_max - log_std_min) * (log_std + 1.0)
    noise = noise_ref[...]
    std = jnp.exp(log_std)
    pi = mu + noise * std

    # gaussian_logprob(noise, log_std)
    log_pi = jnp.sum(-0.5 * noise * noise - log_std, axis=-1, keepdims=True)
    log_pi = log_pi - float(0.5 * np.log(2.0 * np.pi) * A)

    # squash correction; tanh(mu)/tanh(pi) before argmax dropped (monotonic).
    pi_t = jnp.tanh(pi)
    log_pi = log_pi - jnp.sum(
        jnp.log(jnp.maximum(1.0 - pi_t * pi_t, 0.0) + 1e-6),
        axis=-1, keepdims=True)

    def argmax_last(v):  # first-index argmax, torch.argmax convention
        m = jnp.max(v, axis=-1, keepdims=True)
        idx = jax.lax.broadcasted_iota(jnp.int32, v.shape, 1)
        cand = jnp.where(v == m, idx, A)
        return jnp.min(cand, axis=-1, keepdims=True).astype(f32)

    # lane-dense packed output: [mu_idx, pi_idx, log_pi, 0..0, log_std, 0...]
    out_ref[...] = jnp.zeros(out_ref.shape, f32)
    out_ref[:, 0:1] = argmax_last(mu)
    out_ref[:, 1:2] = argmax_last(pi)
    out_ref[:, 2:3] = log_pi
    out_ref[:, 8:8 + A] = log_std


def actor_forward(kparams, obs_nchw, noise, log_std_min, log_std_max):
    """Full Actor.forward with compute_pi=True, compute_log_pi=True."""
    # TODO(synk): detach_encoder is a gradient-flow flag; no-op for forward.
    B = obs_nchw.shape[0]
    A = noise.shape[-1]
    obs_flat = obs_nchw.astype(jnp.float32).reshape(B, -1)  # free reshape (NCHW order)

    operands = (obs_flat, noise,
                kparams["w1"], kparams["b1"], kparams["w2"], kparams["b2"],
                kparams["wfc"], kparams["bfc"], kparams["ln_g"], kparams["ln_b"],
                kparams["wt1"], kparams["bt1"], kparams["wt2"], kparams["bt2"],
                kparams["wt3"], kparams["bt3"])
    in_specs = [pl.BlockSpec(op.shape, lambda i: (0, 0)) for op in operands]
    out_lanes = max(128, _round_up(8 + A, 128))

    packed = pl.pallas_call(
        functools.partial(_actor_fused_kernel,
                          action_dim=A,
                          log_std_min=float(log_std_min),
                          log_std_max=float(log_std_max)),
        out_shape=jax.ShapeDtypeStruct((B, out_lanes), jnp.float32),
        grid=(1,),
        in_specs=in_specs,
        out_specs=pl.BlockSpec((B, out_lanes), lambda i: (0, 0)),
        compiler_params=pltpu.CompilerParams(
            dimension_semantics=("arbitrary",)),
    )(*operands)

    mu_idx = packed[:, 0:1].astype(jnp.int32)      # argmax index of squashed mu
    pi_idx = packed[:, 1:2].astype(jnp.int32)      # argmax index of squashed pi
    log_pi = packed[:, 2:3]
    log_std = packed[:, 8:8 + A]
    return mu_idx, pi_idx, log_pi, log_std


# --------------------- pure-JAX reference (same param layout) ---------------------

def actor_reference(kparams, obs_nchw, noise, log_std_min, log_std_max):
    """Straight-line jnp reimplementation of the same math, for validation."""
    B = obs_nchw.shape[0]
    A = noise.shape[-1]
    x = obs_nchw.astype(jnp.float32).reshape(B, -1)

    def lin(x, w, b, relu):
        y = jnp.dot(x, w, preferred_element_type=jnp.float32) + b
        return jnp.maximum(y, 0.0) if relu else y

    h = lin(x, kparams["w1"], kparams["b1"], True)
    h = lin(h, kparams["w2"], kparams["b2"], True)
    h = lin(h, kparams["wfc"], kparams["bfc"], False)
    mean = jnp.mean(h, axis=-1, keepdims=True)
    var = jnp.mean((h - mean) ** 2, axis=-1, keepdims=True)
    h = (h - mean) * jax.lax.rsqrt(var + 1e-5) * kparams["ln_g"] + kparams["ln_b"]
    h = lin(h, kparams["wt1"], kparams["bt1"], True)
    h = lin(h, kparams["wt2"], kparams["bt2"], True)
    out = lin(h, kparams["wt3"], kparams["bt3"], False)

    mu = out[:, :A]
    log_std = jnp.tanh(out[:, A:2 * A])
    log_std = log_std_min + 0.5 * (log_std_max - log_std_min) * (log_std + 1.0)
    std = jnp.exp(log_std)
    pi = mu + noise * std
    log_pi = jnp.sum(-0.5 * noise * noise - log_std, axis=-1, keepdims=True)
    log_pi = log_pi - 0.5 * np.log(2.0 * np.pi) * A
    pi_t = jnp.tanh(pi)
    log_pi = log_pi - jnp.sum(
        jnp.log(jnp.maximum(1.0 - pi_t * pi_t, 0.0) + 1e-6),
        axis=-1, keepdims=True)
    return mu, pi, log_pi, log_std   # raw mu/pi values (argmax checked separately)


# --------------------- init-time parameter construction ---------------------

def _conv_toeplitz(w_kkio, b, H, W, stride, in_order, scale=1.0):
    """Lower a KxK conv to a dense (H*W*IC, OH*OW*OC) matmul weight.

    Rows index the conv input flattened in `in_order` ('chw' for raw NCHW obs,
    'hwc' for the previous conv's output layout); columns index the output
    flattened in (oh, ow, oc) order.  `scale` folds e.g. the /255 into w.
    """
    w_kkio = np.asarray(w_kkio, np.float32)
    KH, KW, IC, OC = w_kkio.shape
    OH = (H - KH) // stride + 1
    OW = (W - KW) // stride + 1
    Wt = np.zeros((H * W * IC, OH * OW * OC), np.float32)
    for oi in range(OH):
        for oj in range(OW):
            col0 = (oi * OW + oj) * OC
            for kh in range(KH):
                for kw in range(KW):
                    hh = oi * stride + kh
                    ww = oj * stride + kw
                    for ic in range(IC):
                        if in_order == "chw":
                            r = ic * H * W + hh * W + ww
                        else:  # "hwc"
                            r = (hh * W + ww) * IC + ic
                        Wt[r, col0:col0 + OC] += w_kkio[kh, kw, ic, :] * scale
    bt = np.tile(np.asarray(b, np.float32), OH * OW)
    return Wt, bt, OH, OW


def init_params(key, obs_shape, num_filters, feature_dim, hidden_dim, action_dim):
    """Random 'native' parameters in conventional layouts."""
    C, H, W = obs_shape
    OH1 = (H - 3) // 2 + 1
    OW1 = (W - 3) // 2 + 1
    OH2 = OH1 - 2
    OW2 = OW1 - 2
    conv_flat = num_filters * OH2 * OW2
    ks = jax.random.split(key, 6)

    def w(k, shape, scale=0.1):
        return np.asarray(scale * jax.random.normal(k, shape), np.float32)

    return {
        "conv1_w": w(ks[0], (3, 3, C, num_filters)),            # (KH,KW,IC,OC)
        "conv1_b": np.zeros((num_filters,), np.float32),
        "conv2_w": w(ks[1], (3, 3, num_filters, num_filters)),
        "conv2_b": np.zeros((num_filters,), np.float32),
        "fc_w":    w(ks[2], (conv_flat, feature_dim)),          # rows in (C,H,W) order
        "fc_b":    np.zeros((feature_dim,), np.float32),
        "ln_g":    np.ones((feature_dim,), np.float32),
        "ln_b":    np.zeros((feature_dim,), np.float32),
        "t1_w":    w(ks[3], (feature_dim, hidden_dim)),
        "t1_b":    np.zeros((hidden_dim,), np.float32),
        "t2_w":    w(ks[4], (hidden_dim, hidden_dim)),
        "t2_b":    np.zeros((hidden_dim,), np.float32),
        "t3_w":    w(ks[5], (hidden_dim, 2 * action_dim)),
        "t3_b":    np.zeros((2 * action_dim,), np.float32),
    }


def build_kernel_params(native, obs_shape, num_filters):
    """One-time re-layout of native params into the fused-kernel layout."""
    C, H, W = obs_shape

    # conv1: fold /255 into the weights; rows follow the raw NCHW flatten of obs.
    w1, b1, OH1, OW1 = _conv_toeplitz(native["conv1_w"], native["conv1_b"],
                                      H, W, stride=2, in_order="chw",
                                      scale=1.0 / 255.0)
    # conv2: consumes conv1's (oh, ow, oc)-ordered activation.
    w2, b2, OH2, OW2 = _conv_toeplitz(native["conv2_w"], native["conv2_b"],
                                      OH1, OW1, stride=1, in_order="hwc")

    n1 = _round_up(w1.shape[1], 128)     # conv1 activation width, lane aligned
    n2 = _round_up(w2.shape[1], 128)     # conv2 activation width, lane aligned

    w1p = np.zeros((w1.shape[0], n1), np.float32); w1p[:, :w1.shape[1]] = w1
    b1p = np.zeros((n1,), np.float32);             b1p[:b1.shape[0]] = b1
    w2p = np.zeros((n1, n2), np.float32)
    w2p[:w2.shape[0], :w2.shape[1]] = w2
    b2p = np.zeros((n2,), np.float32);             b2p[:b2.shape[0]] = b2

    # fc: reference flattens conv output in (C,H,W) order; ours is (H,W,C).
    # Permute fc rows once at init (removes the runtime transpose), then pad.
    F = num_filters
    perm = np.empty((OH2 * OW2 * F,), np.int32)
    for oi in range(OH2):
        for oj in range(OW2):
            for oc in range(F):
                perm[(oi * OW2 + oj) * F + oc] = oc * OH2 * OW2 + oi * OW2 + oj
    fc_w = native["fc_w"][perm, :]
    fc_wp = np.zeros((n2, fc_w.shape[1]), np.float32)
    fc_wp[:fc_w.shape[0], :] = fc_w

    def row(v):
        return jnp.asarray(np.asarray(v, np.float32).reshape(1, -1))

    return {
        "w1": jnp.asarray(w1p),  "b1": row(b1p),
        "w2": jnp.asarray(w2p),  "b2": row(b2p),
        "wfc": jnp.asarray(fc_wp), "bfc": row(native["fc_b"]),
        "ln_g": row(native["ln_g"]), "ln_b": row(native["ln_b"]),
        "wt1": jnp.asarray(native["t1_w"]), "bt1": row(native["t1_b"]),
        "wt2": jnp.asarray(native["t2_w"]), "bt2": row(native["t2_b"]),
        "wt3": jnp.asarray(native["t3_w"]), "bt3": row(native["t3_b"]),
    }


if __name__ == "__main__":
    # Small shapes consistent with the module:
    #   obs_shape=(4,16,16), action_dim=4, hidden_dim=32, feature_dim=32,
    #   num_layers=2, num_filters=8, log_std_min=-10, log_std_max=2
    B, C, H, W = 2, 4, 16, 16
    num_filters, feature_dim, hidden_dim, action_dim = 8, 32, 32, 4
    log_std_min, log_std_max = -10.0, 2.0

    key = jax.random.PRNGKey(0)
    k_obs, k_noise, k_par = jax.random.split(key, 3)
    obs = jax.random.uniform(k_obs, (B, C, H, W), minval=0.0, maxval=255.0,
                             dtype=jnp.float32)
    noise = jax.random.normal(k_noise, (B, action_dim), dtype=jnp.float32)

    native = init_params(k_par, (C, H, W), num_filters, feature_dim,
                         hidden_dim, action_dim)
    kparams = build_kernel_params(native, (C, H, W), num_filters)

    mu_idx, pi_idx, log_pi, log_std = actor_forward(kparams, obs, noise,
                                                    log_std_min, log_std_max)
    jax.block_until_ready((mu_idx, pi_idx, log_pi, log_std))

    assert mu_idx.shape == (B, 1) and pi_idx.shape == (B, 1)
    assert log_pi.shape == (B, 1) and log_std.shape == (B, action_dim)

    # ---- correctness check against a pure-JAX reference (same param layout) ----
    mu_ref, pi_ref, log_pi_ref, log_std_ref = actor_reference(
        kparams, obs, noise, log_std_min, log_std_max)
    np.testing.assert_allclose(np.asarray(log_pi), np.asarray(log_pi_ref),
                               rtol=5e-3, atol=5e-3)
    np.testing.assert_allclose(np.asarray(log_std), np.asarray(log_std_ref),
                               rtol=5e-3, atol=5e-3)
    # Argmax checked by value (robust to sub-1e-3 float ties between backends).
    mu_sel = np.take_along_axis(np.asarray(mu_ref), np.asarray(mu_idx), axis=-1)
    pi_sel = np.take_along_axis(np.asarray(pi_ref), np.asarray(pi_idx), axis=-1)
    assert np.all(mu_sel >= np.asarray(mu_ref).max(-1, keepdims=True) - 1e-3)
    assert np.all(pi_sel >= np.asarray(pi_ref).max(-1, keepdims=True) - 1e-3)

    print("KERNEL_OK")
</pallas_src>

<mosaic_0001>
module attributes {stable_mosaic.version = 11 : i64} {
  func.func @_actor_fused_kernel(%arg0: i32, %arg1: memref<2x1024xf32, #tpu.memory_space<vmem>>, %arg2: memref<2x4xf32, #tpu.memory_space<vmem>>, %arg3: memref<1024x512xf32, #tpu.memory_space<vmem>>, %arg4: memref<1x512xf32, #tpu.memory_space<vmem>>, %arg5: memref<512x256xf32, #tpu.memory_space<vmem>>, %arg6: memref<1x256xf32, #tpu.memory_space<vmem>>, %arg7: memref<256x32xf32, #tpu.memory_space<vmem>>, %arg8: memref<1x32xf32, #tpu.memory_space<vmem>>, %arg9: memref<1x32xf32, #tpu.memory_space<vmem>>, %arg10: memref<1x32xf32, #tpu.memory_space<vmem>>, %arg11: memref<32x32xf32, #tpu.memory_space<vmem>>, %arg12: memref<1x32xf32, #tpu.memory_space<vmem>>, %arg13: memref<32x32xf32, #tpu.memory_space<vmem>>, %arg14: memref<1x32xf32, #tpu.memory_space<vmem>>, %arg15: memref<32x8xf32, #tpu.memory_space<vmem>>, %arg16: memref<1x8xf32, #tpu.memory_space<vmem>>, %arg17: memref<2x128xf32, #tpu.memory_space<vmem>>) attributes {dimension_semantics = [#tpu.dimension_semantics<arbitrary>], iteration_bounds = array<i64: 1>, scalar_prefetch = 0 : i64, scratch_operands = 0 : i64, tpu.core_type = #tpu.core_type<tc>, window_params = [{pipeline_mode = #tpu.pipeline_mode<synchronous>, transform_indices = @transform_0, window_bounds = array<i64: 2, 1024>}, {pipeline_mode = #tpu.pipeline_mode<synchronous>, transform_indices = @transform_1, window_bounds = array<i64: 2, 4>}, {pipeline_mode = #tpu.pipeline_mode<synchronous>, transform_indices = @transform_2, window_bounds = array<i64: 1024, 512>}, {pipeline_mode = #tpu.pipeline_mode<synchronous>, transform_indices = @transform_3, window_bounds = array<i64: 1, 512>}, {pipeline_mode = #tpu.pipeline_mode<synchronous>, transform_indices = @transform_4, window_bounds = array<i64: 512, 256>}, {pipeline_mode = #tpu.pipeline_mode<synchronous>, transform_indices = @transform_5, window_bounds = array<i64: 1, 256>}, {pipeline_mode = #tpu.pipeline_mode<synchronous>, transform_indices = @transform_6, window_bounds = array<i64: 256, 32>}, {pipeline_mode = #tpu.pipeline_mode<synchronous>, transform_indices = @transform_7, window_bounds = array<i64: 1, 32>}, {pipeline_mode = #tpu.pipeline_mode<synchronous>, transform_indices = @transform_8, window_bounds = array<i64: 1, 32>}, {pipeline_mode = #tpu.pipeline_mode<synchronous>, transform_indices = @transform_9, window_bounds = array<i64: 1, 32>}, {pipeline_mode = #tpu.pipeline_mode<synchronous>, transform_indices = @transform_10, window_bounds = array<i64: 32, 32>}, {pipeline_mode = #tpu.pipeline_mode<synchronous>, transform_indices = @transform_11, window_bounds = array<i64: 1, 32>}, {pipeline_mode = #tpu.pipeline_mode<synchronous>, transform_indices = @transform_12, window_bounds = array<i64: 32, 32>}, {pipeline_mode = #tpu.pipeline_mode<synchronous>, transform_indices = @transform_13, window_bounds = array<i64: 1, 32>}, {pipeline_mode = #tpu.pipeline_mode<synchronous>, transform_indices = @transform_14, window_bounds = array<i64: 32, 8>}, {pipeline_mode = #tpu.pipeline_mode<synchronous>, transform_indices = @transform_15, window_bounds = array<i64: 1, 8>}, {pipeline_mode = #tpu.pipeline_mode<synchronous>, transform_indices = @transform_16, window_bounds = array<i64: 2, 128>}]} {
    %c0 = arith.constant 0 : index
    %c0_0 = arith.constant 0 : index
    %0 = vector.load %arg1[%c0, %c0_0] : memref<2x1024xf32, #tpu.memory_space<vmem>>, vector<2x1024xf32>
    %c0_1 = arith.constant 0 : index
    %c0_2 = arith.constant 0 : index
    %1 = vector.load %arg3[%c0_1, %c0_2] : memref<1024x512xf32, #tpu.memory_space<vmem>>, vector<1024x512xf32>
    %cst = arith.constant dense<0.000000e+00> : vector<2x512xf32>
    %2 = tpu.matmul %0, %1, %cst {dimension_numbers = #tpu.dot_dimension_numbers<[1], [0], [0], [1], [0, 0, 1, 1], [], []>} : vector<2x1024xf32>, vector<1024x512xf32>, vector<2x512xf32> -> vector<2x512xf32>
    %c0_3 = arith.constant 0 : index
    %c0_4 = arith.constant 0 : index
    %3 = vector.load %arg4[%c0_3, %c0_4] : memref<1x512xf32, #tpu.memory_space<vmem>>, vector<1x512xf32>
    %4 = vector.broadcast %3 : vector<1x512xf32> to vector<2x512xf32>
    %5 = arith.addf %2, %4 : vector<2x512xf32>
    %cst_5 = arith.constant 0.000000e+00 : f32
    %6 = vector.broadcast %cst_5 : f32 to vector<2x512xf32>
    %7 = arith.maximumf %5, %6 : vector<2x512xf32>
    %c0_6 = arith.constant 0 : index
    %c0_7 = arith.constant 0 : index
    %8 = vector.load %arg5[%c0_6, %c0_7] : memref<512x256xf32, #tpu.memory_space<vmem>>, vector<512x256xf32>
    %cst_8 = arith.constant dense<0.000000e+00> : vector<2x256xf32>
    %9 = tpu.matmul %7, %8, %cst_8 {dimension_numbers = #tpu.dot_dimension_numbers<[1], [0], [0], [1], [0, 0, 1, 1], [], []>} : vector<2x512xf32>, vector<512x256xf32>, vector<2x256xf32> -> vector<2x256xf32>
    %c0_9 = arith.constant 0 : index
    %c0_10 = arith.constant 0 : index
    %10 = vector.load %arg6[%c0_9, %c0_10] : memref<1x256xf32, #tpu.memory_space<vmem>>, vector<1x256xf32>
    %11 = vector.broadcast %10 : vector<1x256xf32> to vector<2x256xf32>
    %12 = arith.addf %9, %11 : vector<2x256xf32>
    %cst_11 = arith.constant 0.000000e+00 : f32
    %13 = vector.broadcast %cst_11 : f32 to vector<2x256xf32>
    %14 = arith.maximumf %12, %13 : vector<2x256xf32>
    %c0_12 = arith.constant 0 : index
    %c0_13 = arith.constant 0 : index
    %15 = vector.load %arg7[%c0_12, %c0_13] : memref<256x32xf32, #tpu.memory_space<vmem>>, vector<256x32xf32>
    %cst_14 = arith.constant dense<0.000000e+00> : vector<2x32xf32>
    %16 = tpu.matmul %14, %15, %cst_14 {dimension_numbers = #tpu.dot_dimension_numbers<[1], [0], [0], [1], [0, 0, 1, 1], [], []>} : vector<2x256xf32>, vector<256x32xf32>, vector<2x32xf32> -> vector<2x32xf32>
    %c0_15 = arith.constant 0 : index
    %c0_16 = arith.constant 0 : index
    %17 = vector.load %arg8[%c0_15, %c0_16] : memref<1x32xf32, #tpu.memory_space<vmem>>, vector<1x32xf32>
    %18 = vector.broadcast %17 : vector<1x32xf32> to vector<2x32xf32>
    %19 = arith.addf %16, %18 : vector<2x32xf32>
    %cst_17 = arith.constant dense<0.000000e+00> : vector<2xf32>
    %20 = vector.multi_reduction <add>, %19, %cst_17 [1] : vector<2x32xf32> to vector<2xf32>
    %21 = vector.shape_cast %20 : vector<2xf32> to vector<2x1xf32>
    %cst_18 = arith.constant 3.200000e+01 : f32
    %22 = vector.broadcast %cst_18 : f32 to vector<2x1xf32>
    %23 = arith.divf %21, %22 : vector<2x1xf32>
    %24 = vector.broadcast %23 : vector<2x1xf32> to vector<2x32xf32>
    %25 = arith.subf %19, %24 : vector<2x32xf32>
    %26 = arith.mulf %25, %25 : vector<2x32xf32>
    %cst_19 = arith.constant dense<0.000000e+00> : vector<2xf32>
    %27 = vector.multi_reduction <add>, %26, %cst_19 [1] : vector<2x32xf32> to vector<2xf32>
    %28 = vector.shape_cast %27 : vector<2xf32> to vector<2x1xf32>
    %cst_20 = arith.constant 3.200000e+01 : f32
    %29 = vector.broadcast %cst_20 : f32 to vector<2x1xf32>
    %30 = arith.divf %28, %29 : vector<2x1xf32>
    %31 = vector.broadcast %23 : vector<2x1xf32> to vector<2x32xf32>
    %32 = arith.subf %19, %31 : vector<2x32xf32>
    %cst_21 = arith.constant 9.99999974E-6 : f32
    %33 = vector.broadcast %cst_21 : f32 to vector<2x1xf32>
    %34 = arith.addf %30, %33 : vector<2x1xf32>
    %35 = math.rsqrt %34 : vector<2x1xf32>
    %36 = vector.broadcast %35 : vector<2x1xf32> to vector<2x32xf32>
    %37 = arith.mulf %32, %36 : vector<2x32xf32>
    %c0_22 = arith.constant 0 : index
    %c0_23 = arith.constant 0 : index
    %38 = vector.load %arg9[%c0_22, %c0_23] : memref<1x32xf32, #tpu.memory_space<vmem>>, vector<1x32xf32>
    %39 = vector.broadcast %38 : vector<1x32xf32> to vector<2x32xf32>
    %40 = arith.mulf %37, %39 : vector<2x32xf32>
    %c0_24 = arith.constant 0 : index
    %c0_25 = arith.constant 0 : index
    %41 = vector.load %arg10[%c0_24, %c0_25] : memref<1x32xf32, #tpu.memory_space<vmem>>, vector<1x32xf32>
    %42 = vector.broadcast %41 : vector<1x32xf32> to vector<2x32xf32>
    %43 = arith.addf %40, %42 : vector<2x32xf32>
    %c0_26 = arith.constant 0 : index
    %c0_27 = arith.constant 0 : index
    %44 = vector.load %arg11[%c0_26, %c0_27] : memref<32x32xf32, #tpu.memory_space<vmem>>, vector<32x32xf32>
    %cst_28 = arith.constant dense<0.000000e+00> : vector<2x32xf32>
    %45 = tpu.matmul %43, %44, %cst_28 {dimension_numbers = #tpu.dot_dimension_numbers<[1], [0], [0], [1], [0, 0, 1, 1], [], []>} : vector<2x32xf32>, vector<32x32xf32>, vector<2x32xf32> -> vector<2x32xf32>
    %c0_29 = arith.constant 0 : index
    %c0_30 = arith.constant 0 : index
    %46 = vector.load %arg12[%c0_29, %c0_30] : memref<1x32xf32, #tpu.memory_space<vmem>>, vector<1x32xf32>
    %47 = vector.broadcast %46 : vector<1x32xf32> to vector<2x32xf32>
    %48 = arith.addf %45, %47 : vector<2x32xf32>
    %cst_31 = arith.constant 0.000000e+00 : f32
    %49 = vector.broadcast %cst_31 : f32 to vector<2x32xf32>
    %50 = arith.maximumf %48, %49 : vector<2x32xf32>
    %c0_32 = arith.constant 0 : index
    %c0_33 = arith.constant 0 : index
    %51 = vector.load %arg13[%c0_32, %c0_33] : memref<32x32xf32, #tpu.memory_space<vmem>>, vector<32x32xf32>
    %cst_34 = arith.constant dense<0.000000e+00> : vector<2x32xf32>
    %52 = tpu.matmul %50, %51, %cst_34 {dimension_numbers = #tpu.dot_dimension_numbers<[1], [0], [0], [1], [0, 0, 1, 1], [], []>} : vector<2x32xf32>, vector<32x32xf32>, vector<2x32xf32> -> vector<2x32xf32>
    %c0_35 = arith.constant 0 : index
    %c0_36 = arith.constant 0 : index
    %53 = vector.load %arg14[%c0_35, %c0_36] : memref<1x32xf32, #tpu.memory_space<vmem>>, vector<1x32xf32>
    %54 = vector.broadcast %53 : vector<1x32xf32> to vector<2x32xf32>
    %55 = arith.addf %52, %54 : vector<2x32xf32>
    %cst_37 = arith.constant 0.000000e+00 : f32
    %56 = vector.broadcast %cst_37 : f32 to vector<2x32xf32>
    %57 = arith.maximumf %55, %56 : vector<2x32xf32>
    %c0_38 = arith.constant 0 : index
    %c0_39 = arith.constant 0 : index
    %58 = vector.load %arg15[%c0_38, %c0_39] : memref<32x8xf32, #tpu.memory_space<vmem>>, vector<32x8xf32>
    %cst_40 = arith.constant dense<0.000000e+00> : vector<2x8xf32>
    %59 = tpu.matmul %57, %58, %cst_40 {dimension_numbers = #tpu.dot_dimension_numbers<[1], [0], [0], [1], [0, 0, 1, 1], [], []>} : vector<2x32xf32>, vector<32x8xf32>, vector<2x8xf32> -> vector<2x8xf32>
    %c0_41 = arith.constant 0 : index
    %c0_42 = arith.constant 0 : index
    %60 = vector.load %arg16[%c0_41, %c0_42] : memref<1x8xf32, #tpu.memory_space<vmem>>, vector<1x8xf32>
    %61 = vector.broadcast %60 : vector<1x8xf32> to vector<2x8xf32>
    %62 = arith.addf %59, %61 : vector<2x8xf32>
    %63 = vector.extract_strided_slice %62 {offsets = [0, 0], sizes = [2, 4], strides = [1, 1]} : vector<2x8xf32> to vector<2x4xf32>
    %64 = vector.extract_strided_slice %62 {offsets = [0, 4], sizes = [2, 4], strides = [1, 1]} : vector<2x8xf32> to vector<2x4xf32>
    %65 = math.tanh %64 : vector<2x4xf32>
    %cst_43 = arith.constant 1.000000e+00 : f32
    %66 = vector.broadcast %cst_43 : f32 to vector<2x4xf32>
    %67 = arith.addf %65, %66 : vector<2x4xf32>
    %cst_44 = arith.constant 6.000000e+00 : f32
    %68 = vector.broadcast %cst_44 : f32 to vector<2x4xf32>
    %69 = arith.mulf %68, %67 : vector<2x4xf32>
    %cst_45 = arith.constant -1.000000e+01 : f32
    %70 = vector.broadcast %cst_45 : f32 to vector<2x4xf32>
    %71 = arith.addf %70, %69 : vector<2x4xf32>
    %c0_46 = arith.constant 0 : index
    %c0_47 = arith.constant 0 : index
    %72 = vector.load %arg2[%c0_46, %c0_47] : memref<2x4xf32, #tpu.memory_space<vmem>>, vector<2x4xf32>
    %73 = math.exp %71 : vector<2x4xf32>
    %74 = arith.mulf %72, %73 : vector<2x4xf32>
    %75 = arith.addf %63, %74 : vector<2x4xf32>
    %cst_48 = arith.constant -5.000000e-01 : f32
    %76 = vector.broadcast %cst_48 : f32 to vector<2x4xf32>
    %77 = arith.mulf %76, %72 : vector<2x4xf32>
    %78 = arith.mulf %77, %72 : vector<2x4xf32>
    %79 = arith.subf %78, %71 : vector<2x4xf32>
    %cst_49 = arith.constant dense<0.000000e+00> : vector<2xf32>
    %80 = vector.multi_reduction <add>, %79, %cst_49 [1] : vector<2x4xf32> to vector<2xf32>
    %81 = vector.shape_cast %80 : vector<2xf32> to vector<2x1xf32>
    %cst_50 = arith.constant 3.67575407 : f32
    %82 = vector.broadcast %cst_50 : f32 to vector<2x1xf32>
    %83 = arith.subf %81, %82 : vector<2x1xf32>
    %84 = math.tanh %75 : vector<2x4xf32>
    %85 = arith.mulf %84, %84 : vector<2x4xf32>
    %cst_51 = arith.constant 1.000000e+00 : f32
    %86 = vector.broadcast %cst_51 : f32 to vector<2x4xf32>
    %87 = arith.subf %86, %85 : vector<2x4xf32>
    %cst_52 = arith.constant 0.000000e+00 : f32
    %88 = vector.broadcast %cst_52 : f32 to vector<2x4xf32>
    %89 = arith.maximumf %87, %88 : vector<2x4xf32>
    %cst_53 = arith.constant 9.99999997E-7 : f32
    %90 = vector.broadcast %cst_53 : f32 to vector<2x4xf32>
    %91 = arith.addf %89, %90 : vector<2x4xf32>
    %92 = math.log %91 : vector<2x4xf32>
    %cst_54 = arith.constant dense<0.000000e+00> : vector<2xf32>
    %93 = vector.multi_reduction <add>, %92, %cst_54 [1] : vector<2x4xf32> to vector<2xf32>
    %94 = vector.shape_cast %93 : vector<2xf32> to vector<2x1xf32>
    %95 = arith.subf %83, %94 : vector<2x1xf32>
    %cst_55 = arith.constant 0.000000e+00 : f32
    %96 = vector.broadcast %cst_55 : f32 to vector<2x128xf32>
    %c0_56 = arith.constant 0 : index
    %c0_57 = arith.constant 0 : index
    %97 = vector.load %arg17[%c0_56, %c0_57] : memref<2x128xf32, #tpu.memory_space<vmem>>, vector<2x128xf32>
    tpu.vector_store %arg17[%c0_56, %c0_57], %96 {strides = array<i32>} : memref<2x128xf32, #tpu.memory_space<vmem>>, vector<2x128xf32>,
    %cst_58 = arith.constant dense<0xFF800000> : vector<2xf32>
    %98 = vector.multi_reduction <maximumf>, %63, %cst_58 [1] : vector<2x4xf32> to vector<2xf32>
    %99 = vector.shape_cast %98 : vector<2xf32> to vector<2x1xf32>
    %100 = tpu.iota {dimensions = array<i32: 1>} : vector<2x4xi32>
    %101 = vector.broadcast %99 : vector<2x1xf32> to vector<2x4xf32>
    %102 = arith.cmpf oeq, %63, %101 : vector<2x4xf32>
    %c4_i32 = arith.constant 4 : i32
    %103 = vector.broadcast %c4_i32 : i32 to vector<2x4xi32>
    %104 = arith.select %102, %100, %103 : vector<2x4xi1>, vector<2x4xi32>
    %cst_59 = arith.constant dense<2147483647> : vector<2xi32>
    %105 = vector.multi_reduction <minsi>, %104, %cst_59 [1] : vector<2x4xi32> to vector<2xi32>
    %106 = vector.shape_cast %105 : vector<2xi32> to vector<2x1xi32>
    %107 = arith.sitofp %106 : vector<2x1xi32> to vector<2x1xf32>
    %c0_60 = arith.constant 0 : index
    %c0_61 = arith.constant 0 : index
    %108 = vector.load %arg17[%c0_60, %c0_61] : memref<2x128xf32, #tpu.memory_space<vmem>>, vector<2x1xf32>
    tpu.vector_store %arg17[%c0_60, %c0_61], %107 {strides = array<i32>} : memref<2x128xf32, #tpu.memory_space<vmem>>, vector<2x1xf32>,
    %cst_62 = arith.constant dense<0xFF800000> : vector<2xf32>
    %109 = vector.multi_reduction <maximumf>, %75, %cst_62 [1] : vector<2x4xf32> to vector<2xf32>
    %110 = vector.shape_cast %109 : vector<2xf32> to vector<2x1xf32>
    %111 = tpu.iota {dimensions = array<i32: 1>} : vector<2x4xi32>
    %112 = vector.broadcast %110 : vector<2x1xf32> to vector<2x4xf32>
    %113 = arith.cmpf oeq, %75, %112 : vector<2x4xf32>
    %c4_i32_63 = arith.constant 4 : i32
    %114 = vector.broadcast %c4_i32_63 : i32 to vector<2x4xi32>
    %115 = arith.select %113, %111, %114 : vector<2x4xi1>, vector<2x4xi32>
    %cst_64 = arith.constant dense<2147483647> : vector<2xi32>
    %116 = vector.multi_reduction <minsi>, %115, %cst_64 [1] : vector<2x4xi32> to vector<2xi32>
    %117 = vector.shape_cast %116 : vector<2xi32> to vector<2x1xi32>
    %118 = arith.sitofp %117 : vector<2x1xi32> to vector<2x1xf32>
    %c0_65 = arith.constant 0 : index
    %c1 = arith.constant 1 : index
    %119 = vector.load %arg17[%c0_65, %c1] : memref<2x128xf32, #tpu.memory_space<vmem>>, vector<2x1xf32>
    tpu.vector_store %arg17[%c0_65, %c1], %118 {strides = array<i32>} : memref<2x128xf32, #tpu.memory_space<vmem>>, vector<2x1xf32>,
    %c0_66 = arith.constant 0 : index
    %c2 = arith.constant 2 : index
    %120 = vector.load %arg17[%c0_66, %c2] : memref<2x128xf32, #tpu.memory_space<vmem>>, vector<2x1xf32>
    tpu.vector_store %arg17[%c0_66, %c2], %95 {strides = array<i32>} : memref<2x128xf32, #tpu.memory_space<vmem>>, vector<2x1xf32>,
    %c0_67 = arith.constant 0 : index
    %c8 = arith.constant 8 : index
    %121 = vector.load %arg17[%c0_67, %c8] : memref<2x128xf32, #tpu.memory_space<vmem>>, vector<2x4xf32>
    tpu.vector_store %arg17[%c0_67, %c8], %71 {strides = array<i32>} : memref<2x128xf32, #tpu.memory_space<vmem>>, vector<2x4xf32>,
    return
  }
  func.func @transform_0(%arg0: i32) -> (i32, i32) {
    %c0_i32 = arith.constant 0 : i32
    %c0_i32_0 = arith.constant 0 : i32
    %c0_i32_1 = arith.constant 0 : i32
    return %c0_i32, %c0_i32_0 : i32, i32
  }
  func.func @transform_1(%arg0: i32) -> (i32, i32) {
    %c0_i32 = arith.constant 0 : i32
    %c0_i32_0 = arith.constant 0 : i32
    %c0_i32_1 = arith.constant 0 : i32
    return %c0_i32, %c0_i32_0 : i32, i32
  }
  func.func @transform_2(%arg0: i32) -> (i32, i32) {
    %c0_i32 = arith.constant 0 : i32
    %c0_i32_0 = arith.constant 0 : i32
    %c0_i32_1 = arith.constant 0 : i32
    return %c0_i32, %c0_i32_0 : i32, i32
  }
  func.func @transform_3(%arg0: i32) -> (i32, i32) {
    %c0_i32 = arith.constant 0 : i32
    %c0_i32_0 = arith.constant 0 : i32
    %c0_i32_1 = arith.constant 0 : i32
    return %c0_i32, %c0_i32_0 : i32, i32
  }
  func.func @transform_4(%arg0: i32) -> (i32, i32) {
    %c0_i32 = arith.constant 0 : i32
    %c0_i32_0 = arith.constant 0 : i32
    %c0_i32_1 = arith.constant 0 : i32
    return %c0_i32, %c0_i32_0 : i32, i32
  }
  func.func @transform_5(%arg0: i32) -> (i32, i32) {
    %c0_i32 = arith.constant 0 : i32
    %c0_i32_0 = arith.constant 0 : i32
    %c0_i32_1 = arith.constant 0 : i32
    return %c0_i32, %c0_i32_0 : i32, i32
  }
  func.func @transform_6(%arg0: i32) -> (i32, i32) {
    %c0_i32 = arith.constant 0 : i32
    %c0_i32_0 = arith.constant 0 : i32
    %c0_i32_1 = arith.constant 0 : i32
    return %c0_i32, %c0_i32_0 : i32, i32
  }
  func.func @transform_7(%arg0: i32) -> (i32, i32) {
    %c0_i32 = arith.constant 0 : i32
    %c0_i32_0 = arith.constant 0 : i32
    %c0_i32_1 = arith.constant 0 : i32
    return %c0_i32, %c0_i32_0 : i32, i32
  }
  func.func @transform_8(%arg0: i32) -> (i32, i32) {
    %c0_i32 = arith.constant 0 : i32
    %c0_i32_0 = arith.constant 0 : i32
    %c0_i32_1 = arith.constant 0 : i32
    return %c0_i32, %c0_i32_0 : i32, i32
  }
  func.func @transform_9(%arg0: i32) -> (i32, i32) {
    %c0_i32 = arith.constant 0 : i32
    %c0_i32_0 = arith.constant 0 : i32
    %c0_i32_1 = arith.constant 0 : i32
    return %c0_i32, %c0_i32_0 : i32, i32
  }
  func.func @transform_10(%arg0: i32) -> (i32, i32) {
    %c0_i32 = arith.constant 0 : i32
    %c0_i32_0 = arith.constant 0 : i32
    %c0_i32_1 = arith.constant 0 : i32
    return %c0_i32, %c0_i32_0 : i32, i32
  }
  func.func @transform_11(%arg0: i32) -> (i32, i32) {
    %c0_i32 = arith.constant 0 : i32
    %c0_i32_0 = arith.constant 0 : i32
    %c0_i32_1 = arith.constant 0 : i32
    return %c0_i32, %c0_i32_0 : i32, i32
  }
  func.func @transform_12(%arg0: i32) -> (i32, i32) {
    %c0_i32 = arith.constant 0 : i32
    %c0_i32_0 = arith.constant 0 : i32
    %c0_i32_1 = arith.constant 0 : i32
    return %c0_i32, %c0_i32_0 : i32, i32
  }
  func.func @transform_13(%arg0: i32) -> (i32, i32) {
    %c0_i32 = arith.constant 0 : i32
    %c0_i32_0 = arith.constant 0 : i32
    %c0_i32_1 = arith.constant 0 : i32
    return %c0_i32, %c0_i32_0 : i32, i32
  }
  func.func @transform_14(%arg0: i32) -> (i32, i32) {
    %c0_i32 = arith.constant 0 : i32
    %c0_i32_0 = arith.constant 0 : i32
    %c0_i32_1 = arith.constant 0 : i32
    return %c0_i32, %c0_i32_0 : i32, i32
  }
  func.func @transform_15(%arg0: i32) -> (i32, i32) {
    %c0_i32 = arith.constant 0 : i32
    %c0_i32_0 = arith.constant 0 : i32
    %c0_i32_1 = arith.constant 0 : i32
    return %c0_i32, %c0_i32_0 : i32, i32
  }
  func.func @transform_16(%arg0: i32) -> (i32, i32) {
    %c0_i32 = arith.constant 0 : i32
    %c0_i32_0 = arith.constant 0 : i32
    %c0_i32_1 = arith.constant 0 : i32
    return %c0_i32, %c0_i32_0 : i32, i32
  }
}

</mosaic_0001>

<bundles_post_ra>
// kernel: tpu_custom_call.1
= control target key start
LH: loop header
LB: loop body
LE: loop exit
PB: predicated region body
PF: predicated region fallthrough
CT: control target
= control target key end

     0   :  { %s3851_s0 = inlined_call_operand.hbm [shape: f32[2,1024], index: 0, kind: input, shape index: {}]   ;;  %s3852_s1 = inlined_call_operand.hbm [shape: f32[2,4], index: 1, kind: input, shape index: {}]   ;;  %s3853_s2 = inlined_call_operand.hbm [shape: f32[1024,512], index: 2, kind: input, shape index: {}]   ;;  %s3854_s3 = inlined_call_operand.hbm [shape: f32[1,512], index: 3, kind: input, shape index: {}]   ;;  %s3855_s4 = inlined_call_operand.hbm [shape: f32[512,256], index: 4, kind: input, shape index: {}]   ;;  %s3856_s5 = inlined_call_operand.hbm [shape: f32[1,256], index: 5, kind: input, shape index: {}]   ;;  %s3857_s6 = inlined_call_operand.vmem [shape: f32[256,32], index: 6, kind: input, shape index: {}]   ;;  %s3858_s7 = inlined_call_operand.hbm [shape: f32[1,32], index: 7, kind: input, shape index: {}]   ;;  %s3859_s8 = inlined_call_operand.hbm [shape: f32[1,32], index: 8, kind: input, shape index: {}]   ;;  %s3860_s9 = inlined_call_operand.hbm [shape: f32[1,32], index: 9, kind: input, shape index: {}]   ;;  %s3861_s10 = inlined_call_operand.hbm [shape: f32[32,32], index: 10, kind: input, shape index: {}]   ;;  %s3862_s11 = inlined_call_operand.hbm [shape: f32[1,32], index: 11, kind: input, shape index: {}]   ;;  %s3863_s12 = inlined_call_operand.hbm [shape: f32[32,32], index: 12, kind: input, shape index: {}]   ;;  %s3864_s13 = inlined_call_operand.hbm [shape: f32[1,32], index: 13, kind: input, shape index: {}]   ;;  %s3865_s14 = inlined_call_operand.vmem [shape: f32[32,8], index: 14, kind: input, shape index: {}]   ;;  %s3866_s15 = inlined_call_operand.hbm [shape: f32[1,8], index: 15, kind: input, shape index: {}]   ;;  %s3867_s16 = inlined_call_operand.hbm [shape: f32[2,128], index: 16, kind: output, shape index: {}]  }
   0x1   :  { %3869 = sst [smem:[#allocation35_spill]] %s3851_s0 }
   0x2   :  { %21 = vsyncpa [#allocation3], 0 }
   0x3   :  { %22 = vsyncpa [#allocation6], 0 }
   0x4   :  { %23 = vsyncpa [#allocation9], 0 }
   0x5   :  { %24 = vsyncpa [#allocation12], 0 }
   0x6   :  { %25 = vsyncpa [#allocation15], 0 }
   0x7   :  { %26 = vsyncpa [#allocation18], 0 }
   0x8   :  { %27 = vsyncpa [#allocation21], 0 }
   0x9   :  { %28 = vsyncpa [#allocation24], 0 }
   0xa   :  { %29 = vsyncpa [#allocation4], 0  ;;  %s3359_s21 = smov [#allocation5]   ;;  %s3360_s23 = smov [#allocation8]  }
   0xb   :  { %s46_s22 = sshll.u32 %s3359_s21, 4  ;;  %s68_s24 = sshll.u32 %s3360_s23, 4  ;;  %s47_s22 = int_to_ptr.vmem [resolvable:$true] %s46_s22  ;;  %s69_s24 = int_to_ptr.vmem [resolvable:$true] %s68_s24 }
   0xc   :  { %s3011_s27 = scalar_lea.hbm %s3852_s1, 32 }
   0xd   :  { %p3012_p0 = scmp.ne.s32.totalorder %s3852_s1, %s3011_s27  ;;  %p3015_p1 = scmp.lt.u32.totalorder %s3011_s27, %s3852_s1 }
   0xf   :  { %p3017_p2 = pnand %p3015_p1, %p3012_p0 }
  0x11   :  { %3020 = shalt.err (!%p3017_p2)
}
  0x12   :  { %s3021_s17 = scalar_lea.vmem %s47_s22, 32  ;;  %p3026_p4 = scmp.lt.s32.totalorder %s47_s22, %s47_s22 }
  0x13   :  { %p3022_p3 = scmp.ne.s32.totalorder %s47_s22, %s3021_s17  ;;  %p3027_p5 = scmp.lt.s32.totalorder %s3021_s17, %s3021_s17 }
  0x15   :  { %p3028_p6 = por %p3027_p5, %p3026_p4 }
  0x17   :  { %p3029_p7 = pnand %p3028_p6, %p3022_p3 }
  0x19   :  { %3032 = shalt.err (!%p3029_p7)
}
  0x1a   :  { %49 = dma.hbm_to_vmem [thread:$0]  %s3852_s1, 32, %s47_s22, [#allocation6]  }
  0x1b   :  { %s3033_s23 = scalar_lea.hbm %s3854_s3, 64 }
  0x1c   :  { %p3034_p8 = scmp.ne.s32.totalorder %s3854_s3, %s3033_s23  ;;  %p3037_p9 = scmp.lt.u32.totalorder %s3033_s23, %s3854_s3 }
  0x1e   :  { %p3039_p10 = pnand %p3037_p9, %p3034_p8 }
  0x20   :  { %3042 = shalt.err (!%p3039_p10)
}
  0x21   :  { %s3043_s29 = scalar_lea.vmem %s69_s24, 64  ;;  %p3048_p12 = scmp.lt.s32.totalorder %s69_s24, %s69_s24 }
  0x22   :  { %p3044_p11 = scmp.ne.s32.totalorder %s69_s24, %s3043_s29  ;;  %p3049_p13 = scmp.lt.s32.totalorder %s3043_s29, %s3043_s29 }
  0x24   :  { %p3050_p0 = por %p3049_p13, %p3048_p12 }
  0x26   :  { %p3051_p1 = pnand %p3050_p0, %p3044_p11 }
  0x28   :  { %3054 = shalt.err (!%p3051_p1)
}
  0x29   :  { %71 = dma.hbm_to_vmem [thread:$0]  %s3854_s3, 64, %s69_s24, [#allocation9]  }
  0x2a   :  { %s3361_s30 = smov [#allocation11]   ;;  %s3362_s17 = smov [#allocation14]  }
  0x2b   :  { %s90_s0 = sshll.u32 %s3361_s30, 4  ;;  %s112_s18 = sshll.u32 %s3362_s17, 4  ;;  %s91_s0 = int_to_ptr.vmem [resolvable:$true] %s90_s0  ;;  %s113_s18 = int_to_ptr.vmem [resolvable:$true] %s112_s18 }
  0x2c   :  { %s3055_s21 = scalar_lea.hbm %s3856_s5, 32 }
  0x2d   :  { %p3056_p2 = scmp.ne.s32.totalorder %s3856_s5, %s3055_s21  ;;  %p3059_p3 = scmp.lt.u32.totalorder %s3055_s21, %s3856_s5 }
  0x2f   :  { %p3061_p4 = pnand %p3059_p3, %p3056_p2 }
  0x31   :  { %3064 = shalt.err (!%p3061_p4)
}
  0x32   :  { %s3065_s3 = scalar_lea.vmem %s91_s0, 32  ;;  %p3070_p6 = scmp.lt.s32.totalorder %s91_s0, %s91_s0 }
  0x33   :  { %p3066_p5 = scmp.ne.s32.totalorder %s91_s0, %s3065_s3  ;;  %p3071_p7 = scmp.lt.s32.totalorder %s3065_s3, %s3065_s3 }
  0x35   :  { %p3072_p8 = por %p3071_p7, %p3070_p6 }
  0x37   :  { %p3073_p9 = pnand %p3072_p8, %p3066_p5 }
  0x39   :  { %3076 = shalt.err (!%p3073_p9)
}
  0x3a   :  { %93 = dma.hbm_to_vmem [thread:$0]  %s3856_s5, 32, %s91_s0, [#allocation12]  }
  0x3b   :  { %s3077_s22 = scalar_lea.hbm %s3859_s8, 16 }
  0x3c   :  { %p3078_p10 = scmp.ne.s32.totalorder %s3859_s8, %s3077_s22  ;;  %p3081_p11 = scmp.lt.u32.totalorder %s3077_s22, %s3859_s8 }
  0x3e   :  { %p3083_p12 = pnand %p3081_p11, %p3078_p10 }
  0x40   :  { %3086 = shalt.err (!%p3083_p12)
}
  0x41   :  { %s3087_s21 = scalar_lea.vmem %s113_s18, 16  ;;  %s3091_s23 = scalar_lea.vmem %s113_s18, 32 }
  0x42   :  { %p3088_p13 = scmp.ne.s32.totalorder %s113_s18, %s3087_s21  ;;  %p3092_p0 = scmp.lt.s32.totalorder %s113_s18, %s113_s18 }
  0x43   :  { %p3093_p1 = scmp.lt.s32.totalorder %s3091_s23, %s3087_s21 }
  0x45   :  { %p3094_p2 = por %p3093_p1, %p3092_p0 }
  0x47   :  { %p3095_p3 = pnand %p3094_p2, %p3088_p13 }
  0x49   :  { %3098 = shalt.err (!%p3095_p3)
}
  0x4a   :  { %115 = dma.hbm_to_vmem [thread:$0]  %s3859_s8, 16, %s113_s18, [#allocation15]  }
  0x4b   :  { %s3363_s25 = smov [#allocation17]   ;;  %s3099_s24 = scalar_lea.hbm %s3861_s10, 512 }
  0x4c   :  { %s131_s26 = sshll.u32 %s3363_s25, 4  ;;  %p3100_p4 = scmp.ne.s32.totalorder %s3861_s10, %s3099_s24  ;;  %s132_s26 = int_to_ptr.vmem [resolvable:$true] %s131_s26 }
  0x4d   :  { %p3103_p5 = scmp.lt.u32.totalorder %s3099_s24, %s3861_s10 }
  0x4f   :  { %p3105_p6 = pnand %p3103_p5, %p3100_p4 }
  0x51   :  { %3108 = shalt.err (!%p3105_p6)
}
  0x52   :  { %s3109_s30 = scalar_lea.vmem %s132_s26, 512  ;;  %p3114_p8 = scmp.lt.s32.totalorder %s132_s26, %s132_s26 }
  0x53   :  { %p3110_p7 = scmp.ne.s32.totalorder %s132_s26, %s3109_s30  ;;  %p3115_p9 = scmp.lt.s32.totalorder %s3109_s30, %s3109_s30 }
  0x55   :  { %p3116_p10 = por %p3115_p9, %p3114_p8 }
  0x57   :  { %p3117_p11 = pnand %p3116_p10, %p3110_p7 }
  0x59   :  { %3120 = shalt.err (!%p3117_p11)
}
  0x5a   :  { %s3364_s8 = smov 128   ;;  %s3365_s18 = smov 8  }
  0x5b   :  { %137 = dma.hbm_to_vmem [thread:$0]  %s3861_s10, 512, %s132_s26, [#allocation18], %s3364_s8, %s3364_s8, %s3365_s18  }
  0x5c   :  { %s3366_s20 = smov [#allocation20]   ;;  %s3367_s23 = smov [#allocation2]  }
  0x5d   :  { %s153_s21 = sshll.u32 %s3366_s20, 4  ;;  %s36_s5 = sshll.u32 %s3367_s23, 4  ;;  %s154_s21 = int_to_ptr.vmem [resolvable:$true] %s153_s21  ;;  %s37_s5 = int_to_ptr.vmem [resolvable:$true] %s36_s5 }
  0x5e   :  { %s3121_s27 = scalar_lea.hbm %s3863_s12, 512 }
  0x5f   :  { %p3122_p12 = scmp.ne.s32.totalorder %s3863_s12, %s3121_s27  ;;  %p3125_p13 = scmp.lt.u32.totalorder %s3121_s27, %s3863_s12 }
  0x61   :  { %p3127_p0 = pnand %p3125_p13, %p3122_p12 }
  0x63   :  { %3130 = shalt.err (!%p3127_p0)
}
  0x64   :  { %s3131_s10 = scalar_lea.vmem %s154_s21, 512  ;;  %p3136_p2 = scmp.lt.s32.totalorder %s154_s21, %s154_s21 }
  0x65   :  { %p3132_p1 = scmp.ne.s32.totalorder %s154_s21, %s3131_s10  ;;  %p3137_p3 = scmp.lt.s32.totalorder %s3131_s10, %s3131_s10 }
  0x67   :  { %p3138_p4 = por %p3137_p3, %p3136_p2 }
  0x69   :  { %p3139_p5 = pnand %p3138_p4, %p3132_p1 }
  0x6b   :  { %3142 = shalt.err (!%p3139_p5)
}
  0x6c   :  { %159 = dma.hbm_to_vmem [thread:$0]  %s3863_s12, 512, %s154_s21, [#allocation21], %s3364_s8, %s3364_s8, %s3365_s18  }
  0x6d   :  { %s3870_s17 = sld [smem:[#allocation35_spill]] }
  0x73   :  { %s3143_s19 = scalar_lea.hbm %s3870_s17, 256 }
  0x74   :  { %p3144_p6 = scmp.ne.s32.totalorder %s3870_s17, %s3143_s19  ;;  %p3147_p7 = scmp.lt.u32.totalorder %s3143_s19, %s3870_s17 }
  0x76   :  { %p3149_p8 = pnand %p3147_p7, %p3144_p6 }
  0x78   :  { %3152 = shalt.err (!%p3149_p8)
}
  0x79   :  { %s3153_s27 = scalar_lea.vmem %s37_s5, 256  ;;  %p3158_p10 = scmp.lt.s32.totalorder %s37_s5, %s37_s5 }
  0x7a   :  { %p3154_p9 = scmp.ne.s32.totalorder %s37_s5, %s3153_s27  ;;  %p3159_p11 = scmp.lt.s32.totalorder %s3153_s27, %s3153_s27 }
  0x7c   :  { %p3160_p12 = por %p3159_p11, %p3158_p10 }
  0x7e   :  { %p3161_p13 = pnand %p3160_p12, %p3154_p9 }
  0x80   :  { %3164 = shalt.err (!%p3161_p13)
}
  0x81   :  { %39 = dma.hbm_to_vmem [thread:$0]  %s3870_s17, 256, %s37_s5, [#allocation3]  }
  0x82   :  { %s3368_s18 = smov [#allocation7]   ;;  %s3165_s28 = scalar_lea.hbm %s3853_s2, 65536 }
  0x83   :  { %s55_s21 = sshll.u32 %s3368_s18, 4  ;;  %p3166_p0 = scmp.ne.s32.totalorder %s3853_s2, %s3165_s28  ;;  %s56_s21 = int_to_ptr.vmem [resolvable:$true] %s55_s21 }
  0x84   :  { %p3169_p1 = scmp.lt.u32.totalorder %s3165_s28, %s3853_s2 }
  0x86   :  { %p3171_p2 = pnand %p3169_p1, %p3166_p0 }
  0x88   :  { %3174 = shalt.err (!%p3171_p2)
}
  0x89   :  { %s3175_s22 = scalar_lea.vmem %s56_s21, 65536  ;;  %p3180_p4 = scmp.lt.s32.totalorder %s56_s21, %s56_s21 }
  0x8a   :  { %p3176_p3 = scmp.ne.s32.totalorder %s56_s21, %s3175_s22  ;;  %p3181_p5 = scmp.lt.s32.totalorder %s3175_s22, %s3175_s22 }
  0x8c   :  { %p3182_p6 = por %p3181_p5, %p3180_p4 }
  0x8e   :  { %p3183_p7 = pnand %p3182_p6, %p3176_p3 }
  0x90   :  { %3186 = shalt.err (!%p3183_p7)
}
  0x91   :  { %s3369_s5 = smov 512   ;;  %s3370_s30 = smov 32  }
  0x92   :  { %61 = dma.hbm_to_vmem [thread:$0]  %s3853_s2, 65536, %s56_s21, [#allocation6], %s3369_s5, %s3369_s5, %s3370_s30  }
  0x93   :  { %s3371_s20 = smov [#allocation10]   ;;  %s3187_s27 = scalar_lea.hbm %s3855_s4, 16384 }
  0x94   :  { %s77_s23 = sshll.u32 %s3371_s20, 4  ;;  %p3188_p8 = scmp.ne.s32.totalorder %s3855_s4, %s3187_s27  ;;  %s78_s23 = int_to_ptr.vmem [resolvable:$true] %s77_s23 }
  0x95   :  { %p3191_p9 = scmp.lt.u32.totalorder %s3187_s27, %s3855_s4 }
  0x97   :  { %p3193_p10 = pnand %p3191_p9, %p3188_p8 }
  0x99   :  { %3196 = shalt.err (!%p3193_p10)
}
  0x9a   :  { %s3197_s24 = scalar_lea.vmem %s78_s23, 16384  ;;  %p3202_p12 = scmp.lt.s32.totalorder %s78_s23, %s78_s23 }
  0x9b   :  { %p3198_p11 = scmp.ne.s32.totalorder %s78_s23, %s3197_s24  ;;  %p3203_p13 = scmp.lt.s32.totalorder %s3197_s24, %s3197_s24 }
  0x9d   :  { %p3204_p0 = por %p3203_p13, %p3202_p12 }
  0x9f   :  { %p3205_p1 = pnand %p3204_p0, %p3198_p11 }
  0xa1   :  { %3208 = shalt.err (!%p3205_p1)
}
  0xa2   :  { %s3372_s2 = smov 256   ;;  %s3373_s21 = smov 16  }
  0xa3   :  { %83 = dma.hbm_to_vmem [thread:$0]  %s3855_s4, 16384, %s78_s23, [#allocation9], %s3372_s2, %s3372_s2, %s3373_s21  }
  0xa4   :  { %s3374_s10 = smov [#allocation13]   ;;  %s3375_s1 = smov [#allocation16]  }
  0xa5   :  { %s102_s26 = sshll.u32 %s3374_s10, 4  ;;  %s122_s22 = sshll.u32 %s3375_s1, 4  ;;  %s103_s26 = int_to_ptr.vmem [resolvable:$true] %s102_s26  ;;  %s123_s22 = int_to_ptr.vmem [resolvable:$true] %s122_s22 }
  0xa6   :  { %s3209_s17 = scalar_lea.hbm %s3858_s7, 16 }
  0xa7   :  { %p3210_p2 = scmp.ne.s32.totalorder %s3858_s7, %s3209_s17  ;;  %p3213_p3 = scmp.lt.u32.totalorder %s3209_s17, %s3858_s7 }
  0xa9   :  { %p3215_p4 = pnand %p3213_p3, %p3210_p2 }
  0xab   :  { %3218 = shalt.err (!%p3215_p4)
}
  0xac   :  { %s3219_s4 = scalar_lea.vmem %s103_s26, 16  ;;  %s3223_s23 = scalar_lea.vmem %s103_s26, 32 }
  0xad   :  { %p3220_p5 = scmp.ne.s32.totalorder %s103_s26, %s3219_s4  ;;  %p3224_p6 = scmp.lt.s32.totalorder %s103_s26, %s103_s26 }
  0xae   :  { %p3225_p7 = scmp.lt.s32.totalorder %s3223_s23, %s3219_s4 }
  0xb0   :  { %p3226_p8 = por %p3225_p7, %p3224_p6 }
  0xb2   :  { %p3227_p9 = pnand %p3226_p8, %p3220_p5 }
  0xb4   :  { %3230 = shalt.err (!%p3227_p9)
}
  0xb5   :  { %105 = dma.hbm_to_vmem [thread:$0]  %s3858_s7, 16, %s103_s26, [#allocation12]  }
  0xb6   :  { %s3231_s3 = scalar_lea.hbm %s3860_s9, 16 }
  0xb7   :  { %p3232_p10 = scmp.ne.s32.totalorder %s3860_s9, %s3231_s3  ;;  %p3235_p11 = scmp.lt.u32.totalorder %s3231_s3, %s3860_s9 }
  0xb9   :  { %p3237_p12 = pnand %p3235_p11, %p3232_p10 }
  0xbb   :  { %3240 = shalt.err (!%p3237_p12)
}
  0xbc   :  { %s3241_s29 = scalar_lea.vmem %s123_s22, 16  ;;  %s3245_s10 = scalar_lea.vmem %s123_s22, 32 }
  0xbd   :  { %p3242_p13 = scmp.ne.s32.totalorder %s123_s22, %s3241_s29  ;;  %p3246_p0 = scmp.lt.s32.totalorder %s123_s22, %s123_s22 }
  0xbe   :  { %p3247_p1 = scmp.lt.s32.totalorder %s3245_s10, %s3241_s29 }
  0xc0   :  { %p3248_p2 = por %p3247_p1, %p3246_p0 }
  0xc2   :  { %p3249_p3 = pnand %p3248_p2, %p3242_p13 }
  0xc4   :  { %3252 = shalt.err (!%p3249_p3)
}
  0xc5   :  { %125 = dma.hbm_to_vmem [thread:$0]  %s3860_s9, 16, %s123_s22, [#allocation15]  }
  0xc6   :  { %s3376_s1 = smov [#allocation19]   ;;  %s3377_s30 = smov [#allocation22]  }
  0xc7   :  { %s144_s5 = sshll.u32 %s3376_s1, 4  ;;  %s166_s17 = sshll.u32 %s3377_s30, 4  ;;  %s145_s5 = int_to_ptr.vmem [resolvable:$true] %s144_s5  ;;  %s167_s17 = int_to_ptr.vmem [resolvable:$true] %s166_s17 }
  0xc8   :  { %s3253_s0 = scalar_lea.hbm %s3862_s11, 16 }
  0xc9   :  { %p3254_p4 = scmp.ne.s32.totalorder %s3862_s11, %s3253_s0  ;;  %p3257_p5 = scmp.lt.u32.totalorder %s3253_s0, %s3862_s11 }
  0xcb   :  { %p3259_p6 = pnand %p3257_p5, %p3254_p4 }
  0xcd   :  { %3262 = shalt.err (!%p3259_p6)
}
  0xce   :  { %s3263_s9 = scalar_lea.vmem %s145_s5, 16  ;;  %s3267_s22 = scalar_lea.vmem %s145_s5, 32 }
  0xcf   :  { %p3264_p7 = scmp.ne.s32.totalorder %s145_s5, %s3263_s9  ;;  %p3268_p8 = scmp.lt.s32.totalorder %s145_s5, %s145_s5 }
  0xd0   :  { %p3269_p9 = scmp.lt.s32.totalorder %s3267_s22, %s3263_s9 }
  0xd2   :  { %p3270_p10 = por %p3269_p9, %p3268_p8 }
  0xd4   :  { %p3271_p11 = pnand %p3270_p10, %p3264_p7 }
  0xd6   :  { %3274 = shalt.err (!%p3271_p11)
}
  0xd7   :  { %147 = dma.hbm_to_vmem [thread:$0]  %s3862_s11, 16, %s145_s5, [#allocation18]  }
  0xd8   :  { %s3275_s24 = scalar_lea.hbm %s3864_s13, 16 }
  0xd9   :  { %p3276_p12 = scmp.ne.s32.totalorder %s3864_s13, %s3275_s24  ;;  %p3279_p13 = scmp.lt.u32.totalorder %s3275_s24, %s3864_s13 }
  0xdb   :  { %p3281_p0 = pnand %p3279_p13, %p3276_p12 }
  0xdd   :  { %3284 = shalt.err (!%p3281_p0)
}
  0xde   :  { %s3285_s10 = scalar_lea.vmem %s167_s17, 16  ;;  %s3289_s7 = scalar_lea.vmem %s167_s17, 32 }
  0xdf   :  { %p3286_p1 = scmp.ne.s32.totalorder %s167_s17, %s3285_s10  ;;  %p3290_p2 = scmp.lt.s32.totalorder %s167_s17, %s167_s17 }
  0xe0   :  { %p3291_p3 = scmp.lt.s32.totalorder %s3289_s7, %s3285_s10 }
  0xe2   :  { %p3292_p4 = por %p3291_p3, %p3290_p2 }
  0xe4   :  { %p3293_p5 = pnand %p3292_p4, %p3286_p1 }
  0xe6   :  { %3296 = shalt.err (!%p3293_p5)
}
  0xe7   :  { %169 = dma.hbm_to_vmem [thread:$0]  %s3864_s13, 16, %s167_s17, [#allocation21]  }
  0xe8   :  { %s3378_s1 = smov [#allocation23]   ;;  %s3297_s20 = scalar_lea.hbm %s3866_s15, 16 }
  0xe9   :  { %s178_s5 = sshll.u32 %s3378_s1, 4  ;;  %p3298_p6 = scmp.ne.s32.totalorder %s3866_s15, %s3297_s20  ;;  %s179_s5 = int_to_ptr.vmem [resolvable:$true] %s178_s5 }
  0xea   :  { %p3301_p7 = scmp.lt.u32.totalorder %s3297_s20, %s3866_s15 }
  0xec   :  { %p3303_p8 = pnand %p3301_p7, %p3298_p6 }
  0xee   :  { %3306 = shalt.err (!%p3303_p8)
}
  0xef   :  { %s3307_s27 = scalar_lea.vmem %s179_s5, 16  ;;  %s3311_s13 = scalar_lea.vmem %s179_s5, 32 }
  0xf0   :  { %p3308_p9 = scmp.ne.s32.totalorder %s179_s5, %s3307_s27  ;;  %p3312_p10 = scmp.lt.s32.totalorder %s179_s5, %s179_s5 }
  0xf1   :  { %p3313_p11 = scmp.lt.s32.totalorder %s3311_s13, %s3307_s27 }
  0xf3   :  { %p3314_p12 = por %p3313_p11, %p3312_p10 }
  0xf5   :  { %p3315_p13 = pnand %p3314_p12, %p3308_p9 }
  0xf7   :  { %3318 = shalt.err (!%p3315_p13)
}
  0xf8   :  { %181 = dma.hbm_to_vmem [thread:$0]  %s3866_s15, 16, %s179_s5, [#allocation24]  }
  0xf9   :  { %3341 = dma.done.wait [#allocation3], 256  }
  0xfa   :  { %3342 = vsyncadd [#allocation3], 4294967040 }
  0xfb   :  { %3343 = dma.done.wait [#allocation6], 65568  }
  0xfc   :  { %3344 = vsyncadd [#allocation6], 4294901728 }
  0xfd   :  { %3345 = dma.done.wait [#allocation9], 16448  }
  0xfe   :  { %3346 = vsyncadd [#allocation9], 4294950848 }
  0xff   :  { %3347 = dma.done.wait [#allocation12], 48  }
 0x100   :  { %3348 = vsyncadd [#allocation12], 4294967248 }
 0x101   :  { %3349 = dma.done.wait [#allocation15], 32  }
 0x102   :  { %3350 = vsyncadd [#allocation15], 4294967264 }
 0x103   :  { %3351 = dma.done.wait [#allocation18], 528  }
 0x104   :  { %3352 = vsyncadd [#allocation18], 4294966768 }
 0x105   :  { %3353 = dma.done.wait [#allocation21], 528  }
 0x106   :  { %3354 = vsyncadd [#allocation21], 4294966768 }
 0x107   :  { %3355 = dma.done.wait [#allocation24], 16  }
 0x108   :  { %3356 = vsyncadd [#allocation24], 4294967280  ;;  %v227_v0 = vld [vmem:[#allocation7 + $0x8] sm:$0xff]  ;;  %v226_v5 = vld [vmem:[#allocation7] sm:$0xff]  ;;  %vm1769_vm0 = vcmask 254976   ;;  %vm3381_vm1 = vmmov 0  }
 0x109   :  { %v231_v1 = vld [vmem:[#allocation7 + $0x28] sm:$0xff]  ;;  %v230_v6 = vld [vmem:[#allocation7 + $0x20] sm:$0xff]  ;;  %vm1811_vm2 = vcmask 261120   ;;  %vm2075_vm3 = vcmask 25600   ;;  %s3384_s1 = smov 4   ;;  %vm2115_vm8 = vcmask 1024  }
 0x10a   :  { %v355_v2 = vld [vmem:[#allocation7 + $0x408] sm:$0xff]  ;;  %v2262_v3 = vpack.c.bf16 %v231_v1, %v227_v0  ;;  %v2264_v8 = vpack.c.bf16 %v230_v6, %v226_v5  ;;  %v354_v9 = vld [vmem:[#allocation7 + $0x400] sm:$0xff]  ;;  %vm2138_vm9 = vcmask 9224   ;;  %vm2140_vm10 = vcmask 17424   ;;  %s3385_s5 = smov [#allocation25]  }
 0x10b   :  { %v359_v4 = vld [vmem:[#allocation7 + $0x428] sm:$0xff]  ;;  %v358_v10 = vld [vmem:[#allocation7 + $0x420] sm:$0xff]  ;;  %s2153_s30 = sshll.u32 %s3385_s5, 4  ;;  %vm2145_vm11 = vcmask 91200   ;;  %s2154_s30 = int_to_ptr.vmem [resolvable:$true] %s2153_s30 }
 0x10c   :  { %v2326_v7 = vpack.c.bf16 %v359_v4, %v355_v2  ;;  %v235_v11 = vld [vmem:[#allocation7 + $0x48] sm:$0xff]  ;;  %2263 = vmatprep.subr.bf16.mxu1 %v2262_v3  ;;  %v2328_v12 = vpack.c.bf16 %v358_v10, %v354_v9  ;;  %v234_v18 = vld [vmem:[#allocation7 + $0x40] sm:$0xff]  ;;  %s3319_s19 = scalar_lea.vmem %s2154_s30, 32  ;;  %p3324_p1 = scmp.lt.s32.totalorder %s2154_s30, %s2154_s30 }
 0x10d   :  { %v239_v13 = vld [vmem:[#allocation7 + $0x68] sm:$0xff]  ;;  %2265 = vmatpush1.bf16.msra.mxu1 %v2264_v8  ;;  %v238_v19 = vld [vmem:[#allocation7 + $0x60] sm:$0xff]  ;;  %p3320_p0 = scmp.ne.s32.totalorder %s2154_s30, %s3319_s19  ;;  %p3325_p2 = scmp.lt.s32.totalorder %s3319_s19, %s3319_s19 }
 0x10e   :  { %v363_v14 = vld [vmem:[#allocation7 + $0x448] sm:$0xff]  ;;  %2327 = vmatprep.subr.bf16.mxu0 %v2326_v7  ;;  %v2266_v16 = vpack.c.bf16 %v239_v13, %v235_v11  ;;  %v362_v20 = vld [vmem:[#allocation7 + $0x440] sm:$0xff]  ;;  %v2268_v21 = vpack.c.bf16 %v238_v19, %v234_v18 }
 0x10f   :  { %v367_v15 = vld [vmem:[#allocation7 + $0x468] sm:$0xff]  ;;  %2329 = vmatpush1.bf16.msra.mxu0 %v2328_v12  ;;  %v366_v22 = vld [vmem:[#allocation7 + $0x460] sm:$0xff]  ;;  %p3326_p3 = por %p3325_p2, %p3324_p1 }
 0x110   :  { %v2330_v17 = vpack.c.bf16 %v367_v15, %v363_v14  ;;  %v243_v23 = vld [vmem:[#allocation7 + $0x88] sm:$0xff]  ;;  %2267 = vmatprep.subr.bf16.mxu1 %v2266_v16  ;;  %v2332_v25 = vpack.c.bf16 %v366_v22, %v362_v20  ;;  %v242_v29 = vld [vmem:[#allocation7 + $0x80] sm:$0xff] }
 0x111   :  { %v247_v24 = vld [vmem:[#allocation7 + $0xa8] sm:$0xff]  ;;  %v246_v31 = vld [vmem:[#allocation7 + $0xa0] sm:$0xff]  ;;  %2269 = vmatpush1.bf16.msra.mxu1 %v2268_v21  ;;  %p3327_p4 = pnand %p3326_p3, %p3320_p0 }
 0x112   :  { %2331 = vmatprep.subr.bf16.mxu0 %v2330_v17  ;;  %v2270_v26 = vpack.c.bf16 %v247_v24, %v243_v23  ;;  %v371_v27 = vld [vmem:[#allocation7 + $0x488] sm:$0xff]  ;;  %v370_v32 = vld [vmem:[#allocation7 + $0x480] sm:$0xff]  ;;  %v2272_v34 = vpack.c.bf16 %v246_v31, %v242_v29 }
 0x113   :  { %v375_v28 = vld [vmem:[#allocation7 + $0x4a8] sm:$0xff]  ;;  %v374_v33 = vld [vmem:[#allocation7 + $0x4a0] sm:$0xff]  ;;  %2333 = vmatpush1.bf16.msra.mxu0 %v2332_v25 }
 0x114   :  { %v2334_v30 = vpack.c.bf16 %v375_v28, %v371_v27  ;;  %v251_v35 = vld [vmem:[#allocation7 + $0xc8] sm:$0xff]  ;;  %2271 = vmatprep.subr.bf16.mxu1 %v2270_v26  ;;  %v2336_v38 = vpack.c.bf16 %v374_v33, %v370_v32  ;;  %v250_v41 = vld [vmem:[#allocation7 + $0xc0] sm:$0xff] }
 0x115   :  { %v255_v36 = vld [vmem:[#allocation7 + $0xe8] sm:$0xff]  ;;  %v254_v42 = vld [vmem:[#allocation7 + $0xe0] sm:$0xff]  ;;  %2273 = vmatpush1.bf16.msra.mxu1 %v2272_v34 }
 0x116   :  { %v379_v37 = vld [vmem:[#allocation7 + $0x4c8] sm:$0xff]  ;;  %v2274_v39 = vpack.c.bf16 %v255_v36, %v251_v35  ;;  %2335 = vmatprep.subr.bf16.mxu0 %v2334_v30  ;;  %v378_v44 = vld [vmem:[#allocation7 + $0x4c0] sm:$0xff]  ;;  %v2276_v50 = vpack.c.bf16 %v254_v42, %v250_v41 }
 0x117   :  { %v383_v40 = vld [vmem:[#allocation7 + $0x4e8] sm:$0xff]  ;;  %v382_v45 = vld [vmem:[#allocation7 + $0x4e0] sm:$0xff]  ;;  %2337 = vmatpush1.bf16.msra.mxu0 %v2336_v38 }
 0x118   :  { %v2338_v43 = vpack.c.bf16 %v383_v40, %v379_v37  ;;  %v259_v46 = vld [vmem:[#allocation7 + $0x108] sm:$0xff]  ;;  %2275 = vmatprep.subr.bf16.mxu1 %v2274_v39  ;;  %v2340_v51 = vpack.c.bf16 %v382_v45, %v378_v44  ;;  %v258_v53 = vld [vmem:[#allocation7 + $0x100] sm:$0xff] }
 0x119   :  { %v263_v47 = vld [vmem:[#allocation7 + $0x128] sm:$0xff]  ;;  %v262_v54 = vld [vmem:[#allocation7 + $0x120] sm:$0xff]  ;;  %2277 = vmatpush1.bf16.msra.mxu1 %v2276_v50 }
 0x11a   :  { %v387_v48 = vld [vmem:[#allocation7 + $0x508] sm:$0xff]  ;;  %v2278_v52 = vpack.c.bf16 %v263_v47, %v259_v46  ;;  %v386_v55 = vld [vmem:[#allocation7 + $0x500] sm:$0xff]  ;;  %2339 = vmatprep.subr.bf16.mxu0 %v2338_v43  ;;  %v2280_v62 = vpack.c.bf16 %v262_v54, %v258_v53  ;;  %v740_v46 = vlaneseq  ;;  %v3379_v47 = vmov 1983009808  }
 0x11b   :  { %v391_v49 = vld [vmem:[#allocation7 + $0x528] sm:$0xff]  ;;  %v390_v57 = vld [vmem:[#allocation7 + $0x520] sm:$0xff]  ;;  %2341 = vmatpush1.bf16.msra.mxu0 %v2340_v51 }
 0x11c   :  { %v2342_v56 = vpack.c.bf16 %v391_v49, %v387_v48  ;;  %v267_v58 = vld [vmem:[#allocation7 + $0x148] sm:$0xff]  ;;  %2279 = vmatprep.subr.bf16.mxu1 %v2278_v52  ;;  %v2344_v63 = vpack.c.bf16 %v390_v57, %v386_v55  ;;  %v266_v1 = vld [vmem:[#allocation7 + $0x140] sm:$0xff]  ;;  %v764_v48 = vunpack.c.l.s4 %v3379_v47 }
 0x11d   :  { %v271_v59 = vld [vmem:[#allocation7 + $0x168] sm:$0xff]  ;;  %v270_v2 = vld [vmem:[#allocation7 + $0x160] sm:$0xff]  ;;  %2281 = vmatpush1.bf16.msra.mxu1 %v2280_v62 }
 0x11e   :  { %v395_v60 = vld [vmem:[#allocation7 + $0x548] sm:$0xff]  ;;  %v2282_v0 = vpack.c.bf16 %v271_v59, %v267_v58  ;;  %v394_v3 = vld [vmem:[#allocation7 + $0x540] sm:$0xff]  ;;  %2343 = vmatprep.subr.bf16.mxu0 %v2342_v56  ;;  %v2284_v10 = vpack.c.bf16 %v270_v2, %v266_v1  ;;  %v765_v62 = vunpack.c.0.s8 %v764_v48 }
 0x11f   :  { %v399_v61 = vld [vmem:[#allocation7 + $0x568] sm:$0xff]  ;;  %v398_v5 = vld [vmem:[#allocation7 + $0x560] sm:$0xff]  ;;  %2345 = vmatpush1.bf16.msra.mxu0 %v2344_v63 }
 0x120   :  { %v2346_v4 = vpack.c.bf16 %v399_v61, %v395_v60  ;;  %v275_v6 = vld [vmem:[#allocation7 + $0x188] sm:$0xff]  ;;  %2283 = vmatprep.subr.bf16.mxu1 %v2282_v0  ;;  %v2348_v11 = vpack.c.bf16 %v398_v5, %v394_v3  ;;  %v274_v13 = vld [vmem:[#allocation7 + $0x180] sm:$0xff]  ;;  %v3640_v61 = vshrl.u32 %v740_v46, 7 }
 0x121   :  { %v279_v7 = vld [vmem:[#allocation7 + $0x1a8] sm:$0xff]  ;;  %v278_v14 = vld [vmem:[#allocation7 + $0x1a0] sm:$0xff]  ;;  %2285 = vmatpush1.bf16.msra.mxu1 %v2284_v10 }
 0x122   :  { %v403_v8 = vld [vmem:[#allocation7 + $0x588] sm:$0xff]  ;;  %v2286_v12 = vpack.c.bf16 %v279_v7, %v275_v6  ;;  %v402_v15 = vld [vmem:[#allocation7 + $0x580] sm:$0xff]  ;;  %2347 = vmatprep.subr.bf16.mxu0 %v2346_v4  ;;  %v2288_v22 = vpack.c.bf16 %v278_v14, %v274_v13 }
 0x123   :  { %v407_v9 = vld [vmem:[#allocation7 + $0x5a8] sm:$0xff]  ;;  %v406_v17 = vld [vmem:[#allocation7 + $0x5a0] sm:$0xff]  ;;  %2349 = vmatpush1.bf16.msra.mxu0 %v2348_v11  ;;  %v3643_v11 = vsub.s32 %v765_v62, %v3640_v61 }
 0x124   :  { %v2350_v16 = vpack.c.bf16 %v407_v9, %v403_v8  ;;  %v283_v18 = vld [vmem:[#allocation7 + $0x1c8] sm:$0xff]  ;;  %2287 = vmatprep.subr.bf16.mxu1 %v2286_v12  ;;  %v2352_v23 = vpack.c.bf16 %v406_v17, %v402_v15  ;;  %v282_v25 = vld [vmem:[#allocation7 + $0x1c0] sm:$0xff] }
 0x125   :  { %v287_v19 = vld [vmem:[#allocation7 + $0x1e8] sm:$0xff]  ;;  %v286_v26 = vld [vmem:[#allocation7 + $0x1e0] sm:$0xff]  ;;  %2289 = vmatpush1.bf16.msra.mxu1 %v2288_v22 }
 0x126   :  { %v411_v20 = vld [vmem:[#allocation7 + $0x5c8] sm:$0xff]  ;;  %v2290_v24 = vpack.c.bf16 %v287_v19, %v283_v18  ;;  %v410_v27 = vld [vmem:[#allocation7 + $0x5c0] sm:$0xff]  ;;  %2351 = vmatprep.subr.bf16.mxu0 %v2350_v16  ;;  %v2292_v34 = vpack.c.bf16 %v286_v26, %v282_v25 }
 0x127   :  { %v415_v21 = vld [vmem:[#allocation7 + $0x5e8] sm:$0xff]  ;;  %v414_v29 = vld [vmem:[#allocation7 + $0x5e0] sm:$0xff]  ;;  %2353 = vmatpush1.bf16.msra.mxu0 %v2352_v23 }
 0x128   :  { %v2354_v28 = vpack.c.bf16 %v415_v21, %v411_v20  ;;  %v291_v30 = vld [vmem:[#allocation7 + $0x208] sm:$0xff]  ;;  %2291 = vmatprep.subr.bf16.mxu1 %v2290_v24  ;;  %v2356_v35 = vpack.c.bf16 %v414_v29, %v410_v27  ;;  %v290_v37 = vld [vmem:[#allocation7 + $0x200] sm:$0xff] }
 0x129   :  { %v295_v31 = vld [vmem:[#allocation7 + $0x228] sm:$0xff]  ;;  %v294_v38 = vld [vmem:[#allocation7 + $0x220] sm:$0xff]  ;;  %2293 = vmatpush1.bf16.msra.mxu1 %v2292_v34 }
 0x12a   :  { %v419_v32 = vld [vmem:[#allocation7 + $0x608] sm:$0xff]  ;;  %v2294_v36 = vpack.c.bf16 %v295_v31, %v291_v30  ;;  %v418_v39 = vld [vmem:[#allocation7 + $0x600] sm:$0xff]  ;;  %2355 = vmatprep.subr.bf16.mxu0 %v2354_v28  ;;  %v2296_v49 = vpack.c.bf16 %v294_v38, %v290_v37 }
 0x12b   :  { %v423_v33 = vld [vmem:[#allocation7 + $0x628] sm:$0xff]  ;;  %v422_v41 = vld [vmem:[#allocation7 + $0x620] sm:$0xff]  ;;  %2357 = vmatpush1.bf16.msra.mxu0 %v2356_v35 }
 0x12c   :  { %v2358_v40 = vpack.c.bf16 %v423_v33, %v419_v32  ;;  %v299_v42 = vld [vmem:[#allocation7 + $0x248] sm:$0xff]  ;;  %2295 = vmatprep.subr.bf16.mxu1 %v2294_v36  ;;  %v2360_v50 = vpack.c.bf16 %v422_v41, %v418_v39  ;;  %v298_v52 = vld [vmem:[#allocation7 + $0x240] sm:$0xff] }
 0x12d   :  { %v303_v43 = vld [vmem:[#allocation7 + $0x268] sm:$0xff]  ;;  %v302_v53 = vld [vmem:[#allocation7 + $0x260] sm:$0xff]  ;;  %2297 = vmatpush1.bf16.msra.mxu1 %v2296_v49 }
 0x12e   :  { %v427_v44 = vld [vmem:[#allocation7 + $0x648] sm:$0xff]  ;;  %v2298_v51 = vpack.c.bf16 %v303_v43, %v299_v42  ;;  %v426_v54 = vld [vmem:[#allocation7 + $0x640] sm:$0xff]  ;;  %2359 = vmatprep.subr.bf16.mxu0 %v2358_v40  ;;  %v2300_v63 = vpack.c.bf16 %v302_v53, %v298_v52 }
 0x12f   :  { %v431_v45 = vld [vmem:[#allocation7 + $0x668] sm:$0xff]  ;;  %v430_v56 = vld [vmem:[#allocation7 + $0x660] sm:$0xff]  ;;  %2361 = vmatpush1.bf16.msra.mxu0 %v2360_v50 }
 0x130   :  { %v2362_v55 = vpack.c.bf16 %v431_v45, %v427_v44  ;;  %v307_v57 = vld [vmem:[#allocation7 + $0x288] sm:$0xff]  ;;  %2299 = vmatprep.subr.bf16.mxu1 %v2298_v51  ;;  %v2364_v0 = vpack.c.bf16 %v430_v56, %v426_v54  ;;  %v306_v2 = vld [vmem:[#allocation7 + $0x280] sm:$0xff] }
 0x131   :  { %v311_v58 = vld [vmem:[#allocation7 + $0x2a8] sm:$0xff]  ;;  %v310_v3 = vld [vmem:[#allocation7 + $0x2a0] sm:$0xff]  ;;  %2301 = vmatpush1.bf16.msra.mxu1 %v2300_v63 }
 0x132   :  { %v435_v59 = vld [vmem:[#allocation7 + $0x688] sm:$0xff]  ;;  %v2302_v1 = vpack.c.bf16 %v311_v58, %v307_v57  ;;  %v434_v4 = vld [vmem:[#allocation7 + $0x680] sm:$0xff]  ;;  %2363 = vmatprep.subr.bf16.mxu0 %v2362_v55  ;;  %v2304_v12 = vpack.c.bf16 %v310_v3, %v306_v2 }
 0x133   :  { %v439_v60 = vld [vmem:[#allocation7 + $0x6a8] sm:$0xff]  ;;  %v438_v6 = vld [vmem:[#allocation7 + $0x6a0] sm:$0xff]  ;;  %2365 = vmatpush1.bf16.msra.mxu0 %v2364_v0 }
 0x134   :  { %v2366_v5 = vpack.c.bf16 %v439_v60, %v435_v59  ;;  %v315_v7 = vld [vmem:[#allocation7 + $0x2c8] sm:$0xff]  ;;  %v314_v13 = vld [vmem:[#allocation7 + $0x2c0] sm:$0xff]  ;;  %2303 = vmatprep.subr.bf16.mxu1 %v2302_v1  ;;  %v2368_v14 = vpack.c.bf16 %v438_v6, %v434_v4 }
 0x135   :  { %v319_v8 = vld [vmem:[#allocation7 + $0x2e8] sm:$0xff]  ;;  %v318_v16 = vld [vmem:[#allocation7 + $0x2e0] sm:$0xff]  ;;  %2305 = vmatpush1.bf16.msra.mxu1 %v2304_v12 }
 0x136   :  { %v443_v9 = vld [vmem:[#allocation7 + $0x6c8] sm:$0xff]  ;;  %v2306_v15 = vpack.c.bf16 %v319_v8, %v315_v7  ;;  %v442_v17 = vld [vmem:[#allocation7 + $0x6c0] sm:$0xff]  ;;  %2367 = vmatprep.subr.bf16.mxu0 %v2366_v5  ;;  %v2308_v27 = vpack.c.bf16 %v318_v16, %v314_v13  ;;  %v229_v13 = vld [vmem:[#allocation7 + $0x18] sm:$0xff] }
 0x137   :  { %v447_v10 = vld [vmem:[#allocation7 + $0x6e8] sm:$0xff]  ;;  %v446_v18 = vld [vmem:[#allocation7 + $0x6e0] sm:$0xff]  ;;  %2369 = vmatpush1.bf16.msra.mxu0 %v2368_v14  ;;  %v233_v14 = vld [vmem:[#allocation7 + $0x38] sm:$0xff] }
 0x138   :  { %v2370_v19 = vpack.c.bf16 %v447_v10, %v443_v9  ;;  %v323_v20 = vld [vmem:[#allocation7 + $0x308] sm:$0xff]  ;;  %v2372_v28 = vpack.c.bf16 %v446_v18, %v442_v17  ;;  %2307 = vmatprep.subr.bf16.mxu1 %v2306_v15  ;;  %v322_v30 = vld [vmem:[#allocation7 + $0x300] sm:$0xff] }
 0x139   :  { %v327_v21 = vld [vmem:[#allocation7 + $0x328] sm:$0xff]  ;;  %v326_v31 = vld [vmem:[#allocation7 + $0x320] sm:$0xff]  ;;  %2309 = vmatpush1.bf16.msra.mxu1 %v2308_v27  ;;  %v241_v27 = vld [vmem:[#allocation7 + $0x78] sm:$0xff] }
 0x13a   :  { %v224_v22 = vld [vmem:[#allocation2] sm:$0xff]  ;;  %v2310_v29 = vpack.c.bf16 %v327_v21, %v323_v20  ;;  %v450_v32 = vld [vmem:[#allocation7 + $0x700] sm:$0xff]  ;;  %2371 = vmatprep.subr.bf16.mxu0 %v2370_v19  ;;  %v2312_v42 = vpack.c.bf16 %v326_v31, %v322_v30  ;;  %v2518_v19 = vpack.c.bf16 %v233_v14, %v229_v13 }
 0x13b   :  { %v451_v23 = vld [vmem:[#allocation7 + $0x708] sm:$0xff]  ;;  %v3646_v25 = vrot.slane %v224_v22, %v3643_v11  ;;  %v762_v26 = vcombine.high %v224_v22, %v224_v22  ;;  %v454_v36 = vld [vmem:[#allocation7 + $0x720] sm:$0xff]  ;;  %2373 = vmatpush1.bf16.msra.mxu0 %v2372_v28  ;;  %v228_v21 = vld [vmem:[#allocation7 + $0x10] sm:$0xff] }
 0x13c   :  { %v455_v24 = vld [vmem:[#allocation7 + $0x728] sm:$0xff]  ;;  %2311 = vmatprep.subr.bf16.mxu1 %v2310_v29  ;;  %v2376_v43 = vpack.c.bf16 %v454_v36, %v450_v32  ;;  %v330_v45 = vld [vmem:[#allocation7 + $0x340] sm:$0xff]  ;;  %v232_v22 = vld [vmem:[#allocation7 + $0x30] sm:$0xff] }
 0x13d   :  { %v3650_v33 = vcombine.high %v3646_v25, %v3646_v25  ;;  %v3653_v34 = vrot.slane %v762_v26, %v3643_v11  ;;  %v2374_v35 = vpack.c.bf16 %v455_v24, %v451_v23  ;;  %v331_v37 = vld [vmem:[#allocation7 + $0x348] sm:$0xff]  ;;  %v334_v47 = vld [vmem:[#allocation7 + $0x360] sm:$0xff]  ;;  %2313 = vmatpush1.bf16.msra.mxu1 %v2312_v42  ;;  %v237_v26 = vld [vmem:[#allocation7 + $0x58] sm:$0xff]  ;;  %v2520_v30 = vpack.c.bf16 %v232_v22, %v228_v21 }
 0x13e   :  { %v335_v38 = vld [vmem:[#allocation7 + $0x368] sm:$0xff]  ;;  %v458_v48 = vld [vmem:[#allocation7 + $0x740] sm:$0xff]  ;;  %v2316_v55 = vpack.c.bf16 %v334_v47, %v330_v45  ;;  %v2522_v32 = vpack.c.bf16 %v241_v27, %v237_v26  ;;  %v236_v36 = vld [vmem:[#allocation7 + $0x50] sm:$0xff] }
 0x13f   :  { %v459_v39 = vld [vmem:[#allocation7 + $0x748] sm:$0xff]  ;;  %868 = vmatprep.mubr.f32.mxu1 %v3650_v33  ;;  %v3658_v41 = vcombine.high %v3653_v34, %v3653_v34  ;;  %v2314_v44 = vpack.c.bf16 %v335_v38, %v331_v37  ;;  %2375 = vmatprep.subr.bf16.mxu0 %v2374_v35  ;;  %v462_v50 = vld [vmem:[#allocation7 + $0x760] sm:$0xff]  ;;  %v240_v37 = vld [vmem:[#allocation7 + $0x70] sm:$0xff] }
 0x140   :  { %v463_v40 = vld [vmem:[#allocation7 + $0x768] sm:$0xff]  ;;  %2377 = vmatpush1.bf16.msra.mxu0 %v2376_v43  ;;  %v2380_v56 = vpack.c.bf16 %v462_v50, %v458_v48  ;;  %v338_v58 = vld [vmem:[#allocation7 + $0x380] sm:$0xff]  ;;  %v249_v42 = vld [vmem:[#allocation7 + $0xb8] sm:$0xff]  ;;  %v2524_v45 = vpack.c.bf16 %v240_v37, %v236_v36 }
 0x141   :  { %v2378_v49 = vpack.c.bf16 %v463_v40, %v459_v39  ;;  %v339_v51 = vld [vmem:[#allocation7 + $0x388] sm:$0xff]  ;;  %939 = vmatprep.mubr.f32.mxu0 %v3658_v41  ;;  %2315 = vmatprep.subr.bf16.mxu1 %v2314_v44  ;;  %v342_v59 = vld [vmem:[#allocation7 + $0x3a0] sm:$0xff]  ;;  %v245_v40 = vld [vmem:[#allocation7 + $0x98] sm:$0xff] }
 0x142   :  { %v343_v52 = vld [vmem:[#allocation7 + $0x3a8] sm:$0xff]  ;;  %v466_v60 = vld [vmem:[#allocation7 + $0x780] sm:$0xff]  ;;  %2317 = vmatpush1.bf16.msra.mxu1 %v2316_v55  ;;  %v2320_v4 = vpack.c.bf16 %v342_v59, %v338_v58  ;;  %v2526_v48 = vpack.c.bf16 %v249_v42, %v245_v40  ;;  %v244_v50 = vld [vmem:[#allocation7 + $0x90] sm:$0xff] }
 0x143   :  { %v467_v53 = vld [vmem:[#allocation7 + $0x788] sm:$0xff]  ;;  %v2318_v57 = vpack.c.bf16 %v343_v52, %v339_v51  ;;  %2379 = vmatprep.subr.bf16.mxu0 %v2378_v49  ;;  %v470_v63 = vld [vmem:[#allocation7 + $0x7a0] sm:$0xff]  ;;  %v248_v51 = vld [vmem:[#allocation7 + $0xb0] sm:$0xff] }
 0x144   :  { %v471_v54 = vld [vmem:[#allocation7 + $0x7a8] sm:$0xff]  ;;  %2381 = vmatpush1.bf16.msra.mxu0 %v2380_v56  ;;  %v2384_v5 = vpack.c.bf16 %v470_v63, %v466_v60  ;;  %v346_v7 = vld [vmem:[#allocation7 + $0x3c0] sm:$0xff]  ;;  %v257_v55 = vld [vmem:[#allocation7 + $0xf8] sm:$0xff]  ;;  %v2528_v58 = vpack.c.bf16 %v248_v51, %v244_v50 }
 0x145   :  { %v2382_v62 = vpack.c.bf16 %v471_v54, %v467_v53  ;;  %v347_v0 = vld [vmem:[#allocation7 + $0x3c8] sm:$0xff]  ;;  %2319 = vmatprep.subr.bf16.mxu1 %v2318_v57  ;;  %v350_v8 = vld [vmem:[#allocation7 + $0x3e0] sm:$0xff]  ;;  %v253_v54 = vld [vmem:[#allocation7 + $0xd8] sm:$0xff] }
 0x146   :  { %v351_v1 = vld [vmem:[#allocation7 + $0x3e8] sm:$0xff]  ;;  %v474_v9 = vld [vmem:[#allocation7 + $0x7c0] sm:$0xff]  ;;  %2321 = vmatpush1.bf16.msra.mxu1 %v2320_v4  ;;  %v2324_v17 = vpack.c.bf16 %v350_v8, %v346_v7  ;;  %v2530_v60 = vpack.c.bf16 %v257_v55, %v253_v54  ;;  %v252_v63 = vld [vmem:[#allocation7 + $0xd0] sm:$0xff] }
 0x147   :  { %v475_v2 = vld [vmem:[#allocation7 + $0x7c8] sm:$0xff]  ;;  %v2322_v6 = vpack.c.bf16 %v351_v1, %v347_v0  ;;  %2383 = vmatprep.subr.bf16.mxu0 %v2382_v62  ;;  %v478_v12 = vld [vmem:[#allocation7 + $0x7e0] sm:$0xff]  ;;  %v256_v0 = vld [vmem:[#allocation7 + $0xf0] sm:$0xff] }
 0x148   :  { %v479_v3 = vld [vmem:[#allocation7 + $0x7e8] sm:$0xff]  ;;  %2385 = vmatpush1.bf16.msra.mxu0 %v2384_v5  ;;  %v2388_v18 = vpack.c.bf16 %v478_v12, %v474_v9  ;;  %v482_v20 = vld [vmem:[#allocation7 + $0x800] sm:$0xff]  ;;  %v265_v4 = vld [vmem:[#allocation7 + $0x138] sm:$0xff] }
 0x149   :  { %v2386_v10 = vpack.c.bf16 %v479_v3, %v475_v2  ;;  %v483_v15 = vld [vmem:[#allocation7 + $0x808] sm:$0xff]  ;;  %2323 = vmatprep.subr.bf16.mxu1 %v2322_v6  ;;  %v486_v24 = vld [vmem:[#allocation7 + $0x820] sm:$0xff]  ;;  %v261_v3 = vld [vmem:[#allocation7 + $0x118] sm:$0xff] }
 0x14a   :  { %v487_v16 = vld [vmem:[#allocation7 + $0x828] sm:$0xff]  ;;  %2325 = vmatpush1.bf16.msra.mxu1 %v2324_v17  ;;  %v2392_v31 = vpack.c.bf16 %v486_v24, %v482_v20  ;;  %v490_v35 = vld [vmem:[#allocation7 + $0x840] sm:$0xff]  ;;  %v2534_v8 = vpack.c.bf16 %v265_v4, %v261_v3  ;;  %v264_v12 = vld [vmem:[#allocation7 + $0x130] sm:$0xff] }
 0x14b   :  { %2387 = vmatprep.subr.bf16.mxu0 %v2386_v10  ;;  %v2390_v23 = vpack.c.bf16 %v487_v16, %v483_v15  ;;  %v491_v28 = vld [vmem:[#allocation7 + $0x848] sm:$0xff]  ;;  %2519 = vmatprep.subr.bf16.mxu1 %v2518_v19  ;;  %v494_v39 = vld [vmem:[#allocation7 + $0x860] sm:$0xff]  ;;  %v260_v10 = vld [vmem:[#allocation7 + $0x110] sm:$0xff] }
 0x14c   :  { %v495_v29 = vld [vmem:[#allocation7 + $0x868] sm:$0xff]  ;;  %2389 = vmatpush1.bf16.msra.mxu0 %v2388_v18  ;;  %v2396_v47 = vpack.c.bf16 %v494_v39, %v490_v35  ;;  %v498_v49 = vld [vmem:[#allocation7 + $0x880] sm:$0xff]  ;;  %v269_v15 = vld [vmem:[#allocation7 + $0x158] sm:$0xff]  ;;  %v2536_v19 = vpack.c.bf16 %v264_v12, %v260_v10 }
 0x14d   :  { %2391 = vmatprep.subr.bf16.mxu0 %v2390_v23  ;;  %v2394_v38 = vpack.c.bf16 %v495_v29, %v491_v28  ;;  %869 = vmatmul.mubr.f32.vlgmr.msra.gmra.mrb[0].mxu1 %v3646_v25  ;;  %v499_v43 = vld [vmem:[#allocation7 + $0x888] sm:$0xff]  ;;  %v502_v53 = vld [vmem:[#allocation7 + $0x8a0] sm:$0xff]  ;;  %v273_v16 = vld [vmem:[#allocation7 + $0x178] sm:$0xff] }
 0x14e   :  { %v503_v44 = vld [vmem:[#allocation7 + $0x8a8] sm:$0xff]  ;;  %2521 = vmatpush1.bf16.msra.mxu1 %v2520_v30  ;;  %1152 = vmatprep.mubr.f32.mxu1 %v3650_v33  ;;  %v2400_v59 = vpack.c.bf16 %v502_v53, %v498_v49  ;;  %v506_v62 = vld [vmem:[#allocation7 + $0x8c0] sm:$0xff]  ;;  %v2532_v33 = vpack.c.bf16 %v256_v0, %v252_v63  ;;  %v2538_v21 = vpack.c.bf16 %v273_v16, %v269_v15  ;;  %v268_v23 = vld [vmem:[#allocation7 + $0x150] sm:$0xff] }
 0x14f   :  { %940 = vmatmul.mubr.f32.vlgmr.msra.gmra.mrb[0].mxu0 %v3653_v34  ;;  %2523 = vmatprep.subr.bf16.mxu1 %v2522_v32  ;;  %v2398_v52 = vpack.c.bf16 %v503_v44, %v499_v43  ;;  %v507_v56 = vld [vmem:[#allocation7 + $0x8c8] sm:$0xff]  ;;  %v510_v2 = vld [vmem:[#allocation7 + $0x8e0] sm:$0xff]  ;;  %v272_v24 = vld [vmem:[#allocation7 + $0x170] sm:$0xff] }
 0x150   :  { %2393 = vmatpush1.bf16.msra.mxu0 %v2392_v31  ;;  %v511_v57 = vld [vmem:[#allocation7 + $0x8e8] sm:$0xff]  ;;  %v2404_v7 = vpack.c.bf16 %v510_v2, %v506_v62  ;;  %v514_v9 = vld [vmem:[#allocation7 + $0x900] sm:$0xff]  ;;  %v277_v28 = vld [vmem:[#allocation7 + $0x198] sm:$0xff]  ;;  %v2540_v32 = vpack.c.bf16 %v272_v24, %v268_v23 }
 0x151   :  { %2395 = vmatprep.subr.bf16.mxu0 %v2394_v38  ;;  %v2402_v1 = vpack.c.bf16 %v511_v57, %v507_v56  ;;  %v515_v5 = vld [vmem:[#allocation7 + $0x908] sm:$0xff]  ;;  %v518_v14 = vld [vmem:[#allocation7 + $0x920] sm:$0xff]  ;;  %v281_v29 = vld [vmem:[#allocation7 + $0x1b8] sm:$0xff] }
 0x152   :  { %2525 = vmatpush1.bf16.msra.mxu1 %v2524_v45  ;;  %v519_v6 = vld [vmem:[#allocation7 + $0x928] sm:$0xff]  ;;  %v2408_v20 = vpack.c.bf16 %v518_v14, %v514_v9  ;;  %v522_v22 = vld [vmem:[#allocation7 + $0x940] sm:$0xff]  ;;  %v2542_v37 = vpack.c.bf16 %v281_v29, %v277_v28  ;;  %v276_v38 = vld [vmem:[#allocation7 + $0x190] sm:$0xff] }
 0x153   :  { %2527 = vmatprep.subr.bf16.mxu1 %v2526_v48  ;;  %v2406_v13 = vpack.c.bf16 %v519_v6, %v515_v5  ;;  %v523_v17 = vld [vmem:[#allocation7 + $0x948] sm:$0xff]  ;;  %v526_v27 = vld [vmem:[#allocation7 + $0x960] sm:$0xff]  ;;  %v280_v39 = vld [vmem:[#allocation7 + $0x1b0] sm:$0xff] }
 0x154   :  { %2397 = vmatpush1.bf16.msra.mxu0 %v2396_v47  ;;  %v527_v18 = vld [vmem:[#allocation7 + $0x968] sm:$0xff]  ;;  %v530_v35 = vld [vmem:[#allocation7 + $0x980] sm:$0xff]  ;;  %v2412_v36 = vpack.c.bf16 %v526_v27, %v522_v22  ;;  %v3664_v40 = vld [vmem:[#allocation2 + $0x8] sm:$0xff]  ;;  %v2544_v50 = vpack.c.bf16 %v280_v39, %v276_v38 }
 0x155   :  { %2399 = vmatprep.subr.bf16.mxu0 %v2398_v52  ;;  %v2410_v26 = vpack.c.bf16 %v527_v18, %v523_v17  ;;  %v531_v30 = vld [vmem:[#allocation7 + $0x988] sm:$0xff]  ;;  %v534_v43 = vld [vmem:[#allocation7 + $0x9a0] sm:$0xff]  ;;  %v285_v44 = vld [vmem:[#allocation7 + $0x1d8] sm:$0xff]  ;;  %v3668_v47 = vrot.slane %v3664_v40, %v3643_v11 }
 0x156   :  { %2529 = vmatpush1.bf16.msra.mxu1 %v2528_v58  ;;  %v535_v31 = vld [vmem:[#allocation7 + $0x9a8] sm:$0xff]  ;;  %v289_v45 = vld [vmem:[#allocation7 + $0x1f8] sm:$0xff]  ;;  %v2416_v52 = vpack.c.bf16 %v534_v43, %v530_v35  ;;  %v538_v54 = vld [vmem:[#allocation7 + $0x9c0] sm:$0xff] }
 0x157   :  { %2531 = vmatprep.subr.bf16.mxu1 %v2530_v60  ;;  %v2414_v42 = vpack.c.bf16 %v535_v31, %v531_v30  ;;  %v539_v48 = vld [vmem:[#allocation7 + $0x9c8] sm:$0xff]  ;;  %v3672_v51 = vcombine.high %v3668_v47, %v3668_v47  ;;  %v2546_v53 = vpack.c.bf16 %v289_v45, %v285_v44  ;;  %v284_v55 = vld [vmem:[#allocation7 + $0x1d0] sm:$0xff]  ;;  %v542_v58 = vld [vmem:[#allocation7 + $0x9e0] sm:$0xff] }
 0x158   :  { %2401 = vmatpush1.bf16.msra.mxu0 %v2400_v59  ;;  %v543_v49 = vld [vmem:[#allocation7 + $0x9e8] sm:$0xff]  ;;  %v288_v56 = vld [vmem:[#allocation7 + $0x1f0] sm:$0xff]  ;;  %v293_v59 = vld [vmem:[#allocation7 + $0x218] sm:$0xff] }
 0x159   :  { %2403 = vmatprep.subr.bf16.mxu0 %v2402_v1  ;;  %v2418_v57 = vpack.c.bf16 %v543_v49, %v539_v48  ;;  %v297_v60 = vld [vmem:[#allocation7 + $0x238] sm:$0xff]  ;;  %1010 = vmatprep.mubr.f32.mxu0 %v3672_v51  ;;  %v547_v62 = vld [vmem:[#allocation7 + $0xa08] sm:$0xff]  ;;  %v2548_v0 = vpack.c.bf16 %v288_v56, %v284_v55  ;;  %v2420_v1 = vpack.c.bf16 %v542_v58, %v538_v54  ;;  %v546_v3 = vld [vmem:[#allocation7 + $0xa00] sm:$0xff] }
 0x15a   :  { %2533 = vmatpush1.bf16.msra.mxu1 %v2532_v33  ;;  %v551_v63 = vld [vmem:[#allocation7 + $0xa28] sm:$0xff]  ;;  %v2550_v2 = vpack.c.bf16 %v297_v60, %v293_v59  ;;  %v292_v4 = vld [vmem:[#allocation7 + $0x210] sm:$0xff]  ;;  %v550_v33 = vld [vmem:[#allocation7 + $0xa20] sm:$0xff] }
 0x15b   :  { %2535 = vmatprep.subr.bf16.mxu1 %v2534_v8  ;;  %v296_v5 = vld [vmem:[#allocation7 + $0x230] sm:$0xff]  ;;  %v2422_v6 = vpack.c.bf16 %v551_v63, %v547_v62  ;;  %v305_v8 = vld [vmem:[#allocation7 + $0x278] sm:$0xff]  ;;  %v555_v9 = vld [vmem:[#allocation7 + $0xa48] sm:$0xff] }
 0x15c   :  { %2405 = vmatpush1.bf16.msra.mxu0 %v2404_v7  ;;  %v301_v7 = vld [vmem:[#allocation7 + $0x258] sm:$0xff]  ;;  %v559_v10 = vld [vmem:[#allocation7 + $0xa68] sm:$0xff]  ;;  %v2552_v12 = vpack.c.bf16 %v296_v5, %v292_v4  ;;  %v554_v15 = vld [vmem:[#allocation7 + $0xa40] sm:$0xff] }
 0x15d   :  { %2407 = vmatprep.subr.bf16.mxu0 %v2406_v13  ;;  %v2424_v13 = vpack.c.bf16 %v550_v33, %v546_v3  ;;  %v2554_v14 = vpack.c.bf16 %v305_v8, %v301_v7  ;;  %v300_v16 = vld [vmem:[#allocation7 + $0x250] sm:$0xff]  ;;  %v2426_v18 = vpack.c.bf16 %v559_v10, %v555_v9  ;;  %v563_v22 = vld [vmem:[#allocation7 + $0xa88] sm:$0xff]  ;;  %v562_v28 = vld [vmem:[#allocation7 + $0xa80] sm:$0xff] }
 0x15e   :  { %2537 = vmatpush1.bf16.msra.mxu1 %v2536_v19  ;;  %v304_v17 = vld [vmem:[#allocation7 + $0x270] sm:$0xff]  ;;  %v558_v19 = vld [vmem:[#allocation7 + $0xa60] sm:$0xff]  ;;  %v567_v23 = vld [vmem:[#allocation7 + $0xaa8] sm:$0xff] }
 0x15f   :  { %2539 = vmatprep.subr.bf16.mxu1 %v2538_v21  ;;  %v313_v21 = vld [vmem:[#allocation7 + $0x2b8] sm:$0xff]  ;;  %v2556_v24 = vpack.c.bf16 %v304_v17, %v300_v16  ;;  %v308_v29 = vld [vmem:[#allocation7 + $0x290] sm:$0xff]  ;;  %v2430_v31 = vpack.c.bf16 %v567_v23, %v563_v22  ;;  %v575_v38 = vld [vmem:[#allocation7 + $0xae8] sm:$0xff] }
 0x160   :  { %2409 = vmatpush1.bf16.msra.mxu0 %v2408_v20  ;;  %v309_v20 = vld [vmem:[#allocation7 + $0x298] sm:$0xff]  ;;  %v312_v30 = vld [vmem:[#allocation7 + $0x2b0] sm:$0xff]  ;;  %v570_v44 = vld [vmem:[#allocation7 + $0xac0] sm:$0xff] }
 0x161   :  { %2411 = vmatprep.subr.bf16.mxu0 %v2410_v26  ;;  %v2428_v26 = vpack.c.bf16 %v558_v19, %v554_v15  ;;  %v2558_v27 = vpack.c.bf16 %v313_v21, %v309_v20  ;;  %v317_v35 = vld [vmem:[#allocation7 + $0x2d8] sm:$0xff]  ;;  %v2560_v39 = vpack.c.bf16 %v312_v30, %v308_v29  ;;  %v316_v45 = vld [vmem:[#allocation7 + $0x2d0] sm:$0xff]  ;;  %v579_v54 = vld [vmem:[#allocation7 + $0xb08] sm:$0xff] }
 0x162   :  { %2541 = vmatpush1.bf16.msra.mxu1 %v2540_v32  ;;  %v566_v32 = vld [vmem:[#allocation7 + $0xaa0] sm:$0xff]  ;;  %v320_v48 = vld [vmem:[#allocation7 + $0x2f0] sm:$0xff]  ;;  %v583_v55 = vld [vmem:[#allocation7 + $0xb28] sm:$0xff] }
 0x163   :  { %2543 = vmatprep.subr.bf16.mxu1 %v2542_v37  ;;  %v571_v37 = vld [vmem:[#allocation7 + $0xac8] sm:$0xff]  ;;  %v2564_v56 = vpack.c.bf16 %v320_v48, %v316_v45  ;;  %v578_v59 = vld [vmem:[#allocation7 + $0xb00] sm:$0xff]  ;;  %v324_v60 = vld [vmem:[#allocation7 + $0x310] sm:$0xff]  ;;  %v2438_v63 = vpack.c.bf16 %v583_v55, %v579_v54 }
 0x164   :  { %2413 = vmatpush1.bf16.msra.mxu0 %v2412_v36  ;;  %v321_v36 = vld [vmem:[#allocation7 + $0x2f8] sm:$0xff]  ;;  %v2434_v49 = vpack.c.bf16 %v575_v38, %v571_v37  ;;  %v328_v62 = vld [vmem:[#allocation7 + $0x330] sm:$0xff]  ;;  %v587_v3 = vld [vmem:[#allocation7 + $0xb48] sm:$0xff] }
 0x165   :  { %2415 = vmatprep.subr.bf16.mxu0 %v2414_v42  ;;  %v2432_v42 = vpack.c.bf16 %v566_v32, %v562_v28  ;;  %v2562_v43 = vpack.c.bf16 %v321_v36, %v317_v35  ;;  %v591_v4 = vld [vmem:[#allocation7 + $0xb68] sm:$0xff]  ;;  %v2568_v5 = vpack.c.bf16 %v328_v62, %v324_v60  ;;  %v586_v7 = vld [vmem:[#allocation7 + $0xb40] sm:$0xff]  ;;  %v332_v8 = vld [vmem:[#allocation7 + $0x350] sm:$0xff] }
 0x166   :  { %2545 = vmatpush1.bf16.msra.mxu1 %v2544_v50  ;;  %v574_v50 = vld [vmem:[#allocation7 + $0xae0] sm:$0xff]  ;;  %v336_v9 = vld [vmem:[#allocation7 + $0x370] sm:$0xff]  ;;  %v2442_v10 = vpack.c.bf16 %v591_v4, %v587_v3  ;;  %v595_v15 = vld [vmem:[#allocation7 + $0xb88] sm:$0xff] }
 0x167   :  { %2547 = vmatprep.subr.bf16.mxu1 %v2546_v53  ;;  %v329_v53 = vld [vmem:[#allocation7 + $0x338] sm:$0xff]  ;;  %v599_v16 = vld [vmem:[#allocation7 + $0xba8] sm:$0xff]  ;;  %v2572_v17 = vpack.c.bf16 %v336_v9, %v332_v8  ;;  %v594_v20 = vld [vmem:[#allocation7 + $0xb80] sm:$0xff] }
 0x168   :  { %2417 = vmatpush1.bf16.msra.mxu0 %v2416_v52  ;;  %v325_v52 = vld [vmem:[#allocation7 + $0x318] sm:$0xff]  ;;  %v340_v21 = vld [vmem:[#allocation7 + $0x390] sm:$0xff]  ;;  %v2446_v23 = vpack.c.bf16 %v599_v16, %v595_v15  ;;  %v603_v28 = vld [vmem:[#allocation7 + $0xbc8] sm:$0xff] }
 0x169   :  { %2419 = vmatprep.subr.bf16.mxu0 %v2418_v57  ;;  %v2436_v57 = vpack.c.bf16 %v574_v50, %v570_v44  ;;  %v2566_v58 = vpack.c.bf16 %v329_v53, %v325_v52  ;;  %v344_v22 = vld [vmem:[#allocation7 + $0x3b0] sm:$0xff]  ;;  %v607_v29 = vld [vmem:[#allocation7 + $0xbe8] sm:$0xff]  ;;  %v602_v35 = vld [vmem:[#allocation7 + $0xbc0] sm:$0xff]  ;;  %v779_v44 = vcombine.high %v3664_v40, %v3664_v40 }
 0x16a   :  { %2549 = vmatpush1.bf16.msra.mxu1 %v2548_v0  ;;  %v582_v0 = vld [vmem:[#allocation7 + $0xb20] sm:$0xff]  ;;  %v2576_v30 = vpack.c.bf16 %v344_v22, %v340_v21  ;;  %v348_v36 = vld [vmem:[#allocation7 + $0x3d0] sm:$0xff]  ;;  %v2450_v38 = vpack.c.bf16 %v607_v29, %v603_v28  ;;  %v611_v45 = vld [vmem:[#allocation7 + $0xc08] sm:$0xff] }
 0x16b   :  { %2551 = vmatprep.subr.bf16.mxu1 %v2550_v2  ;;  %v337_v2 = vld [vmem:[#allocation7 + $0x378] sm:$0xff]  ;;  %v352_v37 = vld [vmem:[#allocation7 + $0x3f0] sm:$0xff]  ;;  %v615_v48 = vld [vmem:[#allocation7 + $0xc28] sm:$0xff]  ;;  %v3678_v60 = vrot.slane %v779_v44, %v3643_v11 }
 0x16c   :  { %2421 = vmatpush1.bf16.msra.mxu0 %v2420_v1  ;;  %v333_v1 = vld [vmem:[#allocation7 + $0x358] sm:$0xff]  ;;  %v610_v53 = vld [vmem:[#allocation7 + $0xc00] sm:$0xff]  ;;  %v356_v54 = vld [vmem:[#allocation7 + $0x410] sm:$0xff] }
 0x16d   :  { %2423 = vmatprep.subr.bf16.mxu0 %v2422_v6  ;;  %v2440_v6 = vpack.c.bf16 %v582_v0, %v578_v59  ;;  %v2570_v33 = vpack.c.bf16 %v337_v2, %v333_v1  ;;  %v360_v55 = vld [vmem:[#allocation7 + $0x430] sm:$0xff]  ;;  %v369_v59 = vld [vmem:[#allocation7 + $0x478] sm:$0xff]  ;;  %v619_v40 = vld [vmem:[#allocation7 + $0xc48] sm:$0xff]  ;;  %v3682_v11 = vcombine.high %v3678_v60, %v3678_v60 }
 0x16e   :  { %2553 = vmatpush1.bf16.msra.mxu1 %v2552_v12  ;;  %v590_v12 = vld [vmem:[#allocation7 + $0xb60] sm:$0xff]  ;;  %v623_v62 = vld [vmem:[#allocation7 + $0xc68] sm:$0xff]  ;;  %v364_v3 = vld [vmem:[#allocation7 + $0x450] sm:$0xff] }
 0x16f   :  { %2555 = vmatprep.subr.bf16.mxu1 %v2554_v14  ;;  %v345_v14 = vld [vmem:[#allocation7 + $0x3b8] sm:$0xff]  ;;  %v618_v2 = vld [vmem:[#allocation7 + $0xc40] sm:$0xff]  ;;  %v368_v4 = vld [vmem:[#allocation7 + $0x470] sm:$0xff] }
 0x170   :  { %2425 = vmatpush1.bf16.msra.mxu0 %v2424_v13  ;;  %v341_v13 = vld [vmem:[#allocation7 + $0x398] sm:$0xff]  ;;  %v627_v8 = vld [vmem:[#allocation7 + $0xc88] sm:$0xff]  ;;  %v372_v15 = vld [vmem:[#allocation7 + $0x490] sm:$0xff] }
 0x171   :  { %2427 = vmatprep.subr.bf16.mxu0 %v2426_v18  ;;  %v2444_v18 = vpack.c.bf16 %v590_v12, %v586_v7  ;;  %v2574_v19 = vpack.c.bf16 %v345_v14, %v341_v13  ;;  %v377_v7 = vld [vmem:[#allocation7 + $0x4b8] sm:$0xff]  ;;  %v631_v9 = vld [vmem:[#allocation7 + $0xca8] sm:$0xff]  ;;  %v626_v14 = vld [vmem:[#allocation7 + $0xc80] sm:$0xff] }
 0x172   :  { %2557 = vmatpush1.bf16.msra.mxu1 %v2556_v24  ;;  %v598_v24 = vld [vmem:[#allocation7 + $0xba0] sm:$0xff]  ;;  %v376_v16 = vld [vmem:[#allocation7 + $0x4b0] sm:$0xff]  ;;  %v639_v21 = vld [vmem:[#allocation7 + $0xce8] sm:$0xff] }
 0x173   :  { %2559 = vmatprep.subr.bf16.mxu1 %v2558_v27  ;;  %v353_v27 = vld [vmem:[#allocation7 + $0x3f8] sm:$0xff]  ;;  %v2592_v22 = vpack.c.bf16 %v376_v16, %v372_v15  ;;  %v384_v28 = vld [vmem:[#allocation7 + $0x4f0] sm:$0xff] }
 0x174   :  { %2429 = vmatpush1.bf16.msra.mxu0 %v2428_v26  ;;  %v349_v26 = vld [vmem:[#allocation7 + $0x3d8] sm:$0xff] }
 0x175   :  { %2431 = vmatprep.subr.bf16.mxu0 %v2430_v31  ;;  %v2448_v31 = vpack.c.bf16 %v598_v24, %v594_v20  ;;  %v2578_v32 = vpack.c.bf16 %v353_v27, %v349_v26  ;;  %v385_v20 = vld [vmem:[#allocation7 + $0x4f8] sm:$0xff]  ;;  %v634_v26 = vld [vmem:[#allocation7 + $0xcc0] sm:$0xff]  ;;  %v380_v27 = vld [vmem:[#allocation7 + $0x4d0] sm:$0xff] }
 0x176   :  { %2561 = vmatpush1.bf16.msra.mxu1 %v2560_v39  ;;  %v606_v39 = vld [vmem:[#allocation7 + $0xbe0] sm:$0xff] }
 0x177   :  { %2563 = vmatprep.subr.bf16.mxu1 %v2562_v43  ;;  %v361_v43 = vld [vmem:[#allocation7 + $0x438] sm:$0xff]  ;;  %v2452_v50 = vpack.c.bf16 %v606_v39, %v602_v35  ;;  %v643_v35 = vld [vmem:[#allocation7 + $0xd08] sm:$0xff]  ;;  %v642_v39 = vld [vmem:[#allocation7 + $0xd00] sm:$0xff] }
 0x178   :  { %2433 = vmatpush1.bf16.msra.mxu0 %v2432_v42  ;;  %v357_v42 = vld [vmem:[#allocation7 + $0x418] sm:$0xff] }
 0x179   :  { %2435 = vmatprep.subr.bf16.mxu0 %v2434_v49  ;;  %v2580_v49 = vpack.c.bf16 %v352_v37, %v348_v36  ;;  %v2582_v52 = vpack.c.bf16 %v361_v43, %v357_v42  ;;  %v647_v36 = vld [vmem:[#allocation7 + $0xd28] sm:$0xff]  ;;  %v2596_v37 = vpack.c.bf16 %v384_v28, %v380_v27  ;;  %v388_v42 = vld [vmem:[#allocation7 + $0x510] sm:$0xff] }
 0x17a   :  { %2565 = vmatpush1.bf16.msra.mxu1 %v2564_v56  ;;  %v2454_v56 = vpack.c.bf16 %v615_v48, %v611_v45  ;;  %v392_v43 = vld [vmem:[#allocation7 + $0x530] sm:$0xff]  ;;  %v2470_v44 = vpack.c.bf16 %v647_v36, %v643_v35  ;;  %v646_v45 = vld [vmem:[#allocation7 + $0xd20] sm:$0xff]  ;;  %v397_v48 = vld [vmem:[#allocation7 + $0x558] sm:$0xff] }
 0x17b   :  { %2567 = vmatprep.subr.bf16.mxu1 %v2566_v58  ;;  %v365_v58 = vld [vmem:[#allocation7 + $0x458] sm:$0xff]  ;;  %v678_v35 = vld [vmem:[#allocation7 + $0xe20] sm:$0xff] }
 0x17c   :  { %2437 = vmatpush1.bf16.msra.mxu0 %v2436_v57  ;;  %v614_v57 = vld [vmem:[#allocation7 + $0xc20] sm:$0xff]  ;;  %v2586_v1 = vpack.c.bf16 %v369_v59, %v365_v58  ;;  %v400_v58 = vld [vmem:[#allocation7 + $0x570] sm:$0xff]  ;;  %v429_v36 = vld [vmem:[#allocation7 + $0x658] sm:$0xff] }
 0x17d   :  { %2439 = vmatprep.subr.bf16.mxu0 %v2438_v63  ;;  %v2584_v63 = vpack.c.bf16 %v360_v55, %v356_v54  ;;  %v2456_v0 = vpack.c.bf16 %v614_v57, %v610_v53  ;;  %v2600_v53 = vpack.c.bf16 %v392_v43, %v388_v42  ;;  %v2472_v54 = vpack.c.bf16 %v646_v45, %v642_v39  ;;  %v396_v57 = vld [vmem:[#allocation7 + $0x550] sm:$0xff] }
 0x17e   :  { %2569 = vmatpush1.bf16.msra.mxu1 %v2568_v5  ;;  %v2458_v5 = vpack.c.bf16 %v623_v62, %v619_v40  ;;  %v654_v40 = vld [vmem:[#allocation7 + $0xd60] sm:$0xff]  ;;  %v405_v62 = vld [vmem:[#allocation7 + $0x598] sm:$0xff]  ;;  %v428_v45 = vld [vmem:[#allocation7 + $0x650] sm:$0xff] }
 0x17f   :  { %2571 = vmatprep.subr.bf16.mxu1 %v2570_v33  ;;  %v373_v33 = vld [vmem:[#allocation7 + $0x498] sm:$0xff] }
 0x180   :  { %2441 = vmatpush1.bf16.msra.mxu0 %v2440_v6  ;;  %v622_v6 = vld [vmem:[#allocation7 + $0xc60] sm:$0xff]  ;;  %v2590_v13 = vpack.c.bf16 %v377_v7, %v373_v33  ;;  %v408_v33 = vld [vmem:[#allocation7 + $0x5b0] sm:$0xff] }
 0x181   :  { %2443 = vmatprep.subr.bf16.mxu0 %v2442_v10  ;;  %v2588_v10 = vpack.c.bf16 %v368_v4, %v364_v3  ;;  %v2460_v12 = vpack.c.bf16 %v622_v6, %v618_v2  ;;  %v2604_v2 = vpack.c.bf16 %v400_v58, %v396_v57  ;;  %v404_v6 = vld [vmem:[#allocation7 + $0x590] sm:$0xff] }
 0x182   :  { %2573 = vmatpush1.bf16.msra.mxu1 %v2572_v17  ;;  %v2462_v17 = vpack.c.bf16 %v631_v9, %v627_v8  ;;  %v662_v8 = vld [vmem:[#allocation7 + $0xda0] sm:$0xff]  ;;  %v413_v9 = vld [vmem:[#allocation7 + $0x5d8] sm:$0xff] }
 0x183   :  { %2575 = vmatprep.subr.bf16.mxu1 %v2574_v19  ;;  %v381_v19 = vld [vmem:[#allocation7 + $0x4d8] sm:$0xff] }
 0x184   :  { %2445 = vmatpush1.bf16.msra.mxu0 %v2444_v18  ;;  %v630_v18 = vld [vmem:[#allocation7 + $0xca0] sm:$0xff]  ;;  %v2594_v24 = vpack.c.bf16 %v385_v20, %v381_v19  ;;  %v416_v19 = vld [vmem:[#allocation7 + $0x5f0] sm:$0xff] }
 0x185   :  { %2447 = vmatprep.subr.bf16.mxu0 %v2446_v23  ;;  %v2464_v23 = vpack.c.bf16 %v630_v18, %v626_v14  ;;  %v2608_v14 = vpack.c.bf16 %v408_v33, %v404_v6  ;;  %v412_v18 = vld [vmem:[#allocation7 + $0x5d0] sm:$0xff] }
 0x186   :  { %2577 = vmatpush1.bf16.msra.mxu1 %v2576_v30  ;;  %v638_v30 = vld [vmem:[#allocation7 + $0xce0] sm:$0xff] }
 0x187   :  { %2579 = vmatprep.subr.bf16.mxu1 %v2578_v32  ;;  %v393_v32 = vld [vmem:[#allocation7 + $0x538] sm:$0xff] }
 0x188   :  { %2449 = vmatpush1.bf16.msra.mxu0 %v2448_v31  ;;  %v389_v31 = vld [vmem:[#allocation7 + $0x518] sm:$0xff] }
 0x189   :  { %2451 = vmatprep.subr.bf16.mxu0 %v2450_v38  ;;  %v2598_v38 = vpack.c.bf16 %v393_v32, %v389_v31  ;;  %v424_v31 = vld [vmem:[#allocation7 + $0x630] sm:$0xff] }
 0x18a   :  { %2581 = vmatpush1.bf16.msra.mxu1 %v2580_v49  ;;  %v401_v49 = vld [vmem:[#allocation7 + $0x578] sm:$0xff] }
 0x18b   :  { %2583 = vmatprep.subr.bf16.mxu1 %v2582_v52  ;;  %v655_v52 = vld [vmem:[#allocation7 + $0xd68] sm:$0xff]  ;;  %v2602_v55 = vpack.c.bf16 %v401_v49, %v397_v48  ;;  %v432_v48 = vld [vmem:[#allocation7 + $0x670] sm:$0xff] }
 0x18c   :  { %2453 = vmatpush1.bf16.msra.mxu0 %v2452_v50  ;;  %v651_v50 = vld [vmem:[#allocation7 + $0xd48] sm:$0xff] }
 0x18d   :  { %2455 = vmatprep.subr.bf16.mxu0 %v2454_v56  ;;  %1153 = vmatmul.mubr.f32.vlgmr.msra.gmra.mrb[2].mxu1 %v3646_v25  ;;  %v635_v25 = vld [vmem:[#allocation7 + $0xcc8] sm:$0xff]  ;;  %v650_v56 = vld [vmem:[#allocation7 + $0xd40] sm:$0xff]  ;;  %v2474_v59 = vpack.c.bf16 %v655_v52, %v651_v50  ;;  %v437_v52 = vld [vmem:[#allocation7 + $0x698] sm:$0xff] }
 0x18e   :  { %2585 = vmatpush1.bf16.msra.mxu1 %v2584_v63  ;;  %1223 = vmatprep.mubr.f32.mxu1 %v3658_v41  ;;  %v2466_v29 = vpack.c.bf16 %v639_v21, %v635_v25  ;;  %v2468_v41 = vpack.c.bf16 %v638_v30, %v634_v26  ;;  %v409_v63 = vld [vmem:[#allocation7 + $0x5b8] sm:$0xff]  ;;  %v2476_v3 = vpack.c.bf16 %v654_v40, %v650_v56  ;;  %v670_v25 = vld [vmem:[#allocation7 + $0xde0] sm:$0xff]  ;;  %v420_v30 = vld [vmem:[#allocation7 + $0x610] sm:$0xff] }
 0x18f   :  { %1011 = vmatmul.mubr.f32.vlgmr.msra.gmra.mrb[0].mxu0 %v3668_v47  ;;  %2587 = vmatprep.subr.bf16.mxu1 %v2586_v1  ;;  %v663_v1 = vld [vmem:[#allocation7 + $0xda8] sm:$0xff]  ;;  %v2606_v4 = vpack.c.bf16 %v409_v63, %v405_v62  ;;  %v421_v21 = vld [vmem:[#allocation7 + $0x618] sm:$0xff]  ;;  %v2612_v26 = vpack.c.bf16 %v416_v19, %v412_v18  ;;  %v2616_v39 = vpack.c.bf16 %v424_v31, %v420_v30  ;;  %v686_v50 = vld [vmem:[#allocation7 + $0xe60] sm:$0xff] }
 0x190   :  { %2457 = vmatpush1.bf16.msra.mxu0 %v2456_v0  ;;  %1081 = vmatprep.mubr.f32.mxu0 %v3682_v11  ;;  %v659_v0 = vld [vmem:[#allocation7 + $0xd88] sm:$0xff]  ;;  %v2620_v56 = vpack.c.bf16 %v432_v48, %v428_v45  ;;  %v436_v40 = vld [vmem:[#allocation7 + $0x690] sm:$0xff] }
 0x191   :  { %2459 = vmatprep.subr.bf16.mxu0 %v2458_v5  ;;  %v658_v5 = vld [vmem:[#allocation7 + $0xd80] sm:$0xff]  ;;  %v2478_v7 = vpack.c.bf16 %v663_v1, %v659_v0  ;;  %v440_v62 = vld [vmem:[#allocation7 + $0x6b0] sm:$0xff]  ;;  %v445_v1 = vld [vmem:[#allocation7 + $0x6d8] sm:$0xff] }
 0x192   :  { %2589 = vmatpush1.bf16.msra.mxu1 %v2588_v10  ;;  %v417_v10 = vld [vmem:[#allocation7 + $0x5f8] sm:$0xff]  ;;  %v2480_v15 = vpack.c.bf16 %v662_v8, %v658_v5  ;;  %v694_v0 = vld [vmem:[#allocation7 + $0xea0] sm:$0xff]  ;;  %v2624_v5 = vpack.c.bf16 %v440_v62, %v436_v40  ;;  %v444_v8 = vld [vmem:[#allocation7 + $0x6d0] sm:$0xff] }
 0x193   :  { %2591 = vmatprep.subr.bf16.mxu1 %v2590_v13  ;;  %v671_v13 = vld [vmem:[#allocation7 + $0xde8] sm:$0xff]  ;;  %v2610_v16 = vpack.c.bf16 %v417_v10, %v413_v9  ;;  %v448_v9 = vld [vmem:[#allocation7 + $0x6f0] sm:$0xff] }
 0x194   :  { %2461 = vmatpush1.bf16.msra.mxu0 %v2460_v12  ;;  %v667_v12 = vld [vmem:[#allocation7 + $0xdc8] sm:$0xff] }
 0x195   :  { %2463 = vmatprep.subr.bf16.mxu0 %v2462_v17  ;;  %v666_v17 = vld [vmem:[#allocation7 + $0xdc0] sm:$0xff]  ;;  %v2482_v20 = vpack.c.bf16 %v671_v13, %v667_v12  ;;  %v453_v13 = vld [vmem:[#allocation7 + $0x718] sm:$0xff] }
 0x196   :  { %2593 = vmatpush1.bf16.msra.mxu1 %v2592_v22  ;;  %v425_v22 = vld [vmem:[#allocation7 + $0x638] sm:$0xff]  ;;  %v2484_v27 = vpack.c.bf16 %v670_v25, %v666_v17  ;;  %v702_v12 = vld [vmem:[#allocation7 + $0xee0] sm:$0xff]  ;;  %v2628_v17 = vpack.c.bf16 %v448_v9, %v444_v8  ;;  %v452_v25 = vld [vmem:[#allocation7 + $0x710] sm:$0xff] }
 0x197   :  { %2595 = vmatprep.subr.bf16.mxu1 %v2594_v24  ;;  %v679_v24 = vld [vmem:[#allocation7 + $0xe28] sm:$0xff]  ;;  %v2614_v28 = vpack.c.bf16 %v425_v22, %v421_v21  ;;  %v456_v21 = vld [vmem:[#allocation7 + $0x730] sm:$0xff] }
 0x198   :  { %2465 = vmatpush1.bf16.msra.mxu0 %v2464_v23  ;;  %v675_v23 = vld [vmem:[#allocation7 + $0xe08] sm:$0xff]  ;;  %v484_v8 = vld [vmem:[#allocation7 + $0x810] sm:$0xff] }
 0x199   :  { %2467 = vmatprep.subr.bf16.mxu0 %v2466_v29  ;;  %v674_v29 = vld [vmem:[#allocation7 + $0xe00] sm:$0xff]  ;;  %v2486_v32 = vpack.c.bf16 %v679_v24, %v675_v23  ;;  %v461_v24 = vld [vmem:[#allocation7 + $0x758] sm:$0xff]  ;;  %v488_v9 = vld [vmem:[#allocation7 + $0x830] sm:$0xff] }
 0x19a   :  { %2597 = vmatpush1.bf16.msra.mxu1 %v2596_v37  ;;  %v433_v37 = vld [vmem:[#allocation7 + $0x678] sm:$0xff]  ;;  %v2488_v42 = vpack.c.bf16 %v678_v35, %v674_v29  ;;  %v710_v23 = vld [vmem:[#allocation7 + $0xf20] sm:$0xff]  ;;  %v2632_v29 = vpack.c.bf16 %v456_v21, %v452_v25  ;;  %v460_v35 = vld [vmem:[#allocation7 + $0x750] sm:$0xff] }
 0x19b   :  { %2599 = vmatprep.subr.bf16.mxu1 %v2598_v38  ;;  %v687_v38 = vld [vmem:[#allocation7 + $0xe68] sm:$0xff]  ;;  %v2618_v43 = vpack.c.bf16 %v433_v37, %v429_v36  ;;  %v464_v36 = vld [vmem:[#allocation7 + $0x770] sm:$0xff]  ;;  %v1379_v21 = vld [vmem:[#allocation10 + $0x18] sm:$0xff] }
 0x19c   :  { %2469 = vmatpush1.bf16.msra.mxu0 %v2468_v41  ;;  %v683_v41 = vld [vmem:[#allocation7 + $0xe48] sm:$0xff] }
 0x19d   :  { %2471 = vmatprep.subr.bf16.mxu0 %v2470_v44  ;;  %v682_v44 = vld [vmem:[#allocation7 + $0xe40] sm:$0xff]  ;;  %v2490_v49 = vpack.c.bf16 %v687_v38, %v683_v41  ;;  %v469_v38 = vld [vmem:[#allocation7 + $0x798] sm:$0xff]  ;;  %v1377_v25 = vld [vmem:[#allocation10 + $0x8] sm:$0xff] }
 0x19e   :  { %2601 = vmatpush1.bf16.msra.mxu1 %v2600_v53  ;;  %v441_v53 = vld [vmem:[#allocation7 + $0x6b8] sm:$0xff]  ;;  %v2492_v57 = vpack.c.bf16 %v686_v50, %v682_v44  ;;  %v718_v41 = vld [vmem:[#allocation7 + $0xf60] sm:$0xff]  ;;  %v2636_v44 = vpack.c.bf16 %v464_v36, %v460_v35  ;;  %v468_v50 = vld [vmem:[#allocation7 + $0x790] sm:$0xff] }
 0x19f   :  { %2603 = vmatprep.subr.bf16.mxu1 %v2602_v55  ;;  %v695_v55 = vld [vmem:[#allocation7 + $0xea8] sm:$0xff]  ;;  %v2622_v58 = vpack.c.bf16 %v441_v53, %v437_v52  ;;  %v472_v52 = vld [vmem:[#allocation7 + $0x7b0] sm:$0xff]  ;;  %v509_v36 = vld [vmem:[#allocation7 + $0x8d8] sm:$0xff] }
 0x1a0   :  { %2473 = vmatpush1.bf16.msra.mxu0 %v2472_v54  ;;  %v691_v54 = vld [vmem:[#allocation7 + $0xe88] sm:$0xff] }
 0x1a1   :  { %2475 = vmatprep.subr.bf16.mxu0 %v2474_v59  ;;  %v690_v59 = vld [vmem:[#allocation7 + $0xe80] sm:$0xff]  ;;  %v2494_v63 = vpack.c.bf16 %v695_v55, %v691_v54  ;;  %v477_v55 = vld [vmem:[#allocation7 + $0x7d8] sm:$0xff]  ;;  %v1385_v35 = vld [vmem:[#allocation10 + $0x48] sm:$0xff] }
 0x1a2   :  { %2605 = vmatpush1.bf16.msra.mxu1 %v2604_v2  ;;  %v449_v2 = vld [vmem:[#allocation7 + $0x6f8] sm:$0xff]  ;;  %v2496_v6 = vpack.c.bf16 %v694_v0, %v690_v59  ;;  %v726_v54 = vld [vmem:[#allocation7 + $0xfa0] sm:$0xff]  ;;  %v2640_v59 = vpack.c.bf16 %v472_v52, %v468_v50  ;;  %v476_v0 = vld [vmem:[#allocation7 + $0x7d0] sm:$0xff] }
 0x1a3   :  { %2607 = vmatprep.subr.bf16.mxu1 %v2606_v4  ;;  %v703_v4 = vld [vmem:[#allocation7 + $0xee8] sm:$0xff]  ;;  %v2626_v33 = vpack.c.bf16 %v449_v2, %v445_v1  ;;  %v480_v1 = vld [vmem:[#allocation7 + $0x7f0] sm:$0xff]  ;;  %v1391_v50 = vld [vmem:[#allocation10 + $0x78] sm:$0xff] }
 0x1a4   :  { %2477 = vmatpush1.bf16.msra.mxu0 %v2476_v3  ;;  %v699_v3 = vld [vmem:[#allocation7 + $0xec8] sm:$0xff]  ;;  %v517_v52 = vld [vmem:[#allocation7 + $0x918] sm:$0xff] }
 0x1a5   :  { %2479 = vmatprep.subr.bf16.mxu0 %v2478_v7  ;;  %v698_v7 = vld [vmem:[#allocation7 + $0xec0] sm:$0xff]  ;;  %v2498_v10 = vpack.c.bf16 %v703_v4, %v699_v3  ;;  %v485_v4 = vld [vmem:[#allocation7 + $0x818] sm:$0xff] }
 0x1a6   :  { %2609 = vmatpush1.bf16.msra.mxu1 %v2608_v14  ;;  %v457_v14 = vld [vmem:[#allocation7 + $0x738] sm:$0xff]  ;;  %v2500_v18 = vpack.c.bf16 %v702_v12, %v698_v7  ;;  %v734_v3 = vld [vmem:[#allocation7 + $0xfe0] sm:$0xff] }
 0x1a7   :  { %2611 = vmatprep.subr.bf16.mxu1 %v2610_v16  ;;  %v711_v16 = vld [vmem:[#allocation7 + $0xf28] sm:$0xff]  ;;  %v2630_v19 = vpack.c.bf16 %v457_v14, %v453_v13  ;;  %v497_v12 = vld [vmem:[#allocation7 + $0x878] sm:$0xff]  ;;  %v2648_v13 = vpack.c.bf16 %v488_v9, %v484_v8  ;;  %v528_v9 = vld [vmem:[#allocation7 + $0x970] sm:$0xff] }
 0x1a8   :  { %2481 = vmatpush1.bf16.msra.mxu0 %v2480_v15  ;;  %v707_v15 = vld [vmem:[#allocation7 + $0xf08] sm:$0xff] }
 0x1a9   :  { %2483 = vmatprep.subr.bf16.mxu0 %v2482_v20  ;;  %v706_v20 = vld [vmem:[#allocation7 + $0xf00] sm:$0xff]  ;;  %v2502_v22 = vpack.c.bf16 %v711_v16, %v707_v15  ;;  %v492_v15 = vld [vmem:[#allocation7 + $0x850] sm:$0xff] }
 0x1aa   :  { %2613 = vmatpush1.bf16.msra.mxu1 %v2612_v26  ;;  %v465_v26 = vld [vmem:[#allocation7 + $0x778] sm:$0xff]  ;;  %v2504_v30 = vpack.c.bf16 %v710_v23, %v706_v20  ;;  %v496_v16 = vld [vmem:[#allocation7 + $0x870] sm:$0xff] }
 0x1ab   :  { %2615 = vmatprep.subr.bf16.mxu1 %v2614_v28  ;;  %v719_v28 = vld [vmem:[#allocation7 + $0xf68] sm:$0xff]  ;;  %v2634_v31 = vpack.c.bf16 %v465_v26, %v461_v24  ;;  %v504_v20 = vld [vmem:[#allocation7 + $0x8b0] sm:$0xff]  ;;  %v2652_v23 = vpack.c.bf16 %v496_v16, %v492_v15  ;;  %v2774_v24 = vpack.c.bf16 %v1379_v21, %v1377_v25 }
 0x1ac   :  { %2485 = vmatpush1.bf16.msra.mxu0 %v2484_v27  ;;  %v715_v27 = vld [vmem:[#allocation7 + $0xf48] sm:$0xff]  ;;  %v1378_v26 = vld [vmem:[#allocation10 + $0x10] sm:$0xff] }
 0x1ad   :  { %2487 = vmatprep.subr.bf16.mxu0 %v2486_v32  ;;  %v714_v32 = vld [vmem:[#allocation7 + $0xf40] sm:$0xff]  ;;  %v2506_v37 = vpack.c.bf16 %v719_v28, %v715_v27  ;;  %v1381_v27 = vld [vmem:[#allocation10 + $0x28] sm:$0xff] }
 0x1ae   :  { %2617 = vmatpush1.bf16.msra.mxu1 %v2616_v39  ;;  %v473_v39 = vld [vmem:[#allocation7 + $0x7b8] sm:$0xff]  ;;  %v2508_v45 = vpack.c.bf16 %v718_v41, %v714_v32  ;;  %v536_v21 = vld [vmem:[#allocation7 + $0x9b0] sm:$0xff] }
 0x1af   :  { %2619 = vmatprep.subr.bf16.mxu1 %v2618_v43  ;;  %v727_v43 = vld [vmem:[#allocation7 + $0xfa8] sm:$0xff]  ;;  %v2638_v48 = vpack.c.bf16 %v473_v39, %v469_v38  ;;  %v1383_v28 = vld [vmem:[#allocation10 + $0x38] sm:$0xff]  ;;  %v1382_v32 = vld [vmem:[#allocation10 + $0x30] sm:$0xff] }
 0x1b0   :  { %2489 = vmatpush1.bf16.msra.mxu0 %v2488_v42  ;;  %v723_v42 = vld [vmem:[#allocation7 + $0xf88] sm:$0xff]  ;;  %v1387_v41 = vld [vmem:[#allocation10 + $0x58] sm:$0xff] }
 0x1b1   :  { %2491 = vmatprep.subr.bf16.mxu0 %v2490_v49  ;;  %v722_v49 = vld [vmem:[#allocation7 + $0xf80] sm:$0xff]  ;;  %v2510_v53 = vpack.c.bf16 %v727_v43, %v723_v42  ;;  %v508_v42 = vld [vmem:[#allocation7 + $0x8d0] sm:$0xff]  ;;  %v2782_v43 = vpack.c.bf16 %v1387_v41, %v1385_v35  ;;  %v549_v41 = vld [vmem:[#allocation7 + $0xa18] sm:$0xff] }
 0x1b2   :  { %2621 = vmatpush1.bf16.msra.mxu1 %v2620_v56  ;;  %v481_v56 = vld [vmem:[#allocation7 + $0x7f8] sm:$0xff]  ;;  %v2512_v40 = vpack.c.bf16 %v726_v54, %v722_v49  ;;  %v1389_v49 = vld [vmem:[#allocation10 + $0x68] sm:$0xff] }
 0x1b3   :  { %2623 = vmatprep.subr.bf16.mxu1 %v2622_v58  ;;  %v735_v58 = vld [vmem:[#allocation7 + $0xfe8] sm:$0xff]  ;;  %v2642_v62 = vpack.c.bf16 %v481_v56, %v477_v55  ;;  %v516_v56 = vld [vmem:[#allocation7 + $0x910] sm:$0xff] }
 0x1b4   :  { %2493 = vmatpush1.bf16.msra.mxu0 %v2492_v57  ;;  %v731_v57 = vld [vmem:[#allocation7 + $0xfc8] sm:$0xff]  ;;  %v544_v35 = vld [vmem:[#allocation7 + $0x9f0] sm:$0xff] }
 0x1b5   :  { %2495 = vmatprep.subr.bf16.mxu0 %v2494_v63  ;;  %v730_v63 = vld [vmem:[#allocation7 + $0xfc0] sm:$0xff]  ;;  %v2514_v2 = vpack.c.bf16 %v735_v58, %v731_v57  ;;  %v2786_v57 = vpack.c.bf16 %v1391_v50, %v1389_v49  ;;  %v552_v49 = vld [vmem:[#allocation7 + $0xa30] sm:$0xff] }
 0x1b6   :  { %2625 = vmatpush1.bf16.msra.mxu1 %v2624_v5  ;;  %v489_v5 = vld [vmem:[#allocation7 + $0x838] sm:$0xff]  ;;  %v1388_v58 = vld [vmem:[#allocation10 + $0x60] sm:$0xff]  ;;  %v1409_v50 = vld [vmem:[#allocation10 + $0x108] sm:$0xff] }
 0x1b7   :  { %2627 = vmatprep.subr.bf16.mxu1 %v2626_v33  ;;  %v2516_v33 = vpack.c.bf16 %v734_v3, %v730_v63  ;;  %v2646_v7 = vpack.c.bf16 %v489_v5, %v485_v4  ;;  %v1393_v63 = vld [vmem:[#allocation10 + $0x88] sm:$0xff] }
 0x1b8   :  { %2497 = vmatpush1.bf16.msra.mxu0 %v2496_v6  ;;  %v2644_v6 = vpack.c.bf16 %v480_v1, %v476_v0  ;;  %v1395_v0 = vld [vmem:[#allocation10 + $0x98] sm:$0xff]  ;;  %v524_v5 = vld [vmem:[#allocation7 + $0x950] sm:$0xff] }
 0x1b9   :  { %2499 = vmatprep.subr.bf16.mxu0 %v2498_v10  ;;  %v493_v10 = vld [vmem:[#allocation7 + $0x858] sm:$0xff]  ;;  %v2668_v16 = vpack.c.bf16 %v528_v9, %v524_v5 }
 0x1ba   :  { %2629 = vmatpush1.bf16.msra.mxu1 %v2628_v17  ;;  %v2650_v14 = vpack.c.bf16 %v497_v12, %v493_v10  ;;  %v501_v17 = vld [vmem:[#allocation7 + $0x898] sm:$0xff]  ;;  %v1397_v10 = vld [vmem:[#allocation10 + $0xa8] sm:$0xff] }
 0x1bb   :  { %2631 = vmatprep.subr.bf16.mxu1 %v2630_v19  ;;  %v500_v19 = vld [vmem:[#allocation7 + $0x890] sm:$0xff]  ;;  %v525_v1 = vld [vmem:[#allocation7 + $0x958] sm:$0xff] }
 0x1bc   :  { %2501 = vmatpush1.bf16.msra.mxu0 %v2500_v18  ;;  %v505_v18 = vld [vmem:[#allocation7 + $0x8b8] sm:$0xff]  ;;  %v2656_v39 = vpack.c.bf16 %v504_v20, %v500_v19  ;;  %v1396_v19 = vld [vmem:[#allocation10 + $0xa0] sm:$0xff] }
 0x1bd   :  { %2503 = vmatprep.subr.bf16.mxu0 %v2502_v22  ;;  %v1376_v22 = vld [vmem:[#allocation10] sm:$0xff]  ;;  %v1399_v12 = vld [vmem:[#allocation10 + $0xb8] sm:$0xff]  ;;  %v1398_v20 = vld [vmem:[#allocation10 + $0xb0] sm:$0xff] }
 0x1be   :  { %2633 = vmatpush1.bf16.msra.mxu1 %v2632_v29  ;;  %v2654_v29 = vpack.c.bf16 %v505_v18, %v501_v17  ;;  %v532_v17 = vld [vmem:[#allocation7 + $0x990] sm:$0xff]  ;;  %v2794_v18 = vpack.c.bf16 %v1399_v12, %v1397_v10 }
 0x1bf   :  { %2635 = vmatprep.subr.bf16.mxu1 %v2634_v31  ;;  %v2778_v31 = vpack.c.bf16 %v1383_v28, %v1381_v27  ;;  %v2796_v27 = vpack.c.bf16 %v1398_v20, %v1396_v19  ;;  %v2672_v28 = vpack.c.bf16 %v536_v21, %v532_v17  ;;  %v568_v10 = vld [vmem:[#allocation7 + $0xab0] sm:$0xff]  ;;  %v1416_v20 = vld [vmem:[#allocation10 + $0x140] sm:$0xff] }
 0x1c0   :  { %2505 = vmatpush1.bf16.msra.mxu0 %v2504_v30  ;;  %v2776_v30 = vpack.c.bf16 %v1378_v26, %v1376_v22  ;;  %v1401_v22 = vld [vmem:[#allocation10 + $0xc8] sm:$0xff]  ;;  %v545_v26 = vld [vmem:[#allocation7 + $0x9f8] sm:$0xff] }
 0x1c1   :  { %2507 = vmatprep.subr.bf16.mxu0 %v2506_v37  ;;  %v513_v37 = vld [vmem:[#allocation7 + $0x8f8] sm:$0xff]  ;;  %v1417_v12 = vld [vmem:[#allocation10 + $0x148] sm:$0xff] }
 0x1c2   :  { %2637 = vmatpush1.bf16.msra.mxu1 %v2636_v44  ;;  %v1384_v44 = vld [vmem:[#allocation10 + $0x40] sm:$0xff] }
 0x1c3   :  { %2639 = vmatprep.subr.bf16.mxu1 %v2638_v48  ;;  %v512_v48 = vld [vmem:[#allocation7 + $0x8f0] sm:$0xff] }
 0x1c4   :  { %2509 = vmatpush1.bf16.msra.mxu0 %v2508_v45  ;;  %v1386_v45 = vld [vmem:[#allocation10 + $0x50] sm:$0xff]  ;;  %v2660_v55 = vpack.c.bf16 %v512_v48, %v508_v42 }
 0x1c5   :  { %2511 = vmatprep.subr.bf16.mxu0 %v2510_v53  ;;  %v521_v53 = vld [vmem:[#allocation7 + $0x938] sm:$0xff]  ;;  %v2784_v54 = vpack.c.bf16 %v1386_v45, %v1384_v44  ;;  %v1404_v45 = vld [vmem:[#allocation10 + $0xe0] sm:$0xff] }
 0x1c6   :  { %2641 = vmatpush1.bf16.msra.mxu1 %v2640_v59  ;;  %v1390_v59 = vld [vmem:[#allocation10 + $0x70] sm:$0xff] }
 0x1c7   :  { %2643 = vmatprep.subr.bf16.mxu1 %v2642_v62  ;;  %v520_v62 = vld [vmem:[#allocation7 + $0x930] sm:$0xff]  ;;  %v2788_v3 = vpack.c.bf16 %v1390_v59, %v1388_v58  ;;  %v1408_v59 = vld [vmem:[#allocation10 + $0x100] sm:$0xff] }
 0x1c8   :  { %2513 = vmatpush1.bf16.msra.mxu0 %v2512_v40  ;;  %v2662_v40 = vpack.c.bf16 %v521_v53, %v517_v52  ;;  %v2664_v4 = vpack.c.bf16 %v520_v62, %v516_v56  ;;  %v1411_v52 = vld [vmem:[#allocation10 + $0x118] sm:$0xff] }
 0x1c9   :  { %2515 = vmatprep.subr.bf16.mxu0 %v2514_v2  ;;  %v529_v2 = vld [vmem:[#allocation7 + $0x978] sm:$0xff]  ;;  %v2806_v58 = vpack.c.bf16 %v1411_v52, %v1409_v50  ;;  %v592_v50 = vld [vmem:[#allocation7 + $0xb70] sm:$0xff] }
 0x1ca   :  { %2645 = vmatpush1.bf16.msra.mxu1 %v2644_v6  ;;  %v2790_v6 = vpack.c.bf16 %v1395_v0, %v1393_v63  ;;  %v2666_v8 = vpack.c.bf16 %v529_v2, %v525_v1  ;;  %v557_v53 = vld [vmem:[#allocation7 + $0xa58] sm:$0xff]  ;;  %v560_v63 = vld [vmem:[#allocation7 + $0xa70] sm:$0xff] }
 0x1cb   :  { %2647 = vmatprep.subr.bf16.mxu1 %v2646_v7  ;;  %v1394_v7 = vld [vmem:[#allocation10 + $0x90] sm:$0xff]  ;;  %v1413_v0 = vld [vmem:[#allocation10 + $0x128] sm:$0xff]  ;;  %v1415_v1 = vld [vmem:[#allocation10 + $0x138] sm:$0xff] }
 0x1cc   :  { %2517 = vmatpush1.bf16.msra.mxu0 %v2516_v33  ;;  %v1392_v33 = vld [vmem:[#allocation10 + $0x80] sm:$0xff]  ;;  %v565_v2 = vld [vmem:[#allocation7 + $0xa98] sm:$0xff]  ;;  %v1429_v52 = vld [vmem:[#allocation10 + $0x1a8] sm:$0xff] }
 0x1cd   :  { %1224 = vmatmul.mubr.f32.vlgmr.msra.gmra.mrb[2].mxu1 %v3653_v34  ;;  %v1380_v34 = vld [vmem:[#allocation10 + $0x20] sm:$0xff]  ;;  %2775 = vmatprep.subr.bf16.mxu0 %v2774_v24  ;;  %v2792_v15 = vpack.c.bf16 %v1394_v7, %v1392_v33  ;;  %v541_v24 = vld [vmem:[#allocation7 + $0x9d8] sm:$0xff]  ;;  %v2810_v33 = vpack.c.bf16 %v1415_v1, %v1413_v0  ;;  %v600_v0 = vld [vmem:[#allocation7 + $0xbb0] sm:$0xff] }
 0x1ce   :  { %2649 = vmatpush1.bf16.msra.mxu1 %v2648_v13  ;;  %1294 = vmatprep.mubr.f32.mxu1 %v3672_v51  ;;  %v2780_v38 = vpack.c.bf16 %v1382_v32, %v1380_v34  ;;  %v2658_v51 = vpack.c.bf16 %v513_v37, %v509_v36  ;;  %v533_v13 = vld [vmem:[#allocation7 + $0x998] sm:$0xff]  ;;  %v2674_v32 = vpack.c.bf16 %v545_v26, %v541_v24  ;;  %v1405_v36 = vld [vmem:[#allocation10 + $0xe8] sm:$0xff]  ;;  %v1412_v7 = vld [vmem:[#allocation10 + $0x120] sm:$0xff] }
 0x1cf   :  { %1082 = vmatmul.mubr.f32.vlgmr.msra.gmra.mrb[0].mxu0 %v3678_v60  ;;  %2651 = vmatprep.subr.bf16.mxu1 %v2650_v14  ;;  %v537_v14 = vld [vmem:[#allocation7 + $0x9b8] sm:$0xff]  ;;  %v1433_v1 = vld [vmem:[#allocation10 + $0x1c8] sm:$0xff] }
 0x1d0   :  { %2777 = vmatpush1.bf16.msra.mxu0 %v2776_v30  ;;  %v2670_v25 = vpack.c.bf16 %v537_v14, %v533_v13  ;;  %v1402_v34 = vld [vmem:[#allocation10 + $0xd0] sm:$0xff]  ;;  %v1407_v37 = vld [vmem:[#allocation10 + $0xf8] sm:$0xff] }
 0x1d1   :  { %2779 = vmatprep.subr.bf16.mxu0 %v2778_v31  ;;  %v1400_v31 = vld [vmem:[#allocation10 + $0xc0] sm:$0xff]  ;;  %v2802_v44 = vpack.c.bf16 %v1407_v37, %v1405_v36  ;;  %v1419_v13 = vld [vmem:[#allocation10 + $0x158] sm:$0xff]  ;;  %v584_v36 = vld [vmem:[#allocation7 + $0xb30] sm:$0xff] }
 0x1d2   :  { %2653 = vmatpush1.bf16.msra.mxu1 %v2652_v23  ;;  %v1403_v23 = vld [vmem:[#allocation10 + $0xd8] sm:$0xff]  ;;  %v2814_v19 = vpack.c.bf16 %v1419_v13, %v1417_v12  ;;  %v1425_v37 = vld [vmem:[#allocation10 + $0x188] sm:$0xff] }
 0x1d3   :  { %2655 = vmatprep.subr.bf16.mxu1 %v2654_v29  ;;  %v540_v29 = vld [vmem:[#allocation7 + $0x9d0] sm:$0xff]  ;;  %v2798_v30 = vpack.c.bf16 %v1403_v23, %v1401_v22  ;;  %v573_v14 = vld [vmem:[#allocation7 + $0xad8] sm:$0xff] }
 0x1d4   :  { %2781 = vmatpush1.bf16.msra.mxu0 %v2780_v38  ;;  %v553_v38 = vld [vmem:[#allocation7 + $0xa38] sm:$0xff]  ;;  %v2676_v42 = vpack.c.bf16 %v544_v35, %v540_v29  ;;  %v576_v22 = vld [vmem:[#allocation7 + $0xaf0] sm:$0xff] }
 0x1d5   :  { %2783 = vmatprep.subr.bf16.mxu0 %v2782_v43  ;;  %v548_v43 = vld [vmem:[#allocation7 + $0xa10] sm:$0xff]  ;;  %v2678_v48 = vpack.c.bf16 %v553_v38, %v549_v41  ;;  %v1423_v24 = vld [vmem:[#allocation10 + $0x178] sm:$0xff] }
 0x1d6   :  { %2657 = vmatpush1.bf16.msra.mxu1 %v2656_v39  ;;  %v2800_v39 = vpack.c.bf16 %v1402_v34, %v1400_v31  ;;  %v2680_v56 = vpack.c.bf16 %v552_v49, %v548_v43  ;;  %v1421_v23 = vld [vmem:[#allocation10 + $0x168] sm:$0xff]  ;;  %v581_v26 = vld [vmem:[#allocation7 + $0xb18] sm:$0xff]  ;;  %v1420_v34 = vld [vmem:[#allocation10 + $0x160] sm:$0xff] }
 0x1d7   :  { %2659 = vmatprep.subr.bf16.mxu1 %v2658_v51  ;;  %v1406_v51 = vld [vmem:[#allocation10 + $0xf0] sm:$0xff]  ;;  %v2818_v31 = vpack.c.bf16 %v1423_v24, %v1421_v23  ;;  %v1427_v41 = vld [vmem:[#allocation10 + $0x198] sm:$0xff] }
 0x1d8   :  { %2785 = vmatpush1.bf16.msra.mxu0 %v2784_v54  ;;  %v561_v54 = vld [vmem:[#allocation7 + $0xa78] sm:$0xff] }
 0x1d9   :  { %2787 = vmatprep.subr.bf16.mxu0 %v2786_v57  ;;  %v556_v57 = vld [vmem:[#allocation7 + $0xa50] sm:$0xff]  ;;  %v2682_v62 = vpack.c.bf16 %v561_v54, %v557_v53  ;;  %v589_v38 = vld [vmem:[#allocation7 + $0xb58] sm:$0xff] }
 0x1da   :  { %2661 = vmatpush1.bf16.msra.mxu1 %v2660_v55  ;;  %v2804_v55 = vpack.c.bf16 %v1406_v51, %v1404_v45  ;;  %v2684_v5 = vpack.c.bf16 %v560_v63, %v556_v57  ;;  %v2822_v45 = vpack.c.bf16 %v1427_v41, %v1425_v37  ;;  %v1424_v51 = vld [vmem:[#allocation10 + $0x180] sm:$0xff]  ;;  %v1431_v53 = vld [vmem:[#allocation10 + $0x1b8] sm:$0xff] }
 0x1db   :  { %2663 = vmatprep.subr.bf16.mxu1 %v2662_v40  ;;  %v1410_v40 = vld [vmem:[#allocation10 + $0x110] sm:$0xff] }
 0x1dc   :  { %2789 = vmatpush1.bf16.msra.mxu0 %v2788_v3  ;;  %v569_v3 = vld [vmem:[#allocation7 + $0xab8] sm:$0xff] }
 0x1dd   :  { %2791 = vmatprep.subr.bf16.mxu0 %v2790_v6  ;;  %v564_v6 = vld [vmem:[#allocation7 + $0xa90] sm:$0xff]  ;;  %v2686_v9 = vpack.c.bf16 %v569_v3, %v565_v2  ;;  %v597_v54 = vld [vmem:[#allocation7 + $0xb98] sm:$0xff] }
 0x1de   :  { %2665 = vmatpush1.bf16.msra.mxu1 %v2664_v4  ;;  %v2808_v4 = vpack.c.bf16 %v1410_v40, %v1408_v59  ;;  %v2688_v17 = vpack.c.bf16 %v568_v10, %v564_v6  ;;  %v2826_v59 = vpack.c.bf16 %v1431_v53, %v1429_v52  ;;  %v1428_v40 = vld [vmem:[#allocation10 + $0x1a0] sm:$0xff]  ;;  %v1435_v2 = vld [vmem:[#allocation10 + $0x1d8] sm:$0xff]  ;;  %v1434_v53 = vld [vmem:[#allocation10 + $0x1d0] sm:$0xff] }
 0x1df   :  { %2667 = vmatprep.subr.bf16.mxu1 %v2666_v8  ;;  %v1414_v8 = vld [vmem:[#allocation10 + $0x130] sm:$0xff]  ;;  %v1432_v52 = vld [vmem:[#allocation10 + $0x1c0] sm:$0xff] }
 0x1e0   :  { %2793 = vmatpush1.bf16.msra.mxu0 %v2792_v15  ;;  %v577_v15 = vld [vmem:[#allocation7 + $0xaf8] sm:$0xff] }
 0x1e1   :  { %2795 = vmatprep.subr.bf16.mxu0 %v2794_v18  ;;  %v572_v18 = vld [vmem:[#allocation7 + $0xad0] sm:$0xff]  ;;  %v2690_v21 = vpack.c.bf16 %v577_v15, %v573_v14  ;;  %v605_v3 = vld [vmem:[#allocation7 + $0xbd8] sm:$0xff] }
 0x1e2   :  { %2669 = vmatpush1.bf16.msra.mxu1 %v2668_v16  ;;  %v2812_v16 = vpack.c.bf16 %v1414_v8, %v1412_v7  ;;  %v2692_v29 = vpack.c.bf16 %v576_v22, %v572_v18  ;;  %v604_v8 = vld [vmem:[#allocation7 + $0xbd0] sm:$0xff]  ;;  %v613_v10 = vld [vmem:[#allocation7 + $0xc18] sm:$0xff] }
 0x1e3   :  { %2671 = vmatprep.subr.bf16.mxu1 %v2670_v25  ;;  %v1418_v25 = vld [vmem:[#allocation10 + $0x150] sm:$0xff] }
 0x1e4   :  { %2797 = vmatpush1.bf16.msra.mxu0 %v2796_v27  ;;  %v585_v27 = vld [vmem:[#allocation7 + $0xb38] sm:$0xff]  ;;  %v612_v15 = vld [vmem:[#allocation7 + $0xc10] sm:$0xff] }
 0x1e5   :  { %2799 = vmatprep.subr.bf16.mxu0 %v2798_v30  ;;  %v580_v30 = vld [vmem:[#allocation7 + $0xb10] sm:$0xff]  ;;  %v2694_v35 = vpack.c.bf16 %v585_v27, %v581_v26  ;;  %v617_v12 = vld [vmem:[#allocation7 + $0xc38] sm:$0xff] }
 0x1e6   :  { %2673 = vmatpush1.bf16.msra.mxu1 %v2672_v28  ;;  %v2816_v28 = vpack.c.bf16 %v1418_v25, %v1416_v20  ;;  %v2696_v43 = vpack.c.bf16 %v584_v36, %v580_v30  ;;  %v2710_v14 = vpack.c.bf16 %v617_v12, %v613_v10  ;;  %v625_v18 = vld [vmem:[#allocation7 + $0xc78] sm:$0xff]  ;;  %v620_v25 = vld [vmem:[#allocation7 + $0xc50] sm:$0xff] }
 0x1e7   :  { %2675 = vmatprep.subr.bf16.mxu1 %v2674_v32  ;;  %v1422_v32 = vld [vmem:[#allocation10 + $0x170] sm:$0xff] }
 0x1e8   :  { %2801 = vmatpush1.bf16.msra.mxu0 %v2800_v39  ;;  %v593_v39 = vld [vmem:[#allocation7 + $0xb78] sm:$0xff]  ;;  %v628_v27 = vld [vmem:[#allocation7 + $0xc90] sm:$0xff] }
 0x1e9   :  { %2803 = vmatprep.subr.bf16.mxu0 %v2802_v44  ;;  %v588_v44 = vld [vmem:[#allocation7 + $0xb50] sm:$0xff]  ;;  %v2698_v49 = vpack.c.bf16 %v593_v39, %v589_v38  ;;  %v629_v22 = vld [vmem:[#allocation7 + $0xc98] sm:$0xff] }
 0x1ea   :  { %2677 = vmatpush1.bf16.msra.mxu1 %v2676_v42  ;;  %v2820_v42 = vpack.c.bf16 %v1422_v32, %v1420_v34  ;;  %v2700_v57 = vpack.c.bf16 %v592_v50, %v588_v44  ;;  %v633_v23 = vld [vmem:[#allocation7 + $0xcb8] sm:$0xff]  ;;  %v636_v32 = vld [vmem:[#allocation7 + $0xcd0] sm:$0xff] }
 0x1eb   :  { %2679 = vmatprep.subr.bf16.mxu1 %v2678_v48  ;;  %v1426_v48 = vld [vmem:[#allocation10 + $0x190] sm:$0xff]  ;;  %v2718_v26 = vpack.c.bf16 %v633_v23, %v629_v22 }
 0x1ec   :  { %2805 = vmatpush1.bf16.msra.mxu0 %v2804_v55  ;;  %v601_v55 = vld [vmem:[#allocation7 + $0xbb8] sm:$0xff]  ;;  %v644_v38 = vld [vmem:[#allocation7 + $0xd10] sm:$0xff] }
 0x1ed   :  { %2807 = vmatprep.subr.bf16.mxu0 %v2806_v58  ;;  %v596_v58 = vld [vmem:[#allocation7 + $0xb90] sm:$0xff]  ;;  %v2702_v63 = vpack.c.bf16 %v601_v55, %v597_v54  ;;  %v641_v30 = vld [vmem:[#allocation7 + $0xcf8] sm:$0xff] }
 0x1ee   :  { %2681 = vmatpush1.bf16.msra.mxu1 %v2680_v56  ;;  %v2824_v56 = vpack.c.bf16 %v1426_v48, %v1424_v51  ;;  %v2704_v6 = vpack.c.bf16 %v600_v0, %v596_v58  ;;  %v645_v36 = vld [vmem:[#allocation7 + $0xd18] sm:$0xff]  ;;  %v656_v51 = vld [vmem:[#allocation7 + $0xd70] sm:$0xff] }
 0x1ef   :  { %2683 = vmatprep.subr.bf16.mxu1 %v2682_v62  ;;  %v1430_v62 = vld [vmem:[#allocation10 + $0x1b0] sm:$0xff]  ;;  %v1439_v0 = vld [vmem:[#allocation10 + $0x1f8] sm:$0xff] }
 0x1f0   :  { %2809 = vmatpush1.bf16.msra.mxu0 %v2808_v4  ;;  %v609_v4 = vld [vmem:[#allocation7 + $0xbf8] sm:$0xff]  ;;  %v660_v55 = vld [vmem:[#allocation7 + $0xd90] sm:$0xff] }
 0x1f1   :  { %2811 = vmatprep.subr.bf16.mxu0 %v2810_v33  ;;  %v2830_v33 = vpack.c.bf16 %v1435_v2, %v1433_v1  ;;  %v2706_v7 = vpack.c.bf16 %v609_v4, %v605_v3  ;;  %v649_v37 = vld [vmem:[#allocation7 + $0xd38] sm:$0xff]  ;;  %v1436_v3 = vld [vmem:[#allocation10 + $0x1e0] sm:$0xff]  ;;  %v688_v22 = vld [vmem:[#allocation7 + $0xe70] sm:$0xff] }
 0x1f2   :  { %2685 = vmatpush1.bf16.msra.mxu1 %v2684_v5  ;;  %v2828_v5 = vpack.c.bf16 %v1430_v62, %v1428_v40  ;;  %v2726_v41 = vpack.c.bf16 %v649_v37, %v645_v36  ;;  %v653_v39 = vld [vmem:[#allocation7 + $0xd58] sm:$0xff]  ;;  %v704_v36 = vld [vmem:[#allocation7 + $0xef0] sm:$0xff] }
 0x1f3   :  { %2687 = vmatprep.subr.bf16.mxu1 %v2686_v9  ;;  %v608_v9 = vld [vmem:[#allocation7 + $0xbf0] sm:$0xff]  ;;  %v661_v48 = vld [vmem:[#allocation7 + $0xd98] sm:$0xff] }
 0x1f4   :  { %2813 = vmatpush1.bf16.msra.mxu0 %v2812_v16  ;;  %v2708_v13 = vpack.c.bf16 %v608_v9, %v604_v8  ;;  %v616_v16 = vld [vmem:[#allocation7 + $0xc30] sm:$0xff]  ;;  %v673_v40 = vld [vmem:[#allocation7 + $0xdf8] sm:$0xff] }
 0x1f5   :  { %2815 = vmatprep.subr.bf16.mxu0 %v2814_v19  ;;  %v2712_v19 = vpack.c.bf16 %v616_v16, %v612_v15  ;;  %v1438_v4 = vld [vmem:[#allocation10 + $0x1f0] sm:$0xff] }
 0x1f6   :  { %2689 = vmatpush1.bf16.msra.mxu1 %v2688_v17  ;;  %v621_v17 = vld [vmem:[#allocation7 + $0xc58] sm:$0xff] }
 0x1f7   :  { %2691 = vmatprep.subr.bf16.mxu1 %v2690_v21  ;;  %v2714_v20 = vpack.c.bf16 %v625_v18, %v621_v17  ;;  %v624_v21 = vld [vmem:[#allocation7 + $0xc70] sm:$0xff]  ;;  %v677_v8 = vld [vmem:[#allocation7 + $0xe18] sm:$0xff] }
 0x1f8   :  { %2817 = vmatpush1.bf16.msra.mxu0 %v2816_v28  ;;  %v2716_v24 = vpack.c.bf16 %v624_v21, %v620_v25  ;;  %v632_v28 = vld [vmem:[#allocation7 + $0xcb0] sm:$0xff]  ;;  %v681_v9 = vld [vmem:[#allocation7 + $0xe38] sm:$0xff] }
 0x1f9   :  { %2819 = vmatprep.subr.bf16.mxu0 %v2818_v31  ;;  %v2720_v31 = vpack.c.bf16 %v632_v28, %v628_v27  ;;  %v2742_v12 = vpack.c.bf16 %v681_v9, %v677_v8  ;;  %v685_v15 = vld [vmem:[#allocation7 + $0xe58] sm:$0xff]  ;;  %v1441_v17 = vld [vmem:[#allocation10 + $0x208] sm:$0xff] }
 0x1fa   :  { %2693 = vmatpush1.bf16.msra.mxu1 %v2692_v29  ;;  %v637_v29 = vld [vmem:[#allocation7 + $0xcd8] sm:$0xff]  ;;  %v684_v21 = vld [vmem:[#allocation7 + $0xe50] sm:$0xff] }
 0x1fb   :  { %2695 = vmatprep.subr.bf16.mxu1 %v2694_v35  ;;  %v2722_v34 = vpack.c.bf16 %v641_v30, %v637_v29  ;;  %v640_v35 = vld [vmem:[#allocation7 + $0xcf0] sm:$0xff]  ;;  %v689_v16 = vld [vmem:[#allocation7 + $0xe78] sm:$0xff] }
 0x1fc   :  { %2821 = vmatpush1.bf16.msra.mxu0 %v2820_v42  ;;  %v657_v42 = vld [vmem:[#allocation7 + $0xd78] sm:$0xff]  ;;  %v2746_v25 = vpack.c.bf16 %v689_v16, %v685_v15  ;;  %v692_v28 = vld [vmem:[#allocation7 + $0xe90] sm:$0xff] }
 0x1fd   :  { %2823 = vmatprep.subr.bf16.mxu0 %v2822_v45  ;;  %v2730_v44 = vpack.c.bf16 %v657_v42, %v653_v39  ;;  %v652_v45 = vld [vmem:[#allocation7 + $0xd50] sm:$0xff]  ;;  %v1443_v18 = vld [vmem:[#allocation10 + $0x218] sm:$0xff] }
 0x1fe   :  { %2697 = vmatpush1.bf16.msra.mxu1 %v2696_v43  ;;  %v2732_v50 = vpack.c.bf16 %v656_v51, %v652_v45  ;;  %v693_v23 = vld [vmem:[#allocation7 + $0xe98] sm:$0xff]  ;;  %v696_v29 = vld [vmem:[#allocation7 + $0xeb0] sm:$0xff] }
 0x1ff   :  { %2699 = vmatprep.subr.bf16.mxu1 %v2698_v49  ;;  %v665_v49 = vld [vmem:[#allocation7 + $0xdb8] sm:$0xff]  ;;  %v712_v39 = vld [vmem:[#allocation7 + $0xf30] sm:$0xff] }
 0x200   :  { %2825 = vmatpush1.bf16.msra.mxu0 %v2824_v56  ;;  %v2734_v54 = vpack.c.bf16 %v665_v49, %v661_v48  ;;  %v664_v56 = vld [vmem:[#allocation7 + $0xdb0] sm:$0xff]  ;;  %v701_v30 = vld [vmem:[#allocation7 + $0xed8] sm:$0xff] }
 0x201   :  { %2827 = vmatprep.subr.bf16.mxu0 %v2826_v59  ;;  %v669_v59 = vld [vmem:[#allocation7 + $0xdd8] sm:$0xff]  ;;  %v2736_v1 = vpack.c.bf16 %v664_v56, %v660_v55  ;;  %v716_v51 = vld [vmem:[#allocation7 + $0xf50] sm:$0xff] }
 0x202   :  { %2701 = vmatpush1.bf16.msra.mxu1 %v2700_v57  ;;  %v2832_v57 = vpack.c.bf16 %v1434_v53, %v1432_v52  ;;  %v709_v37 = vld [vmem:[#allocation7 + $0xf18] sm:$0xff]  ;;  %v720_v48 = vld [vmem:[#allocation7 + $0xf70] sm:$0xff] }
 0x203   :  { %2703 = vmatprep.subr.bf16.mxu1 %v2702_v63  ;;  %v1437_v63 = vld [vmem:[#allocation10 + $0x1e8] sm:$0xff]  ;;  %v717_v42 = vld [vmem:[#allocation7 + $0xf58] sm:$0xff]  ;;  %v2764_v52 = vpack.c.bf16 %v720_v48, %v716_v51 }
 0x204   :  { %2829 = vmatpush1.bf16.msra.mxu0 %v2828_v5  ;;  %v2834_v2 = vpack.c.bf16 %v1439_v0, %v1437_v63  ;;  %v2738_v5 = vpack.c.bf16 %v673_v40, %v669_v59  ;;  %v725_v49 = vld [vmem:[#allocation7 + $0xf98] sm:$0xff]  ;;  %v728_v55 = vld [vmem:[#allocation7 + $0xfb0] sm:$0xff] }
 0x205   :  { %2831 = vmatprep.subr.bf16.mxu0 %v2830_v33  ;;  %v672_v33 = vld [vmem:[#allocation7 + $0xdf0] sm:$0xff]  ;;  %v733_v56 = vld [vmem:[#allocation7 + $0xfd8] sm:$0xff] }
 0x206   :  { %2705 = vmatpush1.bf16.msra.mxu1 %v2704_v6  ;;  %v668_v6 = vld [vmem:[#allocation7 + $0xdd0] sm:$0xff]  ;;  %v1447_v15 = vld [vmem:[#allocation10 + $0x238] sm:$0xff] }
 0x207   :  { %2707 = vmatprep.subr.bf16.mxu1 %v2706_v7  ;;  %v2836_v7 = vpack.c.bf16 %v1438_v4, %v1436_v3  ;;  %v2740_v10 = vpack.c.bf16 %v672_v33, %v668_v6  ;;  %v732_v63 = vld [vmem:[#allocation7 + $0xfd0] sm:$0xff]  ;;  %v3699_v3 = vld [vmem:[#allocation8] sm:$0xf]  ;;  %v746_v4 = vsub.s32 1, %v3640_v61 }
 0x208   :  { %2833 = vmatpush1.bf16.msra.mxu0 %v2832_v57  ;;  %v737_v57 = vld [vmem:[#allocation7 + $0xff8] sm:$0xff]  ;;  %v736_v0 = vld [vmem:[#allocation7 + $0xff0] sm:$0xff] }
 0x209   :  { %2835 = vmatprep.subr.bf16.mxu0 %v2834_v2  ;;  %v2770_v40 = vpack.c.bf16 %v737_v57, %v733_v56  ;;  %v742_v2 = vsub.s32 0, %v3640_v61  ;;  %v747_v6 = vrot.slane %v3699_v3, %v746_v4  ;;  %v1468_v56 = vld [vmem:[#allocation10 + $0x2e0] sm:$0xff]  ;;  %v1470_v57 = vld [vmem:[#allocation10 + $0x2f0] sm:$0xff] }
 0x20a   :  { %2709 = vmatpush1.bf16.msra.mxu1 %v2708_v13  ;;  %v676_v13 = vld [vmem:[#allocation7 + $0xe10] sm:$0xff] }
 0x20b   :  { %2711 = vmatprep.subr.bf16.mxu1 %v2710_v14  ;;  %v680_v14 = vld [vmem:[#allocation7 + $0xe30] sm:$0xff] }
 0x20c   :  { %2837 = vmatpush1.bf16.msra.mxu0 %v2836_v7 }
 0x20d   :  { %1295 = vmatmul.mubr.f32.vlgmr.msra.gmra.mrb[2].mxu1 %v3668_v47  ;;  %v2724_v47 = vpack.c.bf16 %v640_v35, %v636_v32  ;;  %v700_v35 = vld [vmem:[#allocation7 + $0xed0] sm:$0xff] }
 0x20e   :  { %2713 = vmatpush1.bf16.msra.mxu1 %v2712_v19  ;;  %1365 = vmatprep.mubr.f32.mxu1 %v3682_v11  ;;  %v648_v11 = vld [vmem:[#allocation7 + $0xd30] sm:$0xff]  ;;  %v2838_v19 = vpack.c.bf16 %v1443_v18, %v1441_v17 }
 0x20f   :  { %2715 = vmatprep.subr.bf16.mxu1 %v2714_v20  ;;  %v2728_v43 = vpack.c.bf16 %v648_v11, %v644_v38  ;;  %v2744_v20 = vpack.c.bf16 %v680_v14, %v676_v13  ;;  %v708_v11 = vld [vmem:[#allocation7 + $0xf10] sm:$0xff] }
 0x210   :  { %2839 = vmatprep.subr.bf16.mxu0 %v2838_v19  ;;  %v1445_v14 = vld [vmem:[#allocation10 + $0x228] sm:$0xff] }
 0x211   :  { %v2842_v19 = vpack.c.bf16 %v1447_v15, %v1445_v14  ;;  %v1480_v15 = vld [vmem:[#allocation10 + $0x340] sm:$0xff] }
 0x212   :  { %2717 = vmatpush1.bf16.msra.mxu1 %v2716_v24  ;;  %v697_v24 = vld [vmem:[#allocation7 + $0xeb8] sm:$0xff] }
 0x213   :  { %2719 = vmatprep.subr.bf16.mxu1 %v2718_v26  ;;  %v2748_v26 = vpack.c.bf16 %v688_v22, %v684_v21  ;;  %v2750_v27 = vpack.c.bf16 %v697_v24, %v693_v23  ;;  %v1449_v21 = vld [vmem:[#allocation10 + $0x248] sm:$0xff]  ;;  %v1451_v22 = vld [vmem:[#allocation10 + $0x258] sm:$0xff]  ;;  %v1448_v23 = vld [vmem:[#allocation10 + $0x240] sm:$0xff] }
 0x214   :  { %v1450_v24 = vld [vmem:[#allocation10 + $0x250] sm:$0xff] }
 0x216   :  { %2721 = vmatpush1.bf16.msra.mxu1 %v2720_v31  ;;  %v705_v31 = vld [vmem:[#allocation7 + $0xef8] sm:$0xff] }
 0x217   :  { %2723 = vmatprep.subr.bf16.mxu1 %v2722_v34  ;;  %v2752_v34 = vpack.c.bf16 %v696_v29, %v692_v28  ;;  %v2754_v32 = vpack.c.bf16 %v705_v31, %v701_v30  ;;  %v2848_v28 = vpack.c.bf16 %v1450_v24, %v1448_v23  ;;  %v1452_v30 = vld [vmem:[#allocation10 + $0x260] sm:$0xff]  ;;  %v1454_v31 = vld [vmem:[#allocation10 + $0x270] sm:$0xff] }
 0x218   :  { %v1488_v24 = vld [vmem:[#allocation10 + $0x380] sm:$0xff] }
 0x21a   :  { %2725 = vmatpush1.bf16.msra.mxu1 %v2724_v47  ;;  %v713_v47 = vld [vmem:[#allocation7 + $0xf38] sm:$0xff] }
 0x21b   :  { %2727 = vmatprep.subr.bf16.mxu1 %v2726_v41  ;;  %v2756_v41 = vpack.c.bf16 %v704_v36, %v700_v35  ;;  %v2758_v38 = vpack.c.bf16 %v713_v47, %v709_v37  ;;  %v2852_v35 = vpack.c.bf16 %v1454_v31, %v1452_v30  ;;  %v1456_v37 = vld [vmem:[#allocation10 + $0x280] sm:$0xff]  ;;  %v1458_v47 = vld [vmem:[#allocation10 + $0x290] sm:$0xff] }
 0x21c   :  { %v1492_v31 = vld [vmem:[#allocation10 + $0x3a0] sm:$0xff] }
 0x21e   :  { %2729 = vmatpush1.bf16.msra.mxu1 %v2728_v43  ;;  %v721_v43 = vld [vmem:[#allocation7 + $0xf78] sm:$0xff] }
 0x21f   :  { %2731 = vmatprep.subr.bf16.mxu1 %v2730_v44  ;;  %v2760_v44 = vpack.c.bf16 %v712_v39, %v708_v11  ;;  %v2762_v45 = vpack.c.bf16 %v721_v43, %v717_v42  ;;  %v2856_v11 = vpack.c.bf16 %v1458_v47, %v1456_v37  ;;  %v1460_v42 = vld [vmem:[#allocation10 + $0x2a0] sm:$0xff]  ;;  %v1462_v43 = vld [vmem:[#allocation10 + $0x2b0] sm:$0xff] }
 0x220   :  { %v3693_v58 = vpop.f32.mrb[0].mxu1  ;;  %v2860_v51 = vpack.c.bf16 %v1462_v43, %v1460_v42  ;;  %v1496_v47 = vld [vmem:[#allocation10 + $0x3c0] sm:$0xff] }
 0x221   :  { %v3695_v62 = vpop.f32.mrb[1].mxu1  ;;  %v1500_v43 = vld [vmem:[#allocation10 + $0x3e0] sm:$0xff] }
 0x222   :  { %2733 = vmatpush1.bf16.msra.mxu1 %v2732_v50  ;;  %v729_v50 = vld [vmem:[#allocation7 + $0xfb8] sm:$0xff]  ;;  %v873_v7 = vadd.f32 %v3695_v62, %v747_v6  ;;  %v2846_v62 = vpack.c.bf16 %v1451_v22, %v1449_v21  ;;  %v1477_v6 = vld [vmem:[#allocation10 + $0x328] sm:$0xff] }
 0x223   :  { %2735 = vmatprep.subr.bf16.mxu1 %v2734_v54  ;;  %v2766_v53 = vpack.c.bf16 %v729_v50, %v725_v49  ;;  %v724_v54 = vld [vmem:[#allocation7 + $0xf90] sm:$0xff]  ;;  %v1464_v49 = vld [vmem:[#allocation10 + $0x2c0] sm:$0xff] }
 0x224   :  { %v2768_v59 = vpack.c.bf16 %v728_v55, %v724_v54  ;;  %v1466_v50 = vld [vmem:[#allocation10 + $0x2d0] sm:$0xff]  ;;  %v1489_v22 = vld [vmem:[#allocation10 + $0x388] sm:$0xff] }
 0x225   :  { %v2864_v54 = vpack.c.bf16 %v1466_v50, %v1464_v49  ;;  %v1486_v21 = vld [vmem:[#allocation10 + $0x370] sm:$0xff]  ;;  %v750_v50 = vsub.s32 2, %v3640_v61 }
 0x226   :  { %2737 = vmatpush1.bf16.msra.mxu1 %v2736_v1  ;;  %v2772_v1 = vpack.c.bf16 %v736_v0, %v732_v63  ;;  %v2868_v63 = vpack.c.bf16 %v1470_v57, %v1468_v56 }
 0x227   :  { %2739 = vmatprep.subr.bf16.mxu1 %v2738_v5  ;;  %v743_v5 = vrot.slane %v3699_v3, %v742_v2 }
 0x229   :  { %v871_v33 = vadd.f32 %v3693_v58, %v743_v5  ;;  %v1474_v5 = vld [vmem:[#allocation10 + $0x310] sm:$0xff] }
 0x22a   :  { %2741 = vmatpush1.bf16.msra.mxu1 %v2740_v10  ;;  %v1440_v10 = vld [vmem:[#allocation10 + $0x200] sm:$0xff] }
 0x22b   :  { %2743 = vmatprep.subr.bf16.mxu1 %v2742_v12  ;;  %v1442_v12 = vld [vmem:[#allocation10 + $0x210] sm:$0xff] }
 0x22c   :  { %v2840_v17 = vpack.c.bf16 %v1442_v12, %v1440_v10  ;;  %v1481_v10 = vld [vmem:[#allocation10 + $0x348] sm:$0xff]  ;;  %v1483_v12 = vld [vmem:[#allocation10 + $0x358] sm:$0xff] }
 0x22d   :  { %v2878_v14 = vpack.c.bf16 %v1483_v12, %v1481_v10 }
 0x22e   :  { %2745 = vmatpush1.bf16.msra.mxu1 %v2744_v20  ;;  %v1444_v20 = vld [vmem:[#allocation10 + $0x220] sm:$0xff] }
 0x22f   :  { %2747 = vmatprep.subr.bf16.mxu1 %v2746_v25  ;;  %v1446_v25 = vld [vmem:[#allocation10 + $0x230] sm:$0xff] }
 0x230   :  { %v2844_v58 = vpack.c.bf16 %v1446_v25, %v1444_v20  ;;  %v1484_v25 = vld [vmem:[#allocation10 + $0x360] sm:$0xff] }
 0x232   :  { %2749 = vmatpush1.bf16.msra.mxu1 %v2748_v26  ;;  %v1453_v26 = vld [vmem:[#allocation10 + $0x268] sm:$0xff] }
 0x233   :  { %2751 = vmatprep.subr.bf16.mxu1 %v2750_v27  ;;  %v1455_v27 = vld [vmem:[#allocation10 + $0x278] sm:$0xff] }
 0x234   :  { %v2850_v29 = vpack.c.bf16 %v1455_v27, %v1453_v26  ;;  %v1490_v26 = vld [vmem:[#allocation10 + $0x390] sm:$0xff]  ;;  %v1493_v27 = vld [vmem:[#allocation10 + $0x3a8] sm:$0xff] }
 0x236   :  { %2753 = vmatpush1.bf16.msra.mxu1 %v2752_v34  ;;  %v1457_v34 = vld [vmem:[#allocation10 + $0x288] sm:$0xff] }
 0x237   :  { %2755 = vmatprep.subr.bf16.mxu1 %v2754_v32  ;;  %v1459_v32 = vld [vmem:[#allocation10 + $0x298] sm:$0xff] }
 0x238   :  { %v2854_v36 = vpack.c.bf16 %v1459_v32, %v1457_v34  ;;  %v1494_v34 = vld [vmem:[#allocation10 + $0x3b0] sm:$0xff]  ;;  %v1497_v32 = vld [vmem:[#allocation10 + $0x3c8] sm:$0xff] }
 0x23a   :  { %2757 = vmatpush1.bf16.msra.mxu1 %v2756_v41  ;;  %v1461_v41 = vld [vmem:[#allocation10 + $0x2a8] sm:$0xff] }
 0x23b   :  { %2759 = vmatprep.subr.bf16.mxu1 %v2758_v38  ;;  %v1463_v38 = vld [vmem:[#allocation10 + $0x2b8] sm:$0xff] }
 0x23c   :  { %v2858_v39 = vpack.c.bf16 %v1463_v38, %v1461_v41  ;;  %v1498_v41 = vld [vmem:[#allocation10 + $0x3d0] sm:$0xff]  ;;  %v1501_v38 = vld [vmem:[#allocation10 + $0x3e8] sm:$0xff] }
 0x23e   :  { %2761 = vmatpush1.bf16.msra.mxu1 %v2760_v44  ;;  %v1465_v44 = vld [vmem:[#allocation10 + $0x2c8] sm:$0xff] }
 0x23f   :  { %2763 = vmatprep.subr.bf16.mxu1 %v2762_v45  ;;  %v1467_v45 = vld [vmem:[#allocation10 + $0x2d8] sm:$0xff] }
 0x240   :  { %v2862_v48 = vpack.c.bf16 %v1467_v45, %v1465_v44  ;;  %v1502_v44 = vld [vmem:[#allocation10 + $0x3f0] sm:$0xff] }
 0x241   :  { %v1676_v45 = vld [vmem:[%s3857_s6 + $0x80] sm:$0xff] }
 0x242   :  { %2765 = vmatpush1.bf16.msra.mxu1 %v2764_v52  ;;  %v1469_v52 = vld [vmem:[#allocation10 + $0x2e8] sm:$0xff] }
 0x243   :  { %2767 = vmatprep.subr.bf16.mxu1 %v2766_v53  ;;  %v1471_v53 = vld [vmem:[#allocation10 + $0x2f8] sm:$0xff] }
 0x244   :  { %v2866_v55 = vpack.c.bf16 %v1471_v53, %v1469_v52  ;;  %v754_v52 = vsub.s32 3, %v3640_v61  ;;  %v751_v53 = vrot.slane %v3699_v3, %v750_v50 }
 0x246   :  { %2769 = vmatpush1.bf16.msra.mxu1 %v2768_v59  ;;  %v1473_v59 = vld [vmem:[#allocation10 + $0x308] sm:$0xff] }
 0x247   :  { %2771 = vmatprep.subr.bf16.mxu1 %v2770_v40  ;;  %v1475_v40 = vld [vmem:[#allocation10 + $0x318] sm:$0xff] }
 0x248   :  { %v2870_v0 = vpack.c.bf16 %v1475_v40, %v1473_v59  ;;  %v1660_v59 = vld [vmem:[%s3857_s6] sm:$0xff]  ;;  %v1661_v40 = vld [vmem:[%s3857_s6 + $0x8] sm:$0xff] }
 0x24a   :  { %2773 = vmatpush1.bf16.msra.mxu1 %v2772_v1  ;;  %v1472_v1 = vld [vmem:[#allocation10 + $0x300] sm:$0xff] }
 0x24d   :  { %1366 = vmatmul.mubr.f32.vlgmr.msra.gmra.mrb[2].mxu1 %v3678_v60 }
 0x2a2   :  { %v1083_v8 = vpop.f32.mrb[0].mxu0 }
 0x2a3   :  { %v2953_v60 = vadd.f32 %v1083_v8, %v871_v33  ;;  %v1085_v9 = vpop.f32.mrb[1].mxu0  ;;  %v1479_v33 = vld [vmem:[#allocation10 + $0x338] sm:$0xff] }
 0x2a4   :  { %v2955_v13 = vadd.f32 %v1085_v9, %v873_v7  ;;  %v2872_v7 = vpack.c.bf16 %v1474_v5, %v1472_v1  ;;  %v2874_v8 = vpack.c.bf16 %v1479_v33, %v1477_v6  ;;  %v1478_v9 = vld [vmem:[#allocation10 + $0x330] sm:$0xff]  ;;  %v2904_v5 = vpack.c.bf16 %v1661_v40, %v1660_v59 }
 0x2a5   :  { %v1372_v18 = vmax.f32 %v2953_v60, 0.0  ;;  %v1476_v60 = vld [vmem:[#allocation10 + $0x320] sm:$0xff] }
 0x2a6   :  { %v1373_v16 = vmax.f32 %v2955_v13, 0.0  ;;  %v2876_v13 = vpack.c.bf16 %v1478_v9, %v1476_v60  ;;  %v1680_v60 = vld [vmem:[%s3857_s6 + $0xa0] sm:$0xff]  ;;  %v1681_v9 = vld [vmem:[%s3857_s6 + $0xa8] sm:$0xff] }
 0x2a7   :  { %v2910_v12 = vpack.c.bf16 %v1681_v9, %v1680_v60  ;;  %v3382_v9 = vmov 0.0  }
 0x2a8   :  { %1580 = vmatprep.mubr.f32.mxu0 %v1373_v16  ;;  %v1482_v16 = vld [vmem:[#allocation10 + $0x350] sm:$0xff]  ;;  %2237 = vmatprep.mubr.msk.f32.mxu1 %vm3381_vm1, %v3382_v9  ;;  %2091 = vst [vmem:[#allocation25] sm:$0x3] %v3382_v9 }
 0x2a9   :  { %1581 = vmatmul.mubr.f32.vlgmr.msra.gmra.mrb[2].mxu0 %v1372_v18  ;;  %v1487_v18 = vld [vmem:[#allocation10 + $0x378] sm:$0xff] }
 0x2aa   :  { %2841 = vmatpush1.bf16.msra.mxu0 %v2840_v17  ;;  %v1485_v17 = vld [vmem:[#allocation10 + $0x368] sm:$0xff] }
 0x2ab   :  { %2843 = vmatprep.subr.bf16.mxu0 %v2842_v19  ;;  %v2880_v19 = vpack.c.bf16 %v1482_v16, %v1480_v15  ;;  %v2882_v20 = vpack.c.bf16 %v1487_v18, %v1485_v17  ;;  %v1682_v15 = vld [vmem:[%s3857_s6 + $0xb0] sm:$0xff]  ;;  %v1683_v16 = vld [vmem:[%s3857_s6 + $0xb8] sm:$0xff] }
 0x2ac   :  { %v2914_v18 = vpack.c.bf16 %v1683_v16, %v1682_v15  ;;  %v2170_v15 = vld [vmem:[#allocation14] ss:$0 sm:$0xff] }
 0x2ae   :  { %2845 = vmatpush1.bf16.msra.mxu0 %v2844_v58  ;;  %v1491_v58 = vld [vmem:[#allocation10 + $0x398] sm:$0xff] }
 0x2af   :  { %2847 = vmatprep.subr.bf16.mxu0 %v2846_v62  ;;  %v2884_v62 = vpack.c.bf16 %v1486_v21, %v1484_v25  ;;  %v2886_v23 = vpack.c.bf16 %v1491_v58, %v1489_v22  ;;  %v1684_v25 = vld [vmem:[%s3857_s6 + $0xc0] sm:$0xff]  ;;  %v1685_v21 = vld [vmem:[%s3857_s6 + $0xc8] sm:$0xff] }
 0x2b0   :  { %v2918_v58 = vpack.c.bf16 %v1685_v21, %v1684_v25 }
 0x2b2   :  { %2849 = vmatpush1.bf16.msra.mxu0 %v2848_v28  ;;  %v1495_v28 = vld [vmem:[#allocation10 + $0x3b8] sm:$0xff] }
 0x2b3   :  { %2851 = vmatprep.subr.bf16.mxu0 %v2850_v29  ;;  %v2888_v29 = vpack.c.bf16 %v1490_v26, %v1488_v24  ;;  %v2890_v30 = vpack.c.bf16 %v1495_v28, %v1493_v27  ;;  %v1686_v24 = vld [vmem:[%s3857_s6 + $0xd0] sm:$0xff]  ;;  %v1687_v26 = vld [vmem:[%s3857_s6 + $0xd8] sm:$0xff] }
 0x2b4   :  { %v2922_v28 = vpack.c.bf16 %v1687_v26, %v1686_v24  ;;  %v1971_v24 = vld [vmem:[%s3865_s14] sm:$0xff]  ;;  %v1972_v26 = vld [vmem:[%s3865_s14 + $0x8] sm:$0xff] }
 0x2b6   :  { %2853 = vmatpush1.bf16.msra.mxu0 %v2852_v35  ;;  %v1499_v35 = vld [vmem:[#allocation10 + $0x3d8] sm:$0xff] }
 0x2b7   :  { %2855 = vmatprep.subr.bf16.mxu0 %v2854_v36  ;;  %v2892_v36 = vpack.c.bf16 %v1494_v34, %v1492_v31  ;;  %v2894_v37 = vpack.c.bf16 %v1499_v35, %v1497_v32  ;;  %v1688_v31 = vld [vmem:[%s3857_s6 + $0xe0] sm:$0xff]  ;;  %v1689_v34 = vld [vmem:[%s3857_s6 + $0xe8] sm:$0xff] }
 0x2b8   :  { %v2926_v35 = vpack.c.bf16 %v1689_v34, %v1688_v31  ;;  %v1973_v34 = vld [vmem:[%s3865_s14 + $0x10] sm:$0xff] }
 0x2ba   :  { %2857 = vmatpush1.bf16.msra.mxu0 %v2856_v11  ;;  %v1503_v11 = vld [vmem:[#allocation10 + $0x3f8] sm:$0xff] }
 0x2bb   :  { %2859 = vmatprep.subr.bf16.mxu0 %v2858_v39  ;;  %v2896_v39 = vpack.c.bf16 %v1498_v41, %v1496_v47  ;;  %v2898_v42 = vpack.c.bf16 %v1503_v11, %v1501_v38  ;;  %v1690_v41 = vld [vmem:[%s3857_s6 + $0xf0] sm:$0xff]  ;;  %v1691_v38 = vld [vmem:[%s3857_s6 + $0xf8] sm:$0xff] }
 0x2bc   :  { %v2930_v11 = vpack.c.bf16 %v1691_v38, %v1690_v41 }
 0x2be   :  { %2861 = vmatpush1.bf16.msra.mxu0 %v2860_v51  ;;  %v1677_v51 = vld [vmem:[%s3857_s6 + $0x88] sm:$0xff] }
 0x2bf   :  { %2863 = vmatprep.subr.bf16.mxu0 %v2862_v48  ;;  %v2900_v48 = vpack.c.bf16 %v1502_v44, %v1500_v43  ;;  %v2902_v49 = vpack.c.bf16 %v1677_v51, %v1676_v45  ;;  %v1504_v44 = vld [vmem:[#allocation11] sm:$0x3] }
 0x2c0   :  { %v1509_v45 = vrot.slane %v1504_v44, %v742_v2  ;;  %v1513_v51 = vrot.slane %v1504_v44, %v746_v4 }
 0x2c2   :  { %2865 = vmatpush1.bf16.msra.mxu0 %v2864_v54  ;;  %v755_v54 = vrot.slane %v3699_v3, %v754_v52  ;;  %v1679_v3 = vld [vmem:[%s3857_s6 + $0x98] sm:$0xff] }
 0x2c3   :  { %2867 = vmatprep.subr.bf16.mxu0 %v2866_v55 }
 0x2c6   :  { %2869 = vmatpush1.bf16.msra.mxu0 %v2868_v63 }
 0x2c7   :  { %2871 = vmatprep.subr.bf16.mxu0 %v2870_v0  ;;  %v1678_v0 = vld [vmem:[%s3857_s6 + $0x90] sm:$0xff] }
 0x2c8   :  { %v2906_v33 = vpack.c.bf16 %v1679_v3, %v1678_v0 }
 0x2ca   :  { %2873 = vmatpush1.bf16.msra.mxu0 %v2872_v7  ;;  %v1662_v7 = vld [vmem:[%s3857_s6 + $0x10] sm:$0xff] }
 0x2cb   :  { %2875 = vmatprep.subr.bf16.mxu0 %v2874_v8  ;;  %v1663_v8 = vld [vmem:[%s3857_s6 + $0x18] sm:$0xff] }
 0x2cc   :  { %v2908_v10 = vpack.c.bf16 %v1663_v8, %v1662_v7  ;;  %v1802_v7 = vld [vmem:[#allocation17 + $0x10] sm:$0xff]  ;;  %v1803_v8 = vld [vmem:[#allocation17 + $0x18] sm:$0xff] }
 0x2cd   :  { %v2938_v60 = vpack.c.bf16 %v1803_v8, %v1802_v7 }
 0x2ce   :  { %2877 = vmatpush1.bf16.msra.mxu0 %v2876_v13  ;;  %v1664_v13 = vld [vmem:[%s3857_s6 + $0x20] sm:$0xff] }
 0x2cf   :  { %2879 = vmatprep.subr.bf16.mxu0 %v2878_v14  ;;  %v1665_v14 = vld [vmem:[%s3857_s6 + $0x28] sm:$0xff] }
 0x2d0   :  { %v2912_v17 = vpack.c.bf16 %v1665_v14, %v1664_v13 }
 0x2d2   :  { %2881 = vmatpush1.bf16.msra.mxu0 %v2880_v19  ;;  %v1666_v19 = vld [vmem:[%s3857_s6 + $0x30] sm:$0xff] }
 0x2d3   :  { %2883 = vmatprep.subr.bf16.mxu0 %v2882_v20  ;;  %v1667_v20 = vld [vmem:[%s3857_s6 + $0x38] sm:$0xff] }
 0x2d4   :  { %v2916_v22 = vpack.c.bf16 %v1667_v20, %v1666_v19  ;;  %v2171_v19 = vld [vmem:[#allocation16] ss:$0 sm:$0xff] }
 0x2d6   :  { %2885 = vmatpush1.bf16.msra.mxu0 %v2884_v62  ;;  %v1668_v62 = vld [vmem:[%s3857_s6 + $0x40] sm:$0xff] }
 0x2d7   :  { %2887 = vmatprep.subr.bf16.mxu0 %v2886_v23  ;;  %v1669_v23 = vld [vmem:[%s3857_s6 + $0x48] sm:$0xff] }
 0x2d8   :  { %v2920_v27 = vpack.c.bf16 %v1669_v23, %v1668_v62  ;;  %v2172_v23 = vld [vmem:[#allocation19] ss:$0 sm:$0xff] }
 0x2da   :  { %2889 = vmatpush1.bf16.msra.mxu0 %v2888_v29  ;;  %v1670_v29 = vld [vmem:[%s3857_s6 + $0x50] sm:$0xff] }
 0x2db   :  { %2891 = vmatprep.subr.bf16.mxu0 %v2890_v30  ;;  %v1671_v30 = vld [vmem:[%s3857_s6 + $0x58] sm:$0xff] }
 0x2dc   :  { %v2924_v32 = vpack.c.bf16 %v1671_v30, %v1670_v29  ;;  %v2947_v30 = vpack.c.bf16 %v1972_v26, %v1971_v24 }
 0x2de   :  { %2893 = vmatpush1.bf16.msra.mxu0 %v2892_v36  ;;  %v1672_v36 = vld [vmem:[%s3857_s6 + $0x60] sm:$0xff] }
 0x2df   :  { %2895 = vmatprep.subr.bf16.mxu0 %v2894_v37  ;;  %v1673_v37 = vld [vmem:[%s3857_s6 + $0x68] sm:$0xff] }
 0x2e0   :  { %v2928_v47 = vpack.c.bf16 %v1673_v37, %v1672_v36  ;;  %v2174_v36 = vld [vmem:[#allocation22] ss:$0 sm:$0xff] }
 0x2e2   :  { %2897 = vmatpush1.bf16.msra.mxu0 %v2896_v39  ;;  %v1674_v39 = vld [vmem:[%s3857_s6 + $0x70] sm:$0xff] }
 0x2e3   :  { %2899 = vmatprep.subr.bf16.mxu0 %v2898_v42  ;;  %v1675_v42 = vld [vmem:[%s3857_s6 + $0x78] sm:$0xff] }
 0x2e4   :  { %v2932_v43 = vpack.c.bf16 %v1675_v42, %v1674_v39 }
 0x2e6   :  { %2901 = vmatpush1.bf16.msra.mxu0 %v2900_v48 }
 0x2e7   :  { %2903 = vmatprep.subr.bf16.mxu0 %v2902_v49 }
 0x320   :  { %v1367_v55 = vpop.f32.mrb[2].mxu1 }
 0x321   :  { %v2956_v56 = vadd.f32 %v1367_v55, %v751_v53  ;;  %v1369_v57 = vpop.f32.mrb[3].mxu1 }
 0x322   :  { %v2957_v63 = vadd.f32 %v1369_v57, %v755_v54  ;;  %v2169_v57 = vld [vmem:[#allocation13] ss:$0 sm:$0xff] }
 0x323   :  { %v1374_v6 = vmax.f32 %v2956_v56, 0.0 }
 0x324   :  { %v1375_v1 = vmax.f32 %v2957_v63, 0.0 }
 0x326   :  { %1651 = vmatprep.mubr.f32.mxu0 %v1375_v1  ;;  %v1800_v1 = vld [vmem:[#allocation17] sm:$0xff] }
 0x327   :  { %1652 = vmatmul.mubr.f32.vlgmr.msra.gmra.mrb[2].mxu0 %v1374_v6 }
 0x328   :  { %2905 = vmatpush3.bf16.msra.mxu0 %v2904_v5  ;;  %v1801_v5 = vld [vmem:[#allocation17 + $0x8] sm:$0xff] }
 0x329   :  { %2907 = vmatprep.subr.bf16.mxu0 %v2906_v33  ;;  %v2935_v6 = vpack.c.bf16 %v1801_v5, %v1800_v1  ;;  %v3380_v33 = vmov 0.0|0.0  }
 0x32a   :  { %2934 = vmatprep.subr.bf16.mxu1 %v3380_v33 }
 0x32b   :  { %2936 = vmatpush3.bf16.msra.mxu1 %v2935_v6 }
 0x32c   :  { %2909 = vmatpush3.bf16.msra.mxu0 %v2908_v10  ;;  %2937 = vmatprep.subr.bf16.mxu1 %v3380_v33 }
 0x32d   :  { %2911 = vmatprep.subr.bf16.mxu0 %v2910_v12 }
 0x32f   :  { %2939 = vmatpush3.bf16.msra.mxu1 %v2938_v60 }
 0x330   :  { %2913 = vmatpush3.bf16.msra.mxu0 %v2912_v17  ;;  %2940 = vmatprep.subr.bf16.mxu1 %v3380_v33  ;;  %v1886_v17 = vld [vmem:[#allocation20] sm:$0xff] }
 0x331   :  { %2915 = vmatprep.subr.bf16.mxu0 %v2914_v18  ;;  %v1887_v18 = vld [vmem:[#allocation20 + $0x8] sm:$0xff] }
 0x332   :  { %v2941_v25 = vpack.c.bf16 %v1887_v18, %v1886_v17 }
 0x334   :  { %2917 = vmatpush3.bf16.msra.mxu0 %v2916_v22  ;;  %v1888_v22 = vld [vmem:[#allocation20 + $0x10] sm:$0xff] }
 0x335   :  { %2919 = vmatprep.subr.bf16.mxu0 %v2918_v58  ;;  %v1889_v58 = vld [vmem:[#allocation20 + $0x18] sm:$0xff] }
 0x336   :  { %v2944_v62 = vpack.c.bf16 %v1889_v58, %v1888_v22 }
 0x338   :  { %2921 = vmatpush3.bf16.msra.mxu0 %v2920_v27 }
 0x339   :  { %2923 = vmatprep.subr.bf16.mxu0 %v2922_v28 }
 0x33c   :  { %2925 = vmatpush3.bf16.msra.mxu0 %v2924_v32  ;;  %v1974_v32 = vld [vmem:[%s3865_s14 + $0x18] sm:$0xff]  ;;  %s3383_s14 = smov 124  }
 0x33d   :  { %2927 = vmatprep.subr.bf16.mxu0 %v2926_v35  ;;  %v2950_v35 = vpack.c.bf16 %v1974_v32, %v1973_v34 }
 0x340   :  { %2929 = vmatpush3.bf16.msra.mxu0 %v2928_v47 }
 0x341   :  { %2931 = vmatprep.subr.bf16.mxu0 %v2930_v11  ;;  %v2176_v11 = vld [vmem:[#allocation23] ss:$0 sm:$0xff] }
 0x344   :  { %2933 = vmatpush3.bf16.msra.mxu0 %v2932_v43 }
 0x3fa   :  { %v1653_v48 = vpop.f32.mrb[2].mxu0 }
 0x3fb   :  { %v2958_v49 = vadd.f32 %v1653_v48, %v1509_v45  ;;  %v1655_v50 = vpop.f32.mrb[3].mxu0 }
 0x3fc   :  { %v2959_v52 = vadd.f32 %v1655_v50, %v1513_v51 }
 0x3fd   :  { %v1658_v54 = vmax.f32 %v2958_v49, 0.0 }
 0x3fe   :  { %v1659_v53 = vmax.f32 %v2959_v52, 0.0 }
 0x400   :  { %1763 = vmatprep.mubr.f32.mxu0 %v1659_v53  ;;  %v2059_v53 = vld [vmem:[#allocation5] sm:$0x3] }
 0x401   :  { %1764 = vmatmul.mubr.f32.vlgmr.msra.gmra.mrb[4].mxu0 %v1658_v54 }
 0x4d4   :  { %v2211_v55 = vpop.f32.mrb[4].mxu0 }
 0x4d5   :  { %v2212_v56 = vpop.f32.mrb[5].mxu0 }
 0x4d6   :  { %v2213_v59 = vadd.f32 %v2212_v56, %v2211_v55 }
 0x4d8   :  { %v1766_v40 = vadd.f32 %v2213_v59, %v2169_v57  ;;  %v2096_v59 = vand.u32 127, %v740_v46 }
 0x4da   :  { %v1770_v63 = vsel %vm1769_vm0, %v1766_v40, 0.0 }
 0x4db   :  { %1771 = vadd.xlane.f32.xlu0 %v1770_v63 }
 0x568   :  { %v1772_v2 = vpop.xlane.xlu0 %1771 }
 0x569   :  { %v1774_v0 = vmul.f32 0.03125, %v1772_v2 }
 0x56b   :  { %v1775_v61 = vsub.f32 %v1766_v40, %v1774_v0 }
 0x56d   :  { %v1776_v4 = vmul.f32 %v1775_v61, %v1775_v61 }
 0x56f   :  { %v1777_v3 = vsel %vm1769_vm0, %v1776_v4, 0.0 }
 0x570   :  { %1778 = vadd.xlane.f32.xlu0 %v1777_v3 }
 0x5fd   :  { %v1779_v10 = vpop.xlane.xlu0 %1778 }
 0x5fe   :  { %v1780_v12 = vmul.f32 0.03125, %v1779_v10 }
 0x600   :  { %v1781_v13 = vadd.f32 1e-05, %v1780_v12 }
 0x602   :  { %3001 = vrsqrt.f32 %v1781_v13 }
 0x60c   :  { %v3002_v14 = vpop.eup %3001 }
 0x60d   :  { %v1783_v16 = vmul.f32 %v3002_v14, %v1775_v61 }
 0x60f   :  { %v1791_v20 = vmul.f32 %v2170_v15, %v1783_v16  ;;  %v2068_v15 = vmul.f32 -0.5, %v2059_v53 }
 0x611   :  { %v1799_v21 = vadd.f32 %v2171_v19, %v1791_v20  ;;  %v2069_v18 = vmul.f32 %v2068_v15, %v2059_v53 }
 0x613   :  { %2238 = vmatmul.mubr.msk.f32.vlgmr.msra.gmra.mrb[4].mxu1 %vm1811_vm2, %v1799_v21 }
 0x614   :  { %2942 = vmatpush3.bf16.msra.mxu1 %v2941_v25  ;;  %2248 = vmatprep.mubr.msk.f32.mxu1 %vm3381_vm1, %v3382_v9 }
 0x615   :  { %2943 = vmatprep.subr.bf16.mxu1 %v3380_v33 }
 0x618   :  { %2945 = vmatpush3.bf16.msra.mxu1 %v2944_v62 }
 0x619   :  { %2946 = vmatprep.subr.bf16.mxu1 %v3380_v33 }
 0x6e6   :  { %v1881_v27 = vpop.f32.mrb[4].mxu1 }
 0x6e7   :  { %v1882_v28 = vadd.f32 %v2172_v23, %v1881_v27  ;;  %v2239_v29 = vpop.f32.mrb[5].mxu1 }
 0x6e9   :  { %v1885_v31 = vmax.f32 %v1882_v28, 0.0 }
 0x6eb   :  { %2249 = vmatmul.mubr.msk.f32.vlgmr.msra.gmra.mrb[6].mxu1 %vm1811_vm2, %v1885_v31 }
 0x6ec   :  { %2948 = vmatpush3.bf16.msra.mxu1 %v2947_v30  ;;  %2259 = vmatprep.mubr.msk.f32.mxu1 %vm3381_vm1, %v3382_v9 }
 0x6ed   :  { %2949 = vmatprep.subr.bf16.mxu1 %v3380_v33 }
 0x6f0   :  { %2951 = vmatpush3.bf16.msra.mxu1 %v2950_v35 }
 0x7be   :  { %v1966_v37 = vpop.f32.mrb[6].mxu1 }
 0x7bf   :  { %v1967_v47 = vadd.f32 %v2174_v36, %v1966_v37  ;;  %v2250_v41 = vpop.f32.mrb[7].mxu1 }
 0x7c1   :  { %v1970_v38 = vmax.f32 %v1967_v47, 0.0 }
 0x7c3   :  { %2260 = vmatmul.mubr.msk.f32.vlgmr.msra.gmra.mrb[8].mxu1 %vm1811_vm2, %v1970_v38 }
 0x896   :  { %v2051_v39 = vpop.f32.mrb[8].mxu1 }
 0x897   :  { %v2052_v42 = vadd.f32 %v2176_v11, %v2051_v39  ;;  %v2261_v43 = vpop.f32.mrb[9].mxu1 }
 0x899   :  { %3003 = vtanh.f32 %v2052_v42  ;;  %v2092_v52 = vsel %vm2075_vm3, %v2052_v42, -inf }
 0x8a3   :  { %v3004_v44 = vpop.eup %3003 }
 0x8a4   :  { %v2056_v45 = vadd.f32 1.0, %v3004_v44 }
 0x8a6   :  { %v2057_v51 = vmul.f32 6.0, %v2056_v45 }
 0x8a8   :  { %v2058_v48 = vadd.f32 -10.0, %v2057_v51 }
 0x8aa   :  { %v2060_v49 = vmul.f32 1.442695, %v2058_v48 }
 0x8ac   :  { %3005 = vpow2.f32 %v2060_v49 }
 0x8b6   :  { %v3006_v50 = vpop.eup %3005 }
 0x8b7   :  { %2063 = vrot.lane.b32.xlu1 %v3006_v50, %s3383_s14 }
 0x8db   :  { %2093 = vmax.xlane.f32.xlu1 %v2092_v52 }
 0x929   :  { %v2064_v54 = vpop.permute.xlu1 %2063 }
 0x92a   :  { %v2066_v55 = vmul.f32 %v2064_v54, %v2059_v53 }
 0x92c   :  { %v2067_v56 = vadd.f32 %v2066_v55, %v2052_v42 }
 0x92e   :  { %v2117_v57 = vsel %vm2075_vm3, %v2067_v56, -inf  ;;  %3007 = vtanh.f32 %v2067_v56 }
 0x92f   :  { %2118 = vmax.xlane.f32.xlu0 %v2117_v57 }
 0x938   :  { %v3008_v60 = vpop.eup %3007 }
 0x939   :  { %v2081_v9 = vmul.f32 %v3008_v60, %v3008_v60 }
 0x93b   :  { %v2082_v10 = vsub.f32 1.0, %v2081_v9 }
 0x93d   :  { %v2083_v12 = vmax.f32 %v2082_v10, 0.0 }
 0x93f   :  { %v2084_v13 = vadd.f32 1e-06, %v2083_v12 }
 0x941   :  { %3009 = vlog2.f32 %v2084_v13 }
 0x94b   :  { %v3010_v20 = vpop.eup %3009 }
 0x94c   :  { %v2086_v58 = vmul.f32 0.6931472, %v3010_v20 }
 0x94e   :  { %v2087_v62 = vsel %vm2075_vm3, %v2086_v58, 0.0 }
 0x968   :  { %v2094_v40 = vpop.xlane.xlu1 %2093 }
 0x969   :  { %vm2097_vm4 = vcmp.eq.f32.partialorder %v2052_v42, %v2094_v40 }
 0x96a   :  { %v2098_v63 = vsel %vm2097_vm4, %v2096_v59, 4 }
 0x96b   :  { %v2099_v2 = vsel %vm2075_vm3, %v2098_v63, 2147483647 }
 0x96c   :  { %v2101_v0 = vshra.s32 %v2099_v2, 16  ;;  %v2100_v33 = vand.u32 65535, %v2099_v2 }
 0x96e   :  { %v2103_v61 = vcvt.s32.f32 %v2101_v0  ;;  %v2102_v46 = vcvt.s32.f32 %v2100_v33 }
 0x970   :  { %2104 = vmin.xlane.f32.xlu0 %v2103_v61 }
 0x9bc   :  { %v2119_v4 = vpop.xlane.xlu0 %2118 }
 0x9bd   :  { %vm2120_vm5 = vcmp.eq.f32.partialorder %v2067_v56, %v2119_v4 }
 0x9be   :  { %v2121_v3 = vsel %vm2120_vm5, %v2096_v59, 4 }
 0x9bf   :  { %v2122_v1 = vsel %vm2075_vm3, %v2121_v3, 2147483647 }
 0x9c0   :  { %v2124_v5 = vshra.s32 %v2122_v1, 16  ;;  %v2123_v14 = vand.u32 65535, %v2122_v1 }
 0x9c2   :  { %v2126_v6 = vcvt.s32.f32 %v2124_v5  ;;  %v2125_v17 = vcvt.s32.f32 %v2123_v14 }
 0x9c4   :  { %2127 = vmin.xlane.f32.xlu0 %v2126_v6 }
 0x9da   :  { %2071 = vrot.lane.b32.xlu0 %v2058_v48, %s3383_s14 }
 0x9fd   :  { %v2105_v7 = vpop.xlane.xlu0 %2104 }
 0x9fe   :  { %vm2106_vm6 = vcmp.eq.f32.partialorder %v2103_v61, %v2105_v7  ;;  %v2111_v23 = vcvt.f32.s32 %v2105_v7 }
 0x9ff   :  { %v2107_v8 = vsel %vm2106_vm6, %v2102_v46, inf }
 0xa00   :  { %2108 = vmin.xlane.f32.xlu1 %v2107_v8  ;;  %v2112_v26 = vshll.u32 %v2111_v23, 16 }
 0xa51   :  { %v2128_v16 = vpop.xlane.xlu0 %2127 }
 0xa52   :  { %vm2129_vm7 = vcmp.eq.f32.partialorder %v2126_v6, %v2128_v16  ;;  %v2134_v30 = vcvt.f32.s32 %v2128_v16 }
 0xa53   :  { %v2130_v19 = vsel %vm2129_vm7, %v2125_v17, inf }
 0xa54   :  { %2131 = vmin.xlane.f32.xlu0 %v2130_v19  ;;  %v2135_v34 = vshll.u32 %v2134_v30, 16 }
 0xa55   :  { %v2072_v25 = vpop.permute.xlu0 %2071 }
 0xa56   :  { %v2074_v21 = vsub.f32 %v2069_v18, %v2072_v25 }
 0xa58   :  { %v2076_v22 = vsel %vm2075_vm3, %v2074_v21, 0.0 }
 0xa59   :  { %2077 = vadd.xlane.f32.xlu1 %v2076_v22 }
 0xa5d   :  { %2088 = vadd.xlane.f32.xlu1 %v2087_v62 }
 0xa6e   :  { %2142 = vrot.lane.b32.xlu1 %v2058_v48, %s3384_s1 }
 0xa8d   :  { %v2109_v24 = vpop.xlane.xlu1 %2108 }
 0xa8e   :  { %v2110_v27 = vcvt.f32.s32 %v2109_v24 }
 0xa90   :  { %v2113_v28 = vadd.s32 %v2112_v26, %v2110_v27 }
 0xa92   :  { %v2114_v29 = vcvt.s32.f32 %v2113_v28 }
 0xa94   :  { %2116 = vst.msk [vmem:[#allocation25] sm:$0x3] %vm2115_vm8, %v2114_v29 }
 0xae1   :  { %v2132_v31 = vpop.xlane.xlu0 %2131 }
 0xae2   :  { %v2133_v32 = vcvt.f32.s32 %v2132_v31 }
 0xae4   :  { %v2136_v35 = vadd.s32 %v2135_v34, %v2133_v32 }
 0xae6   :  { %v2137_v36 = vcvt.s32.f32 %v2136_v35  ;;  %v2078_v37 = vpop.xlane.xlu1 %2077 }
 0xae7   :  { %v2178_v47 = vadd.f32 -3.675754, %v2078_v37 }
 0xae8   :  { %2139 = vst.msk [vmem:[#allocation25] sm:$0x3] %vm2138_vm9, %v2137_v36 }
 0xaea   :  { %v2089_v41 = vpop.xlane.xlu1 %2088 }
 0xaeb   :  { %v2090_v38 = vsub.f32 %v2178_v47, %v2089_v41 }
 0xaed   :  { %2141 = vst.msk [vmem:[#allocation25] sm:$0x3] %vm2140_vm10, %v2090_v38 }
 0xaee   :  { %v2143_v11 = vpop.permute.xlu1 %2142 }
 0xaef   :  { %2146 = vst.msk [vmem:[#allocation25] sm:$0x3] %vm2145_vm11, %v2143_v11 }
 0xaf0   :  { %3330 = shalt.err (!%p3327_p4)
}
 0xaf1   :  { %s3331_s25 = scalar_lea.hbm %s3867_s16, 32 }
 0xaf2   :  { %p3332_p5 = scmp.ne.s32.totalorder %s3867_s16, %s3331_s25  ;;  %p3335_p6 = scmp.lt.u32.totalorder %s3331_s25, %s3867_s16 }
 0xaf4   :  { %p3337_p7 = pnand %p3335_p6, %p3332_p5 }
 0xaf6   :  { %3340 = shalt.err (!%p3337_p7)
}
 0xaf7   :  { %2156 = dma.vmem_to_hbm [thread:$0]  %s2154_s30, 32, %s3867_s16, [#allocation4]  }
 0xaf8   :  { %3357 = dma.done.wait [#allocation4], 32  }
 0xaf9   :  { %3358 = vsyncadd [#allocation4], 4294967264 }
 0xafa   :  { %2160 = vsyncpa [#allocation3], 1 }
 0xafb   :  { %2161 = vsyncpa [#allocation6], 1 }
 0xafc   :  { %2162 = vsyncpa [#allocation9], 1 }
 0xafd   :  { %2163 = vsyncpa [#allocation12], 1 }
 0xafe   :  { %2164 = vsyncpa [#allocation15], 1 }
 0xaff   :  { %2165 = vsyncpa [#allocation18], 1 }
 0xb00   :  { %2166 = vsyncpa [#allocation21], 1 }
 0xb01   :  { %2167 = vsyncpa [#allocation24], 1 }
 0xb02   :  { %2168 = vsyncpa [#allocation4], 1 }

</bundles_post_ra>
